<compile_context>
chip_gen: v6e
topology: v6e:2x2x1
jax: 0.10.0
libtpu: 0.0.40
codegen_flags: <defaults>
</compile_context>

<pallas_src>
import math

import jax
import jax.numpy as jnp
from jax.experimental import pallas as pl
from jax.experimental.pallas import tpu as pltpu

# ----------------------- scaled-down model dimensions -----------------------
NCOEF = 8       # original: 23
H1 = 64         # original: 512   (TDNN conv hidden width)
D_MODEL = 128   # original: 1500  (pre-pooling embed dim)
H2 = 64         # original: 512   (post-pooling hidden width)
N_Z = 32        # original: 256
BN_EPS = 1e-5
LANES = 128     # TPU lane width; every channel dim is zero-padded to this

# Conv stack config: (kernel K, padding, Cin, Cout, apply ReLU+BN)
CONV_CFG = (
    (5, 2, NCOEF, H1, True),
    (5, 2, H1, H1, True),
    (5, 3, H1, H1, True),
    (7, 0, H1, H1, True),
    (1, 0, H1, D_MODEL, False),
)

# ---- packed weight layout: one (N_SLABS, 128, 128) bf16 array of slabs -----
_CONV_WBASE = []
_n = 0
for (_K, _p, _ci, _co, _rb) in CONV_CFG:
    _CONV_WBASE.append(_n)
    _n += _K
W_PW1_MU = _n        # post_pooling_1 weight, mu half of the pooled vector
W_PW1_SD = _n + 1    # post_pooling_1 weight, std half
W_PW2 = _n + 2       # post_pooling_2 first 1x1 conv
W_PW3 = _n + 3       # post_pooling_2 final 1x1 conv (+bias)
N_SLABS = _n + 4     # = 27

# ---- packed affine layout: one (N_AFF, 128) f32 array of rows --------------
# conv layer li uses rows 3*li (bias), 3*li+1 (BN scale), 3*li+2 (BN shift)
A_POST = 3 * len(CONV_CFG)   # 15: post1 scale, 16: post1 shift,
N_AFF = A_POST + 5           # 17: post2 scale, 18: post2 shift, 19: post3 bias


# --------------------------------- kernel -----------------------------------
def _tdnn_fused_kernel(x_ref, w_ref, a_ref, out_ref, pbuf):
    Bc = x_ref.shape[0]
    A = a_ref[...]                                   # (N_AFF, 128) f32, resident

    def conv(h, li):
        """Conv1d(+bias[+ReLU+BN affine]) as K accumulated shifted dots."""
        K, pad, _cin, _cout, relu_bn = CONV_CFG[li]
        wb = _CONV_WBASE[li]
        t_in = h.shape[0]
        t_out = t_in + 2 * pad - K + 1
        if K == 1:
            acc = jnp.dot(h.astype(jnp.bfloat16), w_ref[wb],
                          preferred_element_type=jnp.float32)
        else:
            # halo in reused VMEM scratch: zero the pad rows, store h at `pad`
            if pad > 0:
                z = jnp.zeros((pad, LANES), jnp.float32)
                pbuf[pl.ds(0, pad), :] = z
                pbuf[pl.ds(pad + t_in, pad), :] = z
            pbuf[pl.ds(pad, t_in), :] = h
            acc = jnp.zeros((t_out, LANES), jnp.float32)
            for k in range(K):                       # static unrolled taps
                acc = acc + jnp.dot(
                    pbuf[pl.ds(k, t_out), :].astype(jnp.bfloat16),
                    w_ref[wb + k], preferred_element_type=jnp.float32)
        y = acc + A[3 * li:3 * li + 1, :]
        if relu_bn:                                  # Conv -> ReLU -> BN(eval)
            y = (jnp.maximum(y, 0.0) * A[3 * li + 1:3 * li + 2, :]
                 + A[3 * li + 2:3 * li + 3, :])
        return y

    mu_rows, sd_rows = [], []
    for b in range(Bc):                              # static per-sample loop
        h = x_ref[b].astype(jnp.float32)             # (T, 128)
        for li in range(len(CONV_CFG)):
            h = conv(h, li)
        # Statistical pooling: mean + unbiased std over time (torch.std default).
        # TODO(synk): reference adds 1e-6 * randn_like noise before std; omitted
        # (nondeterministic, negligible perturbation).
        t5 = h.shape[0]
        s1 = jnp.sum(h, axis=0, keepdims=True)       # (1, 128)
        s2 = jnp.sum(h * h, axis=0, keepdims=True)   # same pass over h
        mu = s1 * (1.0 / t5)
        var = jnp.maximum(s2 - mu * s1, 0.0) * (1.0 / (t5 - 1))
        sd = jnp.sqrt(var)
        mu_rows.append(mu)
        sd_rows.append(sd)

    # Batched (M = Bc) post-pooling GEMMs.  pooled = [mu ; std] is consumed as
    # two accumulated dots, so no lane-axis concat is needed.
    mu_all = jnp.concatenate(mu_rows, axis=0).astype(jnp.bfloat16)   # (Bc,128)
    sd_all = jnp.concatenate(sd_rows, axis=0).astype(jnp.bfloat16)
    z1 = (jnp.dot(mu_all, w_ref[W_PW1_MU], preferred_element_type=jnp.float32)
          + jnp.dot(sd_all, w_ref[W_PW1_SD], preferred_element_type=jnp.float32))
    fc = jnp.maximum(z1 * A[A_POST:A_POST + 1, :]
                     + A[A_POST + 1:A_POST + 2, :], 0.0)             # BN -> ReLU
    z2 = jnp.dot(fc.astype(jnp.bfloat16), w_ref[W_PW2],
                 preferred_element_type=jnp.float32)
    h2 = jnp.maximum(z2 * A[A_POST + 2:A_POST + 3, :]
                     + A[A_POST + 3:A_POST + 4, :], 0.0)
    emb = (jnp.dot(h2.astype(jnp.bfloat16), w_ref[W_PW3],
                   preferred_element_type=jnp.float32)
           + A[A_POST + 4:A_POST + 5, :])

    # Single lane-dense (Bc, 2, 128) store: row 0 = emb(pad), row 1 = fc(pad).
    out_ref[...] = jnp.concatenate([emb[:, None, :], fc[:, None, :]], axis=1)


# ----------------------------- wrapper / launch ------------------------------
def _default_batch_block(B):
    """1 sample/grid-step on 2-TC chips (v7x), whole batch per step otherwise."""
    try:
        kind = jax.devices()[0].device_kind.lower()
    except Exception:
        kind = ""
    if ("v7" in kind or "7x" in kind) and B > 1:
        return 1
    return B


def tdnn_forward(x, params, batch_block=None):
    # x: (B, 1, ncoef, T) as in the PyTorch module (delta=False)
    x = jnp.squeeze(x, axis=1)                       # (B, ncoef, T)
    x = jnp.transpose(x, (0, 2, 1))                  # (B, T, ncoef) channels-last
    B, T, C = x.shape
    assert C <= LANES
    x = jnp.pad(x, ((0, 0), (0, 0), (0, LANES - C))).astype(jnp.float32)

    if batch_block is None:
        batch_block = _default_batch_block(B)
    Bc = batch_block
    assert B % Bc == 0

    # conv-stack time dims -> scratch halo-buffer size
    t = T
    max_tpad = 8
    for (K, pad, _ci, _co, _rb) in CONV_CFG:
        if K > 1:
            max_tpad = max(max_tpad, t + 2 * pad)
        t = t + 2 * pad - K + 1
    assert t >= 2, "time axis collapsed below 2; std undefined"
    pbuf_rows = ((max_tpad + 7) // 8) * 8

    merged = pl.pallas_call(
        _tdnn_fused_kernel,
        out_shape=jax.ShapeDtypeStruct((B, 2, LANES), jnp.float32),
        grid=(B // Bc,),
        in_specs=[
            pl.BlockSpec((Bc, T, LANES), lambda i: (i, 0, 0)),
            pl.BlockSpec((N_SLABS, LANES, LANES), lambda i: (0, 0, 0)),
            pl.BlockSpec((N_AFF, LANES), lambda i: (0, 0)),
        ],
        out_specs=pl.BlockSpec((Bc, 2, LANES), lambda i: (i, 0, 0)),
        scratch_shapes=[pltpu.VMEM((pbuf_rows, LANES), jnp.float32)],
        compiler_params=pltpu.CompilerParams(
            dimension_semantics=("parallel",)),
    )(x, params["W"], params["A"])

    # matches PyTorch (x.squeeze(-1), fc.squeeze(-1))
    emb = merged[:, 0, :N_Z]
    fc = merged[:, 1, :H2]
    return emb, fc


# --------------------------- deterministic params ---------------------------
def init_params(key):
    keys = iter(jax.random.split(key, 64))

    def nrm(shape, std):
        return (std * jax.random.normal(next(keys), shape)).astype(jnp.float32)

    W = jnp.zeros((N_SLABS, LANES, LANES), jnp.float32)
    A = jnp.zeros((N_AFF, LANES), jnp.float32)

    for li, (K, pad, cin, cout, relu_bn) in enumerate(CONV_CFG):
        wb = _CONV_WBASE[li]
        w = nrm((K, cin, cout), 1.0 / math.sqrt(K * cin))
        W = W.at[wb:wb + K, :cin, :cout].set(w)
        A = A.at[3 * li, :cout].set(nrm((cout,), 0.02))          # bias
        if relu_bn:
            gamma = 1.0 + nrm((cout,), 0.1)
            beta = nrm((cout,), 0.1)
            # eval-mode BN with running_mean=0, running_var=1 folded to affine
            A = A.at[3 * li + 1, :cout].set(gamma / jnp.sqrt(1.0 + BN_EPS))
            A = A.at[3 * li + 2, :cout].set(beta)

    # post_pooling_1: Conv1x1(2*D_MODEL -> H2, no bias) -> BN -> ReLU
    pw1 = nrm((2 * D_MODEL, H2), 1.0 / math.sqrt(2 * D_MODEL))
    W = W.at[W_PW1_MU, :, :H2].set(pw1[:D_MODEL])
    W = W.at[W_PW1_SD, :, :H2].set(pw1[D_MODEL:])
    g1 = 1.0 + nrm((H2,), 0.1)
    A = A.at[A_POST, :H2].set(g1 / jnp.sqrt(1.0 + BN_EPS))
    A = A.at[A_POST + 1, :H2].set(nrm((H2,), 0.1))

    # post_pooling_2: Conv1x1(no bias) -> BN -> ReLU -> Conv1x1(+bias)
    W = W.at[W_PW2, :H2, :H2].set(nrm((H2, H2), 1.0 / math.sqrt(H2)))
    g2 = 1.0 + nrm((H2,), 0.1)
    A = A.at[A_POST + 2, :H2].set(g2 / jnp.sqrt(1.0 + BN_EPS))
    A = A.at[A_POST + 3, :H2].set(nrm((H2,), 0.1))
    W = W.at[W_PW3, :H2, :N_Z].set(nrm((H2, N_Z), 1.0 / math.sqrt(H2)))
    A = A.at[A_POST + 4, :N_Z].set(nrm((N_Z,), 0.02))

    return {"W": W.astype(jnp.bfloat16), "A": A}


if __name__ == "__main__":
    B, T = 2, 16
    master = jax.random.PRNGKey(0)
    pkey, xkey = jax.random.split(master)
    params = init_params(pkey)
    x = jax.random.normal(xkey, (B, 1, NCOEF, T), dtype=jnp.float32)

    fwd = jax.jit(tdnn_forward)
    out, fc = fwd(x, params)
    jax.block_until_ready((out, fc))

    assert out.shape == (B, N_Z), out.shape
    assert fc.shape == (B, H2), fc.shape
    assert bool(jnp.all(jnp.isfinite(out))) and bool(jnp.all(jnp.isfinite(fc)))
    assert bool(jnp.all(fc >= 0.0))   # fc is post-ReLU
    print("KERNEL_OK")
</pallas_src>

<mosaic_0001>
module attributes {stable_mosaic.version = 11 : i64} {
  func.func @_tdnn_fused_kernel(%arg0: i32, %arg1: memref<2x16x128xf32, #tpu.memory_space<vmem>>, %arg2: memref<27x128x128xbf16, #tpu.memory_space<vmem>>, %arg3: memref<20x128xf32, #tpu.memory_space<vmem>>, %arg4: memref<2x2x128xf32, #tpu.memory_space<vmem>>, %arg5: memref<24x128xf32, #tpu.memory_space<vmem>>) attributes {dimension_semantics = [#tpu.dimension_semantics<parallel>], iteration_bounds = array<i64: 1>, scalar_prefetch = 0 : i64, scratch_operands = 1 : i64, tpu.core_type = #tpu.core_type<tc>, window_params = [{transform_indices = @transform_0, window_bounds = array<i64: 2, 16, 128>}, {pipeline_mode = #tpu.pipeline_mode<synchronous>, transform_indices = @transform_1, window_bounds = array<i64: 27, 128, 128>}, {pipeline_mode = #tpu.pipeline_mode<synchronous>, transform_indices = @transform_2, window_bounds = array<i64: 20, 128>}, {transform_indices = @transform_3, window_bounds = array<i64: 2, 2, 128>}]} {
    %c0 = arith.constant 0 : index
    %c0_0 = arith.constant 0 : index
    %0 = vector.load %arg3[%c0, %c0_0] : memref<20x128xf32, #tpu.memory_space<vmem>>, vector<20x128xf32>
    %c0_1 = arith.constant 0 : index
    %c0_2 = arith.constant 0 : index
    %c0_3 = arith.constant 0 : index
    %1 = vector.load %arg1[%c0_1, %c0_2, %c0_3] : memref<2x16x128xf32, #tpu.memory_space<vmem>>, vector<1x16x128xf32>
    %2 = vector.shape_cast %1 : vector<1x16x128xf32> to vector<16x128xf32>
    %cst = arith.constant 0.000000e+00 : f32
    %3 = vector.broadcast %cst : f32 to vector<2x128xf32>
    %c0_4 = arith.constant 0 : index
    %c0_5 = arith.constant 0 : index
    %4 = vector.load %arg5[%c0_4, %c0_5] : memref<24x128xf32, #tpu.memory_space<vmem>>, vector<2x128xf32>
    tpu.vector_store %arg5[%c0_4, %c0_5], %3 {strides = array<i32>} : memref<24x128xf32, #tpu.memory_space<vmem>>, vector<2x128xf32>,
    %c18 = arith.constant 18 : index
    %c0_6 = arith.constant 0 : index
    %5 = vector.load %arg5[%c18, %c0_6] : memref<24x128xf32, #tpu.memory_space<vmem>>, vector<2x128xf32>
    tpu.vector_store %arg5[%c18, %c0_6], %3 {strides = array<i32>} : memref<24x128xf32, #tpu.memory_space<vmem>>, vector<2x128xf32>,
    %c2 = arith.constant 2 : index
    %c0_7 = arith.constant 0 : index
    %6 = vector.load %arg5[%c2, %c0_7] : memref<24x128xf32, #tpu.memory_space<vmem>>, vector<16x128xf32>
    tpu.vector_store %arg5[%c2, %c0_7], %2 {strides = array<i32>} : memref<24x128xf32, #tpu.memory_space<vmem>>, vector<16x128xf32>,
    %cst_8 = arith.constant 0.000000e+00 : f32
    %7 = vector.broadcast %cst_8 : f32 to vector<16x128xf32>
    %c0_9 = arith.constant 0 : index
    %c0_10 = arith.constant 0 : index
    %8 = vector.load %arg5[%c0_9, %c0_10] : memref<24x128xf32, #tpu.memory_space<vmem>>, vector<16x128xf32>
    %9 = arith.truncf %8 : vector<16x128xf32> to vector<16x128xbf16>
    %c0_11 = arith.constant 0 : index
    %c0_12 = arith.constant 0 : index
    %c0_13 = arith.constant 0 : index
    %10 = vector.load %arg2[%c0_11, %c0_12, %c0_13] : memref<27x128x128xbf16, #tpu.memory_space<vmem>>, vector<1x128x128xbf16>
    %11 = vector.shape_cast %10 : vector<1x128x128xbf16> to vector<128x128xbf16>
    %cst_14 = arith.constant dense<0.000000e+00> : vector<16x128xf32>
    %12 = tpu.matmul %9, %11, %cst_14 {dimension_numbers = #tpu.dot_dimension_numbers<[1], [0], [0], [1], [0, 0, 1, 1], [], []>} : vector<16x128xbf16>, vector<128x128xbf16>, vector<16x128xf32> -> vector<16x128xf32>
    %13 = arith.addf %7, %12 : vector<16x128xf32>
    %c1 = arith.constant 1 : index
    %c0_15 = arith.constant 0 : index
    %14 = vector.load %arg5[%c1, %c0_15] : memref<24x128xf32, #tpu.memory_space<vmem>>, vector<16x128xf32>
    %15 = arith.truncf %14 : vector<16x128xf32> to vector<16x128xbf16>
    %c1_16 = arith.constant 1 : index
    %c0_17 = arith.constant 0 : index
    %c0_18 = arith.constant 0 : index
    %16 = vector.load %arg2[%c1_16, %c0_17, %c0_18] : memref<27x128x128xbf16, #tpu.memory_space<vmem>>, vector<1x128x128xbf16>
    %17 = vector.shape_cast %16 : vector<1x128x128xbf16> to vector<128x128xbf16>
    %cst_19 = arith.constant dense<0.000000e+00> : vector<16x128xf32>
    %18 = tpu.matmul %15, %17, %cst_19 {dimension_numbers = #tpu.dot_dimension_numbers<[1], [0], [0], [1], [0, 0, 1, 1], [], []>} : vector<16x128xbf16>, vector<128x128xbf16>, vector<16x128xf32> -> vector<16x128xf32>
    %19 = arith.addf %13, %18 : vector<16x128xf32>
    %c2_20 = arith.constant 2 : index
    %c0_21 = arith.constant 0 : index
    %20 = vector.load %arg5[%c2_20, %c0_21] : memref<24x128xf32, #tpu.memory_space<vmem>>, vector<16x128xf32>
    %21 = arith.truncf %20 : vector<16x128xf32> to vector<16x128xbf16>
    %c2_22 = arith.constant 2 : index
    %c0_23 = arith.constant 0 : index
    %c0_24 = arith.constant 0 : index
    %22 = vector.load %arg2[%c2_22, %c0_23, %c0_24] : memref<27x128x128xbf16, #tpu.memory_space<vmem>>, vector<1x128x128xbf16>
    %23 = vector.shape_cast %22 : vector<1x128x128xbf16> to vector<128x128xbf16>
    %cst_25 = arith.constant dense<0.000000e+00> : vector<16x128xf32>
    %24 = tpu.matmul %21, %23, %cst_25 {dimension_numbers = #tpu.dot_dimension_numbers<[1], [0], [0], [1], [0, 0, 1, 1], [], []>} : vector<16x128xbf16>, vector<128x128xbf16>, vector<16x128xf32> -> vector<16x128xf32>
    %25 = arith.addf %19, %24 : vector<16x128xf32>
    %c3 = arith.constant 3 : index
    %c0_26 = arith.constant 0 : index
    %26 = vector.load %arg5[%c3, %c0_26] : memref<24x128xf32, #tpu.memory_space<vmem>>, vector<16x128xf32>
    %27 = arith.truncf %26 : vector<16x128xf32> to vector<16x128xbf16>
    %c3_27 = arith.constant 3 : index
    %c0_28 = arith.constant 0 : index
    %c0_29 = arith.constant 0 : index
    %28 = vector.load %arg2[%c3_27, %c0_28, %c0_29] : memref<27x128x128xbf16, #tpu.memory_space<vmem>>, vector<1x128x128xbf16>
    %29 = vector.shape_cast %28 : vector<1x128x128xbf16> to vector<128x128xbf16>
    %cst_30 = arith.constant dense<0.000000e+00> : vector<16x128xf32>
    %30 = tpu.matmul %27, %29, %cst_30 {dimension_numbers = #tpu.dot_dimension_numbers<[1], [0], [0], [1], [0, 0, 1, 1], [], []>} : vector<16x128xbf16>, vector<128x128xbf16>, vector<16x128xf32> -> vector<16x128xf32>
    %31 = arith.addf %25, %30 : vector<16x128xf32>
    %c4 = arith.constant 4 : index
    %c0_31 = arith.constant 0 : index
    %32 = vector.load %arg5[%c4, %c0_31] : memref<24x128xf32, #tpu.memory_space<vmem>>, vector<16x128xf32>
    %33 = arith.truncf %32 : vector<16x128xf32> to vector<16x128xbf16>
    %c4_32 = arith.constant 4 : index
    %c0_33 = arith.constant 0 : index
    %c0_34 = arith.constant 0 : index
    %34 = vector.load %arg2[%c4_32, %c0_33, %c0_34] : memref<27x128x128xbf16, #tpu.memory_space<vmem>>, vector<1x128x128xbf16>
    %35 = vector.shape_cast %34 : vector<1x128x128xbf16> to vector<128x128xbf16>
    %cst_35 = arith.constant dense<0.000000e+00> : vector<16x128xf32>
    %36 = tpu.matmul %33, %35, %cst_35 {dimension_numbers = #tpu.dot_dimension_numbers<[1], [0], [0], [1], [0, 0, 1, 1], [], []>} : vector<16x128xbf16>, vector<128x128xbf16>, vector<16x128xf32> -> vector<16x128xf32>
    %37 = arith.addf %31, %36 : vector<16x128xf32>
    %38 = vector.extract_strided_slice %0 {offsets = [0, 0], sizes = [1, 128], strides = [1, 1]} : vector<20x128xf32> to vector<1x128xf32>
    %39 = vector.broadcast %38 : vector<1x128xf32> to vector<16x128xf32>
    %40 = arith.addf %37, %39 : vector<16x128xf32>
    %cst_36 = arith.constant 0.000000e+00 : f32
    %41 = vector.broadcast %cst_36 : f32 to vector<16x128xf32>
    %42 = arith.maximumf %40, %41 : vector<16x128xf32>
    %43 = vector.extract_strided_slice %0 {offsets = [1, 0], sizes = [1, 128], strides = [1, 1]} : vector<20x128xf32> to vector<1x128xf32>
    %44 = vector.broadcast %43 : vector<1x128xf32> to vector<16x128xf32>
    %45 = arith.mulf %42, %44 : vector<16x128xf32>
    %46 = vector.extract_strided_slice %0 {offsets = [2, 0], sizes = [1, 128], strides = [1, 1]} : vector<20x128xf32> to vector<1x128xf32>
    %47 = vector.broadcast %46 : vector<1x128xf32> to vector<16x128xf32>
    %48 = arith.addf %45, %47 : vector<16x128xf32>
    %cst_37 = arith.constant 0.000000e+00 : f32
    %49 = vector.broadcast %cst_37 : f32 to vector<2x128xf32>
    %c0_38 = arith.constant 0 : index
    %c0_39 = arith.constant 0 : index
    %50 = vector.load %arg5[%c0_38, %c0_39] : memref<24x128xf32, #tpu.memory_space<vmem>>, vector<2x128xf32>
    tpu.vector_store %arg5[%c0_38, %c0_39], %49 {strides = array<i32>} : memref<24x128xf32, #tpu.memory_space<vmem>>, vector<2x128xf32>,
    %c18_40 = arith.constant 18 : index
    %c0_41 = arith.constant 0 : index
    %51 = vector.load %arg5[%c18_40, %c0_41] : memref<24x128xf32, #tpu.memory_space<vmem>>, vector<2x128xf32>
    tpu.vector_store %arg5[%c18_40, %c0_41], %49 {strides = array<i32>} : memref<24x128xf32, #tpu.memory_space<vmem>>, vector<2x128xf32>,
    %c2_42 = arith.constant 2 : index
    %c0_43 = arith.constant 0 : index
    %52 = vector.load %arg5[%c2_42, %c0_43] : memref<24x128xf32, #tpu.memory_space<vmem>>, vector<16x128xf32>
    tpu.vector_store %arg5[%c2_42, %c0_43], %48 {strides = array<i32>} : memref<24x128xf32, #tpu.memory_space<vmem>>, vector<16x128xf32>,
    %cst_44 = arith.constant 0.000000e+00 : f32
    %53 = vector.broadcast %cst_44 : f32 to vector<16x128xf32>
    %c0_45 = arith.constant 0 : index
    %c0_46 = arith.constant 0 : index
    %54 = vector.load %arg5[%c0_45, %c0_46] : memref<24x128xf32, #tpu.memory_space<vmem>>, vector<16x128xf32>
    %55 = arith.truncf %54 : vector<16x128xf32> to vector<16x128xbf16>
    %c5 = arith.constant 5 : index
    %c0_47 = arith.constant 0 : index
    %c0_48 = arith.constant 0 : index
    %56 = vector.load %arg2[%c5, %c0_47, %c0_48] : memref<27x128x128xbf16, #tpu.memory_space<vmem>>, vector<1x128x128xbf16>
    %57 = vector.shape_cast %56 : vector<1x128x128xbf16> to vector<128x128xbf16>
    %cst_49 = arith.constant dense<0.000000e+00> : vector<16x128xf32>
    %58 = tpu.matmul %55, %57, %cst_49 {dimension_numbers = #tpu.dot_dimension_numbers<[1], [0], [0], [1], [0, 0, 1, 1], [], []>} : vector<16x128xbf16>, vector<128x128xbf16>, vector<16x128xf32> -> vector<16x128xf32>
    %59 = arith.addf %53, %58 : vector<16x128xf32>
    %c1_50 = arith.constant 1 : index
    %c0_51 = arith.constant 0 : index
    %60 = vector.load %arg5[%c1_50, %c0_51] : memref<24x128xf32, #tpu.memory_space<vmem>>, vector<16x128xf32>
    %61 = arith.truncf %60 : vector<16x128xf32> to vector<16x128xbf16>
    %c6 = arith.constant 6 : index
    %c0_52 = arith.constant 0 : index
    %c0_53 = arith.constant 0 : index
    %62 = vector.load %arg2[%c6, %c0_52, %c0_53] : memref<27x128x128xbf16, #tpu.memory_space<vmem>>, vector<1x128x128xbf16>
    %63 = vector.shape_cast %62 : vector<1x128x128xbf16> to vector<128x128xbf16>
    %cst_54 = arith.constant dense<0.000000e+00> : vector<16x128xf32>
    %64 = tpu.matmul %61, %63, %cst_54 {dimension_numbers = #tpu.dot_dimension_numbers<[1], [0], [0], [1], [0, 0, 1, 1], [], []>} : vector<16x128xbf16>, vector<128x128xbf16>, vector<16x128xf32> -> vector<16x128xf32>
    %65 = arith.addf %59, %64 : vector<16x128xf32>
    %c2_55 = arith.constant 2 : index
    %c0_56 = arith.constant 0 : index
    %66 = vector.load %arg5[%c2_55, %c0_56] : memref<24x128xf32, #tpu.memory_space<vmem>>, vector<16x128xf32>
    %67 = arith.truncf %66 : vector<16x128xf32> to vector<16x128xbf16>
    %c7 = arith.constant 7 : index
    %c0_57 = arith.constant 0 : index
    %c0_58 = arith.constant 0 : index
    %68 = vector.load %arg2[%c7, %c0_57, %c0_58] : memref<27x128x128xbf16, #tpu.memory_space<vmem>>, vector<1x128x128xbf16>
    %69 = vector.shape_cast %68 : vector<1x128x128xbf16> to vector<128x128xbf16>
    %cst_59 = arith.constant dense<0.000000e+00> : vector<16x128xf32>
    %70 = tpu.matmul %67, %69, %cst_59 {dimension_numbers = #tpu.dot_dimension_numbers<[1], [0], [0], [1], [0, 0, 1, 1], [], []>} : vector<16x128xbf16>, vector<128x128xbf16>, vector<16x128xf32> -> vector<16x128xf32>
    %71 = arith.addf %65, %70 : vector<16x128xf32>
    %c3_60 = arith.constant 3 : index
    %c0_61 = arith.constant 0 : index
    %72 = vector.load %arg5[%c3_60, %c0_61] : memref<24x128xf32, #tpu.memory_space<vmem>>, vector<16x128xf32>
    %73 = arith.truncf %72 : vector<16x128xf32> to vector<16x128xbf16>
    %c8 = arith.constant 8 : index
    %c0_62 = arith.constant 0 : index
    %c0_63 = arith.constant 0 : index
    %74 = vector.load %arg2[%c8, %c0_62, %c0_63] : memref<27x128x128xbf16, #tpu.memory_space<vmem>>, vector<1x128x128xbf16>
    %75 = vector.shape_cast %74 : vector<1x128x128xbf16> to vector<128x128xbf16>
    %cst_64 = arith.constant dense<0.000000e+00> : vector<16x128xf32>
    %76 = tpu.matmul %73, %75, %cst_64 {dimension_numbers = #tpu.dot_dimension_numbers<[1], [0], [0], [1], [0, 0, 1, 1], [], []>} : vector<16x128xbf16>, vector<128x128xbf16>, vector<16x128xf32> -> vector<16x128xf32>
    %77 = arith.addf %71, %76 : vector<16x128xf32>
    %c4_65 = arith.constant 4 : index
    %c0_66 = arith.constant 0 : index
    %78 = vector.load %arg5[%c4_65, %c0_66] : memref<24x128xf32, #tpu.memory_space<vmem>>, vector<16x128xf32>
    %79 = arith.truncf %78 : vector<16x128xf32> to vector<16x128xbf16>
    %c9 = arith.constant 9 : index
    %c0_67 = arith.constant 0 : index
    %c0_68 = arith.constant 0 : index
    %80 = vector.load %arg2[%c9, %c0_67, %c0_68] : memref<27x128x128xbf16, #tpu.memory_space<vmem>>, vector<1x128x128xbf16>
    %81 = vector.shape_cast %80 : vector<1x128x128xbf16> to vector<128x128xbf16>
    %cst_69 = arith.constant dense<0.000000e+00> : vector<16x128xf32>
    %82 = tpu.matmul %79, %81, %cst_69 {dimension_numbers = #tpu.dot_dimension_numbers<[1], [0], [0], [1], [0, 0, 1, 1], [], []>} : vector<16x128xbf16>, vector<128x128xbf16>, vector<16x128xf32> -> vector<16x128xf32>
    %83 = arith.addf %77, %82 : vector<16x128xf32>
    %84 = vector.extract_strided_slice %0 {offsets = [3, 0], sizes = [1, 128], strides = [1, 1]} : vector<20x128xf32> to vector<1x128xf32>
    %85 = vector.broadcast %84 : vector<1x128xf32> to vector<16x128xf32>
    %86 = arith.addf %83, %85 : vector<16x128xf32>
    %cst_70 = arith.constant 0.000000e+00 : f32
    %87 = vector.broadcast %cst_70 : f32 to vector<16x128xf32>
    %88 = arith.maximumf %86, %87 : vector<16x128xf32>
    %89 = vector.extract_strided_slice %0 {offsets = [4, 0], sizes = [1, 128], strides = [1, 1]} : vector<20x128xf32> to vector<1x128xf32>
    %90 = vector.broadcast %89 : vector<1x128xf32> to vector<16x128xf32>
    %91 = arith.mulf %88, %90 : vector<16x128xf32>
    %92 = vector.extract_strided_slice %0 {offsets = [5, 0], sizes = [1, 128], strides = [1, 1]} : vector<20x128xf32> to vector<1x128xf32>
    %93 = vector.broadcast %92 : vector<1x128xf32> to vector<16x128xf32>
    %94 = arith.addf %91, %93 : vector<16x128xf32>
    %cst_71 = arith.constant 0.000000e+00 : f32
    %95 = vector.broadcast %cst_71 : f32 to vector<3x128xf32>
    %c0_72 = arith.constant 0 : index
    %c0_73 = arith.constant 0 : index
    %96 = vector.load %arg5[%c0_72, %c0_73] : memref<24x128xf32, #tpu.memory_space<vmem>>, vector<3x128xf32>
    tpu.vector_store %arg5[%c0_72, %c0_73], %95 {strides = array<i32>} : memref<24x128xf32, #tpu.memory_space<vmem>>, vector<3x128xf32>,
    %c19 = arith.constant 19 : index
    %c0_74 = arith.constant 0 : index
    %97 = vector.load %arg5[%c19, %c0_74] : memref<24x128xf32, #tpu.memory_space<vmem>>, vector<3x128xf32>
    tpu.vector_store %arg5[%c19, %c0_74], %95 {strides = array<i32>} : memref<24x128xf32, #tpu.memory_space<vmem>>, vector<3x128xf32>,
    %c3_75 = arith.constant 3 : index
    %c0_76 = arith.constant 0 : index
    %98 = vector.load %arg5[%c3_75, %c0_76] : memref<24x128xf32, #tpu.memory_space<vmem>>, vector<16x128xf32>
    tpu.vector_store %arg5[%c3_75, %c0_76], %94 {strides = array<i32>} : memref<24x128xf32, #tpu.memory_space<vmem>>, vector<16x128xf32>,
    %cst_77 = arith.constant 0.000000e+00 : f32
    %99 = vector.broadcast %cst_77 : f32 to vector<18x128xf32>
    %c0_78 = arith.constant 0 : index
    %c0_79 = arith.constant 0 : index
    %100 = vector.load %arg5[%c0_78, %c0_79] : memref<24x128xf32, #tpu.memory_space<vmem>>, vector<18x128xf32>
    %101 = arith.truncf %100 : vector<18x128xf32> to vector<18x128xbf16>
    %c10 = arith.constant 10 : index
    %c0_80 = arith.constant 0 : index
    %c0_81 = arith.constant 0 : index
    %102 = vector.load %arg2[%c10, %c0_80, %c0_81] : memref<27x128x128xbf16, #tpu.memory_space<vmem>>, vector<1x128x128xbf16>
    %103 = vector.shape_cast %102 : vector<1x128x128xbf16> to vector<128x128xbf16>
    %cst_82 = arith.constant dense<0.000000e+00> : vector<18x128xf32>
    %104 = tpu.matmul %101, %103, %cst_82 {dimension_numbers = #tpu.dot_dimension_numbers<[1], [0], [0], [1], [0, 0, 1, 1], [], []>} : vector<18x128xbf16>, vector<128x128xbf16>, vector<18x128xf32> -> vector<18x128xf32>
    %105 = arith.addf %99, %104 : vector<18x128xf32>
    %c1_83 = arith.constant 1 : index
    %c0_84 = arith.constant 0 : index
    %106 = vector.load %arg5[%c1_83, %c0_84] : memref<24x128xf32, #tpu.memory_space<vmem>>, vector<18x128xf32>
    %107 = arith.truncf %106 : vector<18x128xf32> to vector<18x128xbf16>
    %c11 = arith.constant 11 : index
    %c0_85 = arith.constant 0 : index
    %c0_86 = arith.constant 0 : index
    %108 = vector.load %arg2[%c11, %c0_85, %c0_86] : memref<27x128x128xbf16, #tpu.memory_space<vmem>>, vector<1x128x128xbf16>
    %109 = vector.shape_cast %108 : vector<1x128x128xbf16> to vector<128x128xbf16>
    %cst_87 = arith.constant dense<0.000000e+00> : vector<18x128xf32>
    %110 = tpu.matmul %107, %109, %cst_87 {dimension_numbers = #tpu.dot_dimension_numbers<[1], [0], [0], [1], [0, 0, 1, 1], [], []>} : vector<18x128xbf16>, vector<128x128xbf16>, vector<18x128xf32> -> vector<18x128xf32>
    %111 = arith.addf %105, %110 : vector<18x128xf32>
    %c2_88 = arith.constant 2 : index
    %c0_89 = arith.constant 0 : index
    %112 = vector.load %arg5[%c2_88, %c0_89] : memref<24x128xf32, #tpu.memory_space<vmem>>, vector<18x128xf32>
    %113 = arith.truncf %112 : vector<18x128xf32> to vector<18x128xbf16>
    %c12 = arith.constant 12 : index
    %c0_90 = arith.constant 0 : index
    %c0_91 = arith.constant 0 : index
    %114 = vector.load %arg2[%c12, %c0_90, %c0_91] : memref<27x128x128xbf16, #tpu.memory_space<vmem>>, vector<1x128x128xbf16>
    %115 = vector.shape_cast %114 : vector<1x128x128xbf16> to vector<128x128xbf16>
    %cst_92 = arith.constant dense<0.000000e+00> : vector<18x128xf32>
    %116 = tpu.matmul %113, %115, %cst_92 {dimension_numbers = #tpu.dot_dimension_numbers<[1], [0], [0], [1], [0, 0, 1, 1], [], []>} : vector<18x128xbf16>, vector<128x128xbf16>, vector<18x128xf32> -> vector<18x128xf32>
    %117 = arith.addf %111, %116 : vector<18x128xf32>
    %c3_93 = arith.constant 3 : index
    %c0_94 = arith.constant 0 : index
    %118 = vector.load %arg5[%c3_93, %c0_94] : memref<24x128xf32, #tpu.memory_space<vmem>>, vector<18x128xf32>
    %119 = arith.truncf %118 : vector<18x128xf32> to vector<18x128xbf16>
    %c13 = arith.constant 13 : index
    %c0_95 = arith.constant 0 : index
    %c0_96 = arith.constant 0 : index
    %120 = vector.load %arg2[%c13, %c0_95, %c0_96] : memref<27x128x128xbf16, #tpu.memory_space<vmem>>, vector<1x128x128xbf16>
    %121 = vector.shape_cast %120 : vector<1x128x128xbf16> to vector<128x128xbf16>
    %cst_97 = arith.constant dense<0.000000e+00> : vector<18x128xf32>
    %122 = tpu.matmul %119, %121, %cst_97 {dimension_numbers = #tpu.dot_dimension_numbers<[1], [0], [0], [1], [0, 0, 1, 1], [], []>} : vector<18x128xbf16>, vector<128x128xbf16>, vector<18x128xf32> -> vector<18x128xf32>
    %123 = arith.addf %117, %122 : vector<18x128xf32>
    %c4_98 = arith.constant 4 : index
    %c0_99 = arith.constant 0 : index
    %124 = vector.load %arg5[%c4_98, %c0_99] : memref<24x128xf32, #tpu.memory_space<vmem>>, vector<18x128xf32>
    %125 = arith.truncf %124 : vector<18x128xf32> to vector<18x128xbf16>
    %c14 = arith.constant 14 : index
    %c0_100 = arith.constant 0 : index
    %c0_101 = arith.constant 0 : index
    %126 = vector.load %arg2[%c14, %c0_100, %c0_101] : memref<27x128x128xbf16, #tpu.memory_space<vmem>>, vector<1x128x128xbf16>
    %127 = vector.shape_cast %126 : vector<1x128x128xbf16> to vector<128x128xbf16>
    %cst_102 = arith.constant dense<0.000000e+00> : vector<18x128xf32>
    %128 = tpu.matmul %125, %127, %cst_102 {dimension_numbers = #tpu.dot_dimension_numbers<[1], [0], [0], [1], [0, 0, 1, 1], [], []>} : vector<18x128xbf16>, vector<128x128xbf16>, vector<18x128xf32> -> vector<18x128xf32>
    %129 = arith.addf %123, %128 : vector<18x128xf32>
    %130 = vector.extract_strided_slice %0 {offsets = [6, 0], sizes = [1, 128], strides = [1, 1]} : vector<20x128xf32> to vector<1x128xf32>
    %131 = vector.broadcast %130 : vector<1x128xf32> to vector<18x128xf32>
    %132 = arith.addf %129, %131 : vector<18x128xf32>
    %cst_103 = arith.constant 0.000000e+00 : f32
    %133 = vector.broadcast %cst_103 : f32 to vector<18x128xf32>
    %134 = arith.maximumf %132, %133 : vector<18x128xf32>
    %135 = vector.extract_strided_slice %0 {offsets = [7, 0], sizes = [1, 128], strides = [1, 1]} : vector<20x128xf32> to vector<1x128xf32>
    %136 = vector.broadcast %135 : vector<1x128xf32> to vector<18x128xf32>
    %137 = arith.mulf %134, %136 : vector<18x128xf32>
    %138 = vector.extract_strided_slice %0 {offsets = [8, 0], sizes = [1, 128], strides = [1, 1]} : vector<20x128xf32> to vector<1x128xf32>
    %139 = vector.broadcast %138 : vector<1x128xf32> to vector<18x128xf32>
    %140 = arith.addf %137, %139 : vector<18x128xf32>
    %c0_104 = arith.constant 0 : index
    %c0_105 = arith.constant 0 : index
    %141 = vector.load %arg5[%c0_104, %c0_105] : memref<24x128xf32, #tpu.memory_space<vmem>>, vector<18x128xf32>
    tpu.vector_store %arg5[%c0_104, %c0_105], %140 {strides = array<i32>} : memref<24x128xf32, #tpu.memory_space<vmem>>, vector<18x128xf32>,
    %cst_106 = arith.constant 0.000000e+00 : f32
    %142 = vector.broadcast %cst_106 : f32 to vector<12x128xf32>
    %c0_107 = arith.constant 0 : index
    %c0_108 = arith.constant 0 : index
    %143 = vector.load %arg5[%c0_107, %c0_108] : memref<24x128xf32, #tpu.memory_space<vmem>>, vector<12x128xf32>
    %144 = arith.truncf %143 : vector<12x128xf32> to vector<12x128xbf16>
    %c15 = arith.constant 15 : index
    %c0_109 = arith.constant 0 : index
    %c0_110 = arith.constant 0 : index
    %145 = vector.load %arg2[%c15, %c0_109, %c0_110] : memref<27x128x128xbf16, #tpu.memory_space<vmem>>, vector<1x128x128xbf16>
    %146 = vector.shape_cast %145 : vector<1x128x128xbf16> to vector<128x128xbf16>
    %cst_111 = arith.constant dense<0.000000e+00> : vector<12x128xf32>
    %147 = tpu.matmul %144, %146, %cst_111 {dimension_numbers = #tpu.dot_dimension_numbers<[1], [0], [0], [1], [0, 0, 1, 1], [], []>} : vector<12x128xbf16>, vector<128x128xbf16>, vector<12x128xf32> -> vector<12x128xf32>
    %148 = arith.addf %142, %147 : vector<12x128xf32>
    %c1_112 = arith.constant 1 : index
    %c0_113 = arith.constant 0 : index
    %149 = vector.load %arg5[%c1_112, %c0_113] : memref<24x128xf32, #tpu.memory_space<vmem>>, vector<12x128xf32>
    %150 = arith.truncf %149 : vector<12x128xf32> to vector<12x128xbf16>
    %c16 = arith.constant 16 : index
    %c0_114 = arith.constant 0 : index
    %c0_115 = arith.constant 0 : index
    %151 = vector.load %arg2[%c16, %c0_114, %c0_115] : memref<27x128x128xbf16, #tpu.memory_space<vmem>>, vector<1x128x128xbf16>
    %152 = vector.shape_cast %151 : vector<1x128x128xbf16> to vector<128x128xbf16>
    %cst_116 = arith.constant dense<0.000000e+00> : vector<12x128xf32>
    %153 = tpu.matmul %150, %152, %cst_116 {dimension_numbers = #tpu.dot_dimension_numbers<[1], [0], [0], [1], [0, 0, 1, 1], [], []>} : vector<12x128xbf16>, vector<128x128xbf16>, vector<12x128xf32> -> vector<12x128xf32>
    %154 = arith.addf %148, %153 : vector<12x128xf32>
    %c2_117 = arith.constant 2 : index
    %c0_118 = arith.constant 0 : index
    %155 = vector.load %arg5[%c2_117, %c0_118] : memref<24x128xf32, #tpu.memory_space<vmem>>, vector<12x128xf32>
    %156 = arith.truncf %155 : vector<12x128xf32> to vector<12x128xbf16>
    %c17 = arith.constant 17 : index
    %c0_119 = arith.constant 0 : index
    %c0_120 = arith.constant 0 : index
    %157 = vector.load %arg2[%c17, %c0_119, %c0_120] : memref<27x128x128xbf16, #tpu.memory_space<vmem>>, vector<1x128x128xbf16>
    %158 = vector.shape_cast %157 : vector<1x128x128xbf16> to vector<128x128xbf16>
    %cst_121 = arith.constant dense<0.000000e+00> : vector<12x128xf32>
    %159 = tpu.matmul %156, %158, %cst_121 {dimension_numbers = #tpu.dot_dimension_numbers<[1], [0], [0], [1], [0, 0, 1, 1], [], []>} : vector<12x128xbf16>, vector<128x128xbf16>, vector<12x128xf32> -> vector<12x128xf32>
    %160 = arith.addf %154, %159 : vector<12x128xf32>
    %c3_122 = arith.constant 3 : index
    %c0_123 = arith.constant 0 : index
    %161 = vector.load %arg5[%c3_122, %c0_123] : memref<24x128xf32, #tpu.memory_space<vmem>>, vector<12x128xf32>
    %162 = arith.truncf %161 : vector<12x128xf32> to vector<12x128xbf16>
    %c18_124 = arith.constant 18 : index
    %c0_125 = arith.constant 0 : index
    %c0_126 = arith.constant 0 : index
    %163 = vector.load %arg2[%c18_124, %c0_125, %c0_126] : memref<27x128x128xbf16, #tpu.memory_space<vmem>>, vector<1x128x128xbf16>
    %164 = vector.shape_cast %163 : vector<1x128x128xbf16> to vector<128x128xbf16>
    %cst_127 = arith.constant dense<0.000000e+00> : vector<12x128xf32>
    %165 = tpu.matmul %162, %164, %cst_127 {dimension_numbers = #tpu.dot_dimension_numbers<[1], [0], [0], [1], [0, 0, 1, 1], [], []>} : vector<12x128xbf16>, vector<128x128xbf16>, vector<12x128xf32> -> vector<12x128xf32>
    %166 = arith.addf %160, %165 : vector<12x128xf32>
    %c4_128 = arith.constant 4 : index
    %c0_129 = arith.constant 0 : index
    %167 = vector.load %arg5[%c4_128, %c0_129] : memref<24x128xf32, #tpu.memory_space<vmem>>, vector<12x128xf32>
    %168 = arith.truncf %167 : vector<12x128xf32> to vector<12x128xbf16>
    %c19_130 = arith.constant 19 : index
    %c0_131 = arith.constant 0 : index
    %c0_132 = arith.constant 0 : index
    %169 = vector.load %arg2[%c19_130, %c0_131, %c0_132] : memref<27x128x128xbf16, #tpu.memory_space<vmem>>, vector<1x128x128xbf16>
    %170 = vector.shape_cast %169 : vector<1x128x128xbf16> to vector<128x128xbf16>
    %cst_133 = arith.constant dense<0.000000e+00> : vector<12x128xf32>
    %171 = tpu.matmul %168, %170, %cst_133 {dimension_numbers = #tpu.dot_dimension_numbers<[1], [0], [0], [1], [0, 0, 1, 1], [], []>} : vector<12x128xbf16>, vector<128x128xbf16>, vector<12x128xf32> -> vector<12x128xf32>
    %172 = arith.addf %166, %171 : vector<12x128xf32>
    %c5_134 = arith.constant 5 : index
    %c0_135 = arith.constant 0 : index
    %173 = vector.load %arg5[%c5_134, %c0_135] : memref<24x128xf32, #tpu.memory_space<vmem>>, vector<12x128xf32>
    %174 = arith.truncf %173 : vector<12x128xf32> to vector<12x128xbf16>
    %c20 = arith.constant 20 : index
    %c0_136 = arith.constant 0 : index
    %c0_137 = arith.constant 0 : index
    %175 = vector.load %arg2[%c20, %c0_136, %c0_137] : memref<27x128x128xbf16, #tpu.memory_space<vmem>>, vector<1x128x128xbf16>
    %176 = vector.shape_cast %175 : vector<1x128x128xbf16> to vector<128x128xbf16>
    %cst_138 = arith.constant dense<0.000000e+00> : vector<12x128xf32>
    %177 = tpu.matmul %174, %176, %cst_138 {dimension_numbers = #tpu.dot_dimension_numbers<[1], [0], [0], [1], [0, 0, 1, 1], [], []>} : vector<12x128xbf16>, vector<128x128xbf16>, vector<12x128xf32> -> vector<12x128xf32>
    %178 = arith.addf %172, %177 : vector<12x128xf32>
    %c6_139 = arith.constant 6 : index
    %c0_140 = arith.constant 0 : index
    %179 = vector.load %arg5[%c6_139, %c0_140] : memref<24x128xf32, #tpu.memory_space<vmem>>, vector<12x128xf32>
    %180 = arith.truncf %179 : vector<12x128xf32> to vector<12x128xbf16>
    %c21 = arith.constant 21 : index
    %c0_141 = arith.constant 0 : index
    %c0_142 = arith.constant 0 : index
    %181 = vector.load %arg2[%c21, %c0_141, %c0_142] : memref<27x128x128xbf16, #tpu.memory_space<vmem>>, vector<1x128x128xbf16>
    %182 = vector.shape_cast %181 : vector<1x128x128xbf16> to vector<128x128xbf16>
    %cst_143 = arith.constant dense<0.000000e+00> : vector<12x128xf32>
    %183 = tpu.matmul %180, %182, %cst_143 {dimension_numbers = #tpu.dot_dimension_numbers<[1], [0], [0], [1], [0, 0, 1, 1], [], []>} : vector<12x128xbf16>, vector<128x128xbf16>, vector<12x128xf32> -> vector<12x128xf32>
    %184 = arith.addf %178, %183 : vector<12x128xf32>
    %185 = vector.extract_strided_slice %0 {offsets = [9, 0], sizes = [1, 128], strides = [1, 1]} : vector<20x128xf32> to vector<1x128xf32>
    %186 = vector.broadcast %185 : vector<1x128xf32> to vector<12x128xf32>
    %187 = arith.addf %184, %186 : vector<12x128xf32>
    %cst_144 = arith.constant 0.000000e+00 : f32
    %188 = vector.broadcast %cst_144 : f32 to vector<12x128xf32>
    %189 = arith.maximumf %187, %188 : vector<12x128xf32>
    %190 = vector.extract_strided_slice %0 {offsets = [10, 0], sizes = [1, 128], strides = [1, 1]} : vector<20x128xf32> to vector<1x128xf32>
    %191 = vector.broadcast %190 : vector<1x128xf32> to vector<12x128xf32>
    %192 = arith.mulf %189, %191 : vector<12x128xf32>
    %193 = vector.extract_strided_slice %0 {offsets = [11, 0], sizes = [1, 128], strides = [1, 1]} : vector<20x128xf32> to vector<1x128xf32>
    %194 = vector.broadcast %193 : vector<1x128xf32> to vector<12x128xf32>
    %195 = arith.addf %192, %194 : vector<12x128xf32>
    %196 = arith.truncf %195 : vector<12x128xf32> to vector<12x128xbf16>
    %c22 = arith.constant 22 : index
    %c0_145 = arith.constant 0 : index
    %c0_146 = arith.constant 0 : index
    %197 = vector.load %arg2[%c22, %c0_145, %c0_146] : memref<27x128x128xbf16, #tpu.memory_space<vmem>>, vector<1x128x128xbf16>
    %198 = vector.shape_cast %197 : vector<1x128x128xbf16> to vector<128x128xbf16>
    %cst_147 = arith.constant dense<0.000000e+00> : vector<12x128xf32>
    %199 = tpu.matmul %196, %198, %cst_147 {dimension_numbers = #tpu.dot_dimension_numbers<[1], [0], [0], [1], [0, 0, 1, 1], [], []>} : vector<12x128xbf16>, vector<128x128xbf16>, vector<12x128xf32> -> vector<12x128xf32>
    %200 = vector.extract_strided_slice %0 {offsets = [12, 0], sizes = [1, 128], strides = [1, 1]} : vector<20x128xf32> to vector<1x128xf32>
    %201 = vector.broadcast %200 : vector<1x128xf32> to vector<12x128xf32>
    %202 = arith.addf %199, %201 : vector<12x128xf32>
    %cst_148 = arith.constant dense<0.000000e+00> : vector<128xf32>
    %203 = vector.multi_reduction <add>, %202, %cst_148 [0] : vector<12x128xf32> to vector<128xf32>
    %204 = vector.shape_cast %203 : vector<128xf32> to vector<1x128xf32>
    %205 = arith.mulf %202, %202 : vector<12x128xf32>
    %cst_149 = arith.constant dense<0.000000e+00> : vector<128xf32>
    %206 = vector.multi_reduction <add>, %205, %cst_149 [0] : vector<12x128xf32> to vector<128xf32>
    %207 = vector.shape_cast %206 : vector<128xf32> to vector<1x128xf32>
    %cst_150 = arith.constant 0.0833333358 : f32
    %208 = vector.broadcast %cst_150 : f32 to vector<1x128xf32>
    %209 = arith.mulf %204, %208 : vector<1x128xf32>
    %210 = arith.mulf %209, %204 : vector<1x128xf32>
    %211 = arith.subf %207, %210 : vector<1x128xf32>
    %cst_151 = arith.constant 0.000000e+00 : f32
    %212 = vector.broadcast %cst_151 : f32 to vector<1x128xf32>
    %213 = arith.maximumf %211, %212 : vector<1x128xf32>
    %cst_152 = arith.constant 0.0909090936 : f32
    %214 = vector.broadcast %cst_152 : f32 to vector<1x128xf32>
    %215 = arith.mulf %213, %214 : vector<1x128xf32>
    %216 = math.sqrt %215 : vector<1x128xf32>
    %c1_153 = arith.constant 1 : index
    %c0_154 = arith.constant 0 : index
    %c0_155 = arith.constant 0 : index
    %217 = vector.load %arg1[%c1_153, %c0_154, %c0_155] : memref<2x16x128xf32, #tpu.memory_space<vmem>>, vector<1x16x128xf32>
    %218 = vector.shape_cast %217 : vector<1x16x128xf32> to vector<16x128xf32>
    %cst_156 = arith.constant 0.000000e+00 : f32
    %219 = vector.broadcast %cst_156 : f32 to vector<2x128xf32>
    %c0_157 = arith.constant 0 : index
    %c0_158 = arith.constant 0 : index
    %220 = vector.load %arg5[%c0_157, %c0_158] : memref<24x128xf32, #tpu.memory_space<vmem>>, vector<2x128xf32>
    tpu.vector_store %arg5[%c0_157, %c0_158], %219 {strides = array<i32>} : memref<24x128xf32, #tpu.memory_space<vmem>>, vector<2x128xf32>,
    %c18_159 = arith.constant 18 : index
    %c0_160 = arith.constant 0 : index
    %221 = vector.load %arg5[%c18_159, %c0_160] : memref<24x128xf32, #tpu.memory_space<vmem>>, vector<2x128xf32>
    tpu.vector_store %arg5[%c18_159, %c0_160], %219 {strides = array<i32>} : memref<24x128xf32, #tpu.memory_space<vmem>>, vector<2x128xf32>,
    %c2_161 = arith.constant 2 : index
    %c0_162 = arith.constant 0 : index
    %222 = vector.load %arg5[%c2_161, %c0_162] : memref<24x128xf32, #tpu.memory_space<vmem>>, vector<16x128xf32>
    tpu.vector_store %arg5[%c2_161, %c0_162], %218 {strides = array<i32>} : memref<24x128xf32, #tpu.memory_space<vmem>>, vector<16x128xf32>,
    %cst_163 = arith.constant 0.000000e+00 : f32
    %223 = vector.broadcast %cst_163 : f32 to vector<16x128xf32>
    %c0_164 = arith.constant 0 : index
    %c0_165 = arith.constant 0 : index
    %224 = vector.load %arg5[%c0_164, %c0_165] : memref<24x128xf32, #tpu.memory_space<vmem>>, vector<16x128xf32>
    %225 = arith.truncf %224 : vector<16x128xf32> to vector<16x128xbf16>
    %c0_166 = arith.constant 0 : index
    %c0_167 = arith.constant 0 : index
    %c0_168 = arith.constant 0 : index
    %226 = vector.load %arg2[%c0_166, %c0_167, %c0_168] : memref<27x128x128xbf16, #tpu.memory_space<vmem>>, vector<1x128x128xbf16>
    %227 = vector.shape_cast %226 : vector<1x128x128xbf16> to vector<128x128xbf16>
    %cst_169 = arith.constant dense<0.000000e+00> : vector<16x128xf32>
    %228 = tpu.matmul %225, %227, %cst_169 {dimension_numbers = #tpu.dot_dimension_numbers<[1], [0], [0], [1], [0, 0, 1, 1], [], []>} : vector<16x128xbf16>, vector<128x128xbf16>, vector<16x128xf32> -> vector<16x128xf32>
    %229 = arith.addf %223, %228 : vector<16x128xf32>
    %c1_170 = arith.constant 1 : index
    %c0_171 = arith.constant 0 : index
    %230 = vector.load %arg5[%c1_170, %c0_171] : memref<24x128xf32, #tpu.memory_space<vmem>>, vector<16x128xf32>
    %231 = arith.truncf %230 : vector<16x128xf32> to vector<16x128xbf16>
    %c1_172 = arith.constant 1 : index
    %c0_173 = arith.constant 0 : index
    %c0_174 = arith.constant 0 : index
    %232 = vector.load %arg2[%c1_172, %c0_173, %c0_174] : memref<27x128x128xbf16, #tpu.memory_space<vmem>>, vector<1x128x128xbf16>
    %233 = vector.shape_cast %232 : vector<1x128x128xbf16> to vector<128x128xbf16>
    %cst_175 = arith.constant dense<0.000000e+00> : vector<16x128xf32>
    %234 = tpu.matmul %231, %233, %cst_175 {dimension_numbers = #tpu.dot_dimension_numbers<[1], [0], [0], [1], [0, 0, 1, 1], [], []>} : vector<16x128xbf16>, vector<128x128xbf16>, vector<16x128xf32> -> vector<16x128xf32>
    %235 = arith.addf %229, %234 : vector<16x128xf32>
    %c2_176 = arith.constant 2 : index
    %c0_177 = arith.constant 0 : index
    %236 = vector.load %arg5[%c2_176, %c0_177] : memref<24x128xf32, #tpu.memory_space<vmem>>, vector<16x128xf32>
    %237 = arith.truncf %236 : vector<16x128xf32> to vector<16x128xbf16>
    %c2_178 = arith.constant 2 : index
    %c0_179 = arith.constant 0 : index
    %c0_180 = arith.constant 0 : index
    %238 = vector.load %arg2[%c2_178, %c0_179, %c0_180] : memref<27x128x128xbf16, #tpu.memory_space<vmem>>, vector<1x128x128xbf16>
    %239 = vector.shape_cast %238 : vector<1x128x128xbf16> to vector<128x128xbf16>
    %cst_181 = arith.constant dense<0.000000e+00> : vector<16x128xf32>
    %240 = tpu.matmul %237, %239, %cst_181 {dimension_numbers = #tpu.dot_dimension_numbers<[1], [0], [0], [1], [0, 0, 1, 1], [], []>} : vector<16x128xbf16>, vector<128x128xbf16>, vector<16x128xf32> -> vector<16x128xf32>
    %241 = arith.addf %235, %240 : vector<16x128xf32>
    %c3_182 = arith.constant 3 : index
    %c0_183 = arith.constant 0 : index
    %242 = vector.load %arg5[%c3_182, %c0_183] : memref<24x128xf32, #tpu.memory_space<vmem>>, vector<16x128xf32>
    %243 = arith.truncf %242 : vector<16x128xf32> to vector<16x128xbf16>
    %c3_184 = arith.constant 3 : index
    %c0_185 = arith.constant 0 : index
    %c0_186 = arith.constant 0 : index
    %244 = vector.load %arg2[%c3_184, %c0_185, %c0_186] : memref<27x128x128xbf16, #tpu.memory_space<vmem>>, vector<1x128x128xbf16>
    %245 = vector.shape_cast %244 : vector<1x128x128xbf16> to vector<128x128xbf16>
    %cst_187 = arith.constant dense<0.000000e+00> : vector<16x128xf32>
    %246 = tpu.matmul %243, %245, %cst_187 {dimension_numbers = #tpu.dot_dimension_numbers<[1], [0], [0], [1], [0, 0, 1, 1], [], []>} : vector<16x128xbf16>, vector<128x128xbf16>, vector<16x128xf32> -> vector<16x128xf32>
    %247 = arith.addf %241, %246 : vector<16x128xf32>
    %c4_188 = arith.constant 4 : index
    %c0_189 = arith.constant 0 : index
    %248 = vector.load %arg5[%c4_188, %c0_189] : memref<24x128xf32, #tpu.memory_space<vmem>>, vector<16x128xf32>
    %249 = arith.truncf %248 : vector<16x128xf32> to vector<16x128xbf16>
    %c4_190 = arith.constant 4 : index
    %c0_191 = arith.constant 0 : index
    %c0_192 = arith.constant 0 : index
    %250 = vector.load %arg2[%c4_190, %c0_191, %c0_192] : memref<27x128x128xbf16, #tpu.memory_space<vmem>>, vector<1x128x128xbf16>
    %251 = vector.shape_cast %250 : vector<1x128x128xbf16> to vector<128x128xbf16>
    %cst_193 = arith.constant dense<0.000000e+00> : vector<16x128xf32>
    %252 = tpu.matmul %249, %251, %cst_193 {dimension_numbers = #tpu.dot_dimension_numbers<[1], [0], [0], [1], [0, 0, 1, 1], [], []>} : vector<16x128xbf16>, vector<128x128xbf16>, vector<16x128xf32> -> vector<16x128xf32>
    %253 = arith.addf %247, %252 : vector<16x128xf32>
    %254 = vector.extract_strided_slice %0 {offsets = [0, 0], sizes = [1, 128], strides = [1, 1]} : vector<20x128xf32> to vector<1x128xf32>
    %255 = vector.broadcast %254 : vector<1x128xf32> to vector<16x128xf32>
    %256 = arith.addf %253, %255 : vector<16x128xf32>
    %cst_194 = arith.constant 0.000000e+00 : f32
    %257 = vector.broadcast %cst_194 : f32 to vector<16x128xf32>
    %258 = arith.maximumf %256, %257 : vector<16x128xf32>
    %259 = vector.extract_strided_slice %0 {offsets = [1, 0], sizes = [1, 128], strides = [1, 1]} : vector<20x128xf32> to vector<1x128xf32>
    %260 = vector.broadcast %259 : vector<1x128xf32> to vector<16x128xf32>
    %261 = arith.mulf %258, %260 : vector<16x128xf32>
    %262 = vector.extract_strided_slice %0 {offsets = [2, 0], sizes = [1, 128], strides = [1, 1]} : vector<20x128xf32> to vector<1x128xf32>
    %263 = vector.broadcast %262 : vector<1x128xf32> to vector<16x128xf32>
    %264 = arith.addf %261, %263 : vector<16x128xf32>
    %cst_195 = arith.constant 0.000000e+00 : f32
    %265 = vector.broadcast %cst_195 : f32 to vector<2x128xf32>
    %c0_196 = arith.constant 0 : index
    %c0_197 = arith.constant 0 : index
    %266 = vector.load %arg5[%c0_196, %c0_197] : memref<24x128xf32, #tpu.memory_space<vmem>>, vector<2x128xf32>
    tpu.vector_store %arg5[%c0_196, %c0_197], %265 {strides = array<i32>} : memref<24x128xf32, #tpu.memory_space<vmem>>, vector<2x128xf32>,
    %c18_198 = arith.constant 18 : index
    %c0_199 = arith.constant 0 : index
    %267 = vector.load %arg5[%c18_198, %c0_199] : memref<24x128xf32, #tpu.memory_space<vmem>>, vector<2x128xf32>
    tpu.vector_store %arg5[%c18_198, %c0_199], %265 {strides = array<i32>} : memref<24x128xf32, #tpu.memory_space<vmem>>, vector<2x128xf32>,
    %c2_200 = arith.constant 2 : index
    %c0_201 = arith.constant 0 : index
    %268 = vector.load %arg5[%c2_200, %c0_201] : memref<24x128xf32, #tpu.memory_space<vmem>>, vector<16x128xf32>
    tpu.vector_store %arg5[%c2_200, %c0_201], %264 {strides = array<i32>} : memref<24x128xf32, #tpu.memory_space<vmem>>, vector<16x128xf32>,
    %cst_202 = arith.constant 0.000000e+00 : f32
    %269 = vector.broadcast %cst_202 : f32 to vector<16x128xf32>
    %c0_203 = arith.constant 0 : index
    %c0_204 = arith.constant 0 : index
    %270 = vector.load %arg5[%c0_203, %c0_204] : memref<24x128xf32, #tpu.memory_space<vmem>>, vector<16x128xf32>
    %271 = arith.truncf %270 : vector<16x128xf32> to vector<16x128xbf16>
    %c5_205 = arith.constant 5 : index
    %c0_206 = arith.constant 0 : index
    %c0_207 = arith.constant 0 : index
    %272 = vector.load %arg2[%c5_205, %c0_206, %c0_207] : memref<27x128x128xbf16, #tpu.memory_space<vmem>>, vector<1x128x128xbf16>
    %273 = vector.shape_cast %272 : vector<1x128x128xbf16> to vector<128x128xbf16>
    %cst_208 = arith.constant dense<0.000000e+00> : vector<16x128xf32>
    %274 = tpu.matmul %271, %273, %cst_208 {dimension_numbers = #tpu.dot_dimension_numbers<[1], [0], [0], [1], [0, 0, 1, 1], [], []>} : vector<16x128xbf16>, vector<128x128xbf16>, vector<16x128xf32> -> vector<16x128xf32>
    %275 = arith.addf %269, %274 : vector<16x128xf32>
    %c1_209 = arith.constant 1 : index
    %c0_210 = arith.constant 0 : index
    %276 = vector.load %arg5[%c1_209, %c0_210] : memref<24x128xf32, #tpu.memory_space<vmem>>, vector<16x128xf32>
    %277 = arith.truncf %276 : vector<16x128xf32> to vector<16x128xbf16>
    %c6_211 = arith.constant 6 : index
    %c0_212 = arith.constant 0 : index
    %c0_213 = arith.constant 0 : index
    %278 = vector.load %arg2[%c6_211, %c0_212, %c0_213] : memref<27x128x128xbf16, #tpu.memory_space<vmem>>, vector<1x128x128xbf16>
    %279 = vector.shape_cast %278 : vector<1x128x128xbf16> to vector<128x128xbf16>
    %cst_214 = arith.constant dense<0.000000e+00> : vector<16x128xf32>
    %280 = tpu.matmul %277, %279, %cst_214 {dimension_numbers = #tpu.dot_dimension_numbers<[1], [0], [0], [1], [0, 0, 1, 1], [], []>} : vector<16x128xbf16>, vector<128x128xbf16>, vector<16x128xf32> -> vector<16x128xf32>
    %281 = arith.addf %275, %280 : vector<16x128xf32>
    %c2_215 = arith.constant 2 : index
    %c0_216 = arith.constant 0 : index
    %282 = vector.load %arg5[%c2_215, %c0_216] : memref<24x128xf32, #tpu.memory_space<vmem>>, vector<16x128xf32>
    %283 = arith.truncf %282 : vector<16x128xf32> to vector<16x128xbf16>
    %c7_217 = arith.constant 7 : index
    %c0_218 = arith.constant 0 : index
    %c0_219 = arith.constant 0 : index
    %284 = vector.load %arg2[%c7_217, %c0_218, %c0_219] : memref<27x128x128xbf16, #tpu.memory_space<vmem>>, vector<1x128x128xbf16>
    %285 = vector.shape_cast %284 : vector<1x128x128xbf16> to vector<128x128xbf16>
    %cst_220 = arith.constant dense<0.000000e+00> : vector<16x128xf32>
    %286 = tpu.matmul %283, %285, %cst_220 {dimension_numbers = #tpu.dot_dimension_numbers<[1], [0], [0], [1], [0, 0, 1, 1], [], []>} : vector<16x128xbf16>, vector<128x128xbf16>, vector<16x128xf32> -> vector<16x128xf32>
    %287 = arith.addf %281, %286 : vector<16x128xf32>
    %c3_221 = arith.constant 3 : index
    %c0_222 = arith.constant 0 : index
    %288 = vector.load %arg5[%c3_221, %c0_222] : memref<24x128xf32, #tpu.memory_space<vmem>>, vector<16x128xf32>
    %289 = arith.truncf %288 : vector<16x128xf32> to vector<16x128xbf16>
    %c8_223 = arith.constant 8 : index
    %c0_224 = arith.constant 0 : index
    %c0_225 = arith.constant 0 : index
    %290 = vector.load %arg2[%c8_223, %c0_224, %c0_225] : memref<27x128x128xbf16, #tpu.memory_space<vmem>>, vector<1x128x128xbf16>
    %291 = vector.shape_cast %290 : vector<1x128x128xbf16> to vector<128x128xbf16>
    %cst_226 = arith.constant dense<0.000000e+00> : vector<16x128xf32>
    %292 = tpu.matmul %289, %291, %cst_226 {dimension_numbers = #tpu.dot_dimension_numbers<[1], [0], [0], [1], [0, 0, 1, 1], [], []>} : vector<16x128xbf16>, vector<128x128xbf16>, vector<16x128xf32> -> vector<16x128xf32>
    %293 = arith.addf %287, %292 : vector<16x128xf32>
    %c4_227 = arith.constant 4 : index
    %c0_228 = arith.constant 0 : index
    %294 = vector.load %arg5[%c4_227, %c0_228] : memref<24x128xf32, #tpu.memory_space<vmem>>, vector<16x128xf32>
    %295 = arith.truncf %294 : vector<16x128xf32> to vector<16x128xbf16>
    %c9_229 = arith.constant 9 : index
    %c0_230 = arith.constant 0 : index
    %c0_231 = arith.constant 0 : index
    %296 = vector.load %arg2[%c9_229, %c0_230, %c0_231] : memref<27x128x128xbf16, #tpu.memory_space<vmem>>, vector<1x128x128xbf16>
    %297 = vector.shape_cast %296 : vector<1x128x128xbf16> to vector<128x128xbf16>
    %cst_232 = arith.constant dense<0.000000e+00> : vector<16x128xf32>
    %298 = tpu.matmul %295, %297, %cst_232 {dimension_numbers = #tpu.dot_dimension_numbers<[1], [0], [0], [1], [0, 0, 1, 1], [], []>} : vector<16x128xbf16>, vector<128x128xbf16>, vector<16x128xf32> -> vector<16x128xf32>
    %299 = arith.addf %293, %298 : vector<16x128xf32>
    %300 = vector.extract_strided_slice %0 {offsets = [3, 0], sizes = [1, 128], strides = [1, 1]} : vector<20x128xf32> to vector<1x128xf32>
    %301 = vector.broadcast %300 : vector<1x128xf32> to vector<16x128xf32>
    %302 = arith.addf %299, %301 : vector<16x128xf32>
    %cst_233 = arith.constant 0.000000e+00 : f32
    %303 = vector.broadcast %cst_233 : f32 to vector<16x128xf32>
    %304 = arith.maximumf %302, %303 : vector<16x128xf32>
    %305 = vector.extract_strided_slice %0 {offsets = [4, 0], sizes = [1, 128], strides = [1, 1]} : vector<20x128xf32> to vector<1x128xf32>
    %306 = vector.broadcast %305 : vector<1x128xf32> to vector<16x128xf32>
    %307 = arith.mulf %304, %306 : vector<16x128xf32>
    %308 = vector.extract_strided_slice %0 {offsets = [5, 0], sizes = [1, 128], strides = [1, 1]} : vector<20x128xf32> to vector<1x128xf32>
    %309 = vector.broadcast %308 : vector<1x128xf32> to vector<16x128xf32>
    %310 = arith.addf %307, %309 : vector<16x128xf32>
    %cst_234 = arith.constant 0.000000e+00 : f32
    %311 = vector.broadcast %cst_234 : f32 to vector<3x128xf32>
    %c0_235 = arith.constant 0 : index
    %c0_236 = arith.constant 0 : index
    %312 = vector.load %arg5[%c0_235, %c0_236] : memref<24x128xf32, #tpu.memory_space<vmem>>, vector<3x128xf32>
    tpu.vector_store %arg5[%c0_235, %c0_236], %311 {strides = array<i32>} : memref<24x128xf32, #tpu.memory_space<vmem>>, vector<3x128xf32>,
    %c19_237 = arith.constant 19 : index
    %c0_238 = arith.constant 0 : index
    %313 = vector.load %arg5[%c19_237, %c0_238] : memref<24x128xf32, #tpu.memory_space<vmem>>, vector<3x128xf32>
    tpu.vector_store %arg5[%c19_237, %c0_238], %311 {strides = array<i32>} : memref<24x128xf32, #tpu.memory_space<vmem>>, vector<3x128xf32>,
    %c3_239 = arith.constant 3 : index
    %c0_240 = arith.constant 0 : index
    %314 = vector.load %arg5[%c3_239, %c0_240] : memref<24x128xf32, #tpu.memory_space<vmem>>, vector<16x128xf32>
    tpu.vector_store %arg5[%c3_239, %c0_240], %310 {strides = array<i32>} : memref<24x128xf32, #tpu.memory_space<vmem>>, vector<16x128xf32>,
    %cst_241 = arith.constant 0.000000e+00 : f32
    %315 = vector.broadcast %cst_241 : f32 to vector<18x128xf32>
    %c0_242 = arith.constant 0 : index
    %c0_243 = arith.constant 0 : index
    %316 = vector.load %arg5[%c0_242, %c0_243] : memref<24x128xf32, #tpu.memory_space<vmem>>, vector<18x128xf32>
    %317 = arith.truncf %316 : vector<18x128xf32> to vector<18x128xbf16>
    %c10_244 = arith.constant 10 : index
    %c0_245 = arith.constant 0 : index
    %c0_246 = arith.constant 0 : index
    %318 = vector.load %arg2[%c10_244, %c0_245, %c0_246] : memref<27x128x128xbf16, #tpu.memory_space<vmem>>, vector<1x128x128xbf16>
    %319 = vector.shape_cast %318 : vector<1x128x128xbf16> to vector<128x128xbf16>
    %cst_247 = arith.constant dense<0.000000e+00> : vector<18x128xf32>
    %320 = tpu.matmul %317, %319, %cst_247 {dimension_numbers = #tpu.dot_dimension_numbers<[1], [0], [0], [1], [0, 0, 1, 1], [], []>} : vector<18x128xbf16>, vector<128x128xbf16>, vector<18x128xf32> -> vector<18x128xf32>
    %321 = arith.addf %315, %320 : vector<18x128xf32>
    %c1_248 = arith.constant 1 : index
    %c0_249 = arith.constant 0 : index
    %322 = vector.load %arg5[%c1_248, %c0_249] : memref<24x128xf32, #tpu.memory_space<vmem>>, vector<18x128xf32>
    %323 = arith.truncf %322 : vector<18x128xf32> to vector<18x128xbf16>
    %c11_250 = arith.constant 11 : index
    %c0_251 = arith.constant 0 : index
    %c0_252 = arith.constant 0 : index
    %324 = vector.load %arg2[%c11_250, %c0_251, %c0_252] : memref<27x128x128xbf16, #tpu.memory_space<vmem>>, vector<1x128x128xbf16>
    %325 = vector.shape_cast %324 : vector<1x128x128xbf16> to vector<128x128xbf16>
    %cst_253 = arith.constant dense<0.000000e+00> : vector<18x128xf32>
    %326 = tpu.matmul %323, %325, %cst_253 {dimension_numbers = #tpu.dot_dimension_numbers<[1], [0], [0], [1], [0, 0, 1, 1], [], []>} : vector<18x128xbf16>, vector<128x128xbf16>, vector<18x128xf32> -> vector<18x128xf32>
    %327 = arith.addf %321, %326 : vector<18x128xf32>
    %c2_254 = arith.constant 2 : index
    %c0_255 = arith.constant 0 : index
    %328 = vector.load %arg5[%c2_254, %c0_255] : memref<24x128xf32, #tpu.memory_space<vmem>>, vector<18x128xf32>
    %329 = arith.truncf %328 : vector<18x128xf32> to vector<18x128xbf16>
    %c12_256 = arith.constant 12 : index
    %c0_257 = arith.constant 0 : index
    %c0_258 = arith.constant 0 : index
    %330 = vector.load %arg2[%c12_256, %c0_257, %c0_258] : memref<27x128x128xbf16, #tpu.memory_space<vmem>>, vector<1x128x128xbf16>
    %331 = vector.shape_cast %330 : vector<1x128x128xbf16> to vector<128x128xbf16>
    %cst_259 = arith.constant dense<0.000000e+00> : vector<18x128xf32>
    %332 = tpu.matmul %329, %331, %cst_259 {dimension_numbers = #tpu.dot_dimension_numbers<[1], [0], [0], [1], [0, 0, 1, 1], [], []>} : vector<18x128xbf16>, vector<128x128xbf16>, vector<18x128xf32> -> vector<18x128xf32>
    %333 = arith.addf %327, %332 : vector<18x128xf32>
    %c3_260 = arith.constant 3 : index
    %c0_261 = arith.constant 0 : index
    %334 = vector.load %arg5[%c3_260, %c0_261] : memref<24x128xf32, #tpu.memory_space<vmem>>, vector<18x128xf32>
    %335 = arith.truncf %334 : vector<18x128xf32> to vector<18x128xbf16>
    %c13_262 = arith.constant 13 : index
    %c0_263 = arith.constant 0 : index
    %c0_264 = arith.constant 0 : index
    %336 = vector.load %arg2[%c13_262, %c0_263, %c0_264] : memref<27x128x128xbf16, #tpu.memory_space<vmem>>, vector<1x128x128xbf16>
    %337 = vector.shape_cast %336 : vector<1x128x128xbf16> to vector<128x128xbf16>
    %cst_265 = arith.constant dense<0.000000e+00> : vector<18x128xf32>
    %338 = tpu.matmul %335, %337, %cst_265 {dimension_numbers = #tpu.dot_dimension_numbers<[1], [0], [0], [1], [0, 0, 1, 1], [], []>} : vector<18x128xbf16>, vector<128x128xbf16>, vector<18x128xf32> -> vector<18x128xf32>
    %339 = arith.addf %333, %338 : vector<18x128xf32>
    %c4_266 = arith.constant 4 : index
    %c0_267 = arith.constant 0 : index
    %340 = vector.load %arg5[%c4_266, %c0_267] : memref<24x128xf32, #tpu.memory_space<vmem>>, vector<18x128xf32>
    %341 = arith.truncf %340 : vector<18x128xf32> to vector<18x128xbf16>
    %c14_268 = arith.constant 14 : index
    %c0_269 = arith.constant 0 : index
    %c0_270 = arith.constant 0 : index
    %342 = vector.load %arg2[%c14_268, %c0_269, %c0_270] : memref<27x128x128xbf16, #tpu.memory_space<vmem>>, vector<1x128x128xbf16>
    %343 = vector.shape_cast %342 : vector<1x128x128xbf16> to vector<128x128xbf16>
    %cst_271 = arith.constant dense<0.000000e+00> : vector<18x128xf32>
    %344 = tpu.matmul %341, %343, %cst_271 {dimension_numbers = #tpu.dot_dimension_numbers<[1], [0], [0], [1], [0, 0, 1, 1], [], []>} : vector<18x128xbf16>, vector<128x128xbf16>, vector<18x128xf32> -> vector<18x128xf32>
    %345 = arith.addf %339, %344 : vector<18x128xf32>
    %346 = vector.extract_strided_slice %0 {offsets = [6, 0], sizes = [1, 128], strides = [1, 1]} : vector<20x128xf32> to vector<1x128xf32>
    %347 = vector.broadcast %346 : vector<1x128xf32> to vector<18x128xf32>
    %348 = arith.addf %345, %347 : vector<18x128xf32>
    %cst_272 = arith.constant 0.000000e+00 : f32
    %349 = vector.broadcast %cst_272 : f32 to vector<18x128xf32>
    %350 = arith.maximumf %348, %349 : vector<18x128xf32>
    %351 = vector.extract_strided_slice %0 {offsets = [7, 0], sizes = [1, 128], strides = [1, 1]} : vector<20x128xf32> to vector<1x128xf32>
    %352 = vector.broadcast %351 : vector<1x128xf32> to vector<18x128xf32>
    %353 = arith.mulf %350, %352 : vector<18x128xf32>
    %354 = vector.extract_strided_slice %0 {offsets = [8, 0], sizes = [1, 128], strides = [1, 1]} : vector<20x128xf32> to vector<1x128xf32>
    %355 = vector.broadcast %354 : vector<1x128xf32> to vector<18x128xf32>
    %356 = arith.addf %353, %355 : vector<18x128xf32>
    %c0_273 = arith.constant 0 : index
    %c0_274 = arith.constant 0 : index
    %357 = vector.load %arg5[%c0_273, %c0_274] : memref<24x128xf32, #tpu.memory_space<vmem>>, vector<18x128xf32>
    tpu.vector_store %arg5[%c0_273, %c0_274], %356 {strides = array<i32>} : memref<24x128xf32, #tpu.memory_space<vmem>>, vector<18x128xf32>,
    %cst_275 = arith.constant 0.000000e+00 : f32
    %358 = vector.broadcast %cst_275 : f32 to vector<12x128xf32>
    %c0_276 = arith.constant 0 : index
    %c0_277 = arith.constant 0 : index
    %359 = vector.load %arg5[%c0_276, %c0_277] : memref<24x128xf32, #tpu.memory_space<vmem>>, vector<12x128xf32>
    %360 = arith.truncf %359 : vector<12x128xf32> to vector<12x128xbf16>
    %c15_278 = arith.constant 15 : index
    %c0_279 = arith.constant 0 : index
    %c0_280 = arith.constant 0 : index
    %361 = vector.load %arg2[%c15_278, %c0_279, %c0_280] : memref<27x128x128xbf16, #tpu.memory_space<vmem>>, vector<1x128x128xbf16>
    %362 = vector.shape_cast %361 : vector<1x128x128xbf16> to vector<128x128xbf16>
    %cst_281 = arith.constant dense<0.000000e+00> : vector<12x128xf32>
    %363 = tpu.matmul %360, %362, %cst_281 {dimension_numbers = #tpu.dot_dimension_numbers<[1], [0], [0], [1], [0, 0, 1, 1], [], []>} : vector<12x128xbf16>, vector<128x128xbf16>, vector<12x128xf32> -> vector<12x128xf32>
    %364 = arith.addf %358, %363 : vector<12x128xf32>
    %c1_282 = arith.constant 1 : index
    %c0_283 = arith.constant 0 : index
    %365 = vector.load %arg5[%c1_282, %c0_283] : memref<24x128xf32, #tpu.memory_space<vmem>>, vector<12x128xf32>
    %366 = arith.truncf %365 : vector<12x128xf32> to vector<12x128xbf16>
    %c16_284 = arith.constant 16 : index
    %c0_285 = arith.constant 0 : index
    %c0_286 = arith.constant 0 : index
    %367 = vector.load %arg2[%c16_284, %c0_285, %c0_286] : memref<27x128x128xbf16, #tpu.memory_space<vmem>>, vector<1x128x128xbf16>
    %368 = vector.shape_cast %367 : vector<1x128x128xbf16> to vector<128x128xbf16>
    %cst_287 = arith.constant dense<0.000000e+00> : vector<12x128xf32>
    %369 = tpu.matmul %366, %368, %cst_287 {dimension_numbers = #tpu.dot_dimension_numbers<[1], [0], [0], [1], [0, 0, 1, 1], [], []>} : vector<12x128xbf16>, vector<128x128xbf16>, vector<12x128xf32> -> vector<12x128xf32>
    %370 = arith.addf %364, %369 : vector<12x128xf32>
    %c2_288 = arith.constant 2 : index
    %c0_289 = arith.constant 0 : index
    %371 = vector.load %arg5[%c2_288, %c0_289] : memref<24x128xf32, #tpu.memory_space<vmem>>, vector<12x128xf32>
    %372 = arith.truncf %371 : vector<12x128xf32> to vector<12x128xbf16>
    %c17_290 = arith.constant 17 : index
    %c0_291 = arith.constant 0 : index
    %c0_292 = arith.constant 0 : index
    %373 = vector.load %arg2[%c17_290, %c0_291, %c0_292] : memref<27x128x128xbf16, #tpu.memory_space<vmem>>, vector<1x128x128xbf16>
    %374 = vector.shape_cast %373 : vector<1x128x128xbf16> to vector<128x128xbf16>
    %cst_293 = arith.constant dense<0.000000e+00> : vector<12x128xf32>
    %375 = tpu.matmul %372, %374, %cst_293 {dimension_numbers = #tpu.dot_dimension_numbers<[1], [0], [0], [1], [0, 0, 1, 1], [], []>} : vector<12x128xbf16>, vector<128x128xbf16>, vector<12x128xf32> -> vector<12x128xf32>
    %376 = arith.addf %370, %375 : vector<12x128xf32>
    %c3_294 = arith.constant 3 : index
    %c0_295 = arith.constant 0 : index
    %377 = vector.load %arg5[%c3_294, %c0_295] : memref<24x128xf32, #tpu.memory_space<vmem>>, vector<12x128xf32>
    %378 = arith.truncf %377 : vector<12x128xf32> to vector<12x128xbf16>
    %c18_296 = arith.constant 18 : index
    %c0_297 = arith.constant 0 : index
    %c0_298 = arith.constant 0 : index
    %379 = vector.load %arg2[%c18_296, %c0_297, %c0_298] : memref<27x128x128xbf16, #tpu.memory_space<vmem>>, vector<1x128x128xbf16>
    %380 = vector.shape_cast %379 : vector<1x128x128xbf16> to vector<128x128xbf16>
    %cst_299 = arith.constant dense<0.000000e+00> : vector<12x128xf32>
    %381 = tpu.matmul %378, %380, %cst_299 {dimension_numbers = #tpu.dot_dimension_numbers<[1], [0], [0], [1], [0, 0, 1, 1], [], []>} : vector<12x128xbf16>, vector<128x128xbf16>, vector<12x128xf32> -> vector<12x128xf32>
    %382 = arith.addf %376, %381 : vector<12x128xf32>
    %c4_300 = arith.constant 4 : index
    %c0_301 = arith.constant 0 : index
    %383 = vector.load %arg5[%c4_300, %c0_301] : memref<24x128xf32, #tpu.memory_space<vmem>>, vector<12x128xf32>
    %384 = arith.truncf %383 : vector<12x128xf32> to vector<12x128xbf16>
    %c19_302 = arith.constant 19 : index
    %c0_303 = arith.constant 0 : index
    %c0_304 = arith.constant 0 : index
    %385 = vector.load %arg2[%c19_302, %c0_303, %c0_304] : memref<27x128x128xbf16, #tpu.memory_space<vmem>>, vector<1x128x128xbf16>
    %386 = vector.shape_cast %385 : vector<1x128x128xbf16> to vector<128x128xbf16>
    %cst_305 = arith.constant dense<0.000000e+00> : vector<12x128xf32>
    %387 = tpu.matmul %384, %386, %cst_305 {dimension_numbers = #tpu.dot_dimension_numbers<[1], [0], [0], [1], [0, 0, 1, 1], [], []>} : vector<12x128xbf16>, vector<128x128xbf16>, vector<12x128xf32> -> vector<12x128xf32>
    %388 = arith.addf %382, %387 : vector<12x128xf32>
    %c5_306 = arith.constant 5 : index
    %c0_307 = arith.constant 0 : index
    %389 = vector.load %arg5[%c5_306, %c0_307] : memref<24x128xf32, #tpu.memory_space<vmem>>, vector<12x128xf32>
    %390 = arith.truncf %389 : vector<12x128xf32> to vector<12x128xbf16>
    %c20_308 = arith.constant 20 : index
    %c0_309 = arith.constant 0 : index
    %c0_310 = arith.constant 0 : index
    %391 = vector.load %arg2[%c20_308, %c0_309, %c0_310] : memref<27x128x128xbf16, #tpu.memory_space<vmem>>, vector<1x128x128xbf16>
    %392 = vector.shape_cast %391 : vector<1x128x128xbf16> to vector<128x128xbf16>
    %cst_311 = arith.constant dense<0.000000e+00> : vector<12x128xf32>
    %393 = tpu.matmul %390, %392, %cst_311 {dimension_numbers = #tpu.dot_dimension_numbers<[1], [0], [0], [1], [0, 0, 1, 1], [], []>} : vector<12x128xbf16>, vector<128x128xbf16>, vector<12x128xf32> -> vector<12x128xf32>
    %394 = arith.addf %388, %393 : vector<12x128xf32>
    %c6_312 = arith.constant 6 : index
    %c0_313 = arith.constant 0 : index
    %395 = vector.load %arg5[%c6_312, %c0_313] : memref<24x128xf32, #tpu.memory_space<vmem>>, vector<12x128xf32>
    %396 = arith.truncf %395 : vector<12x128xf32> to vector<12x128xbf16>
    %c21_314 = arith.constant 21 : index
    %c0_315 = arith.constant 0 : index
    %c0_316 = arith.constant 0 : index
    %397 = vector.load %arg2[%c21_314, %c0_315, %c0_316] : memref<27x128x128xbf16, #tpu.memory_space<vmem>>, vector<1x128x128xbf16>
    %398 = vector.shape_cast %397 : vector<1x128x128xbf16> to vector<128x128xbf16>
    %cst_317 = arith.constant dense<0.000000e+00> : vector<12x128xf32>
    %399 = tpu.matmul %396, %398, %cst_317 {dimension_numbers = #tpu.dot_dimension_numbers<[1], [0], [0], [1], [0, 0, 1, 1], [], []>} : vector<12x128xbf16>, vector<128x128xbf16>, vector<12x128xf32> -> vector<12x128xf32>
    %400 = arith.addf %394, %399 : vector<12x128xf32>
    %401 = vector.extract_strided_slice %0 {offsets = [9, 0], sizes = [1, 128], strides = [1, 1]} : vector<20x128xf32> to vector<1x128xf32>
    %402 = vector.broadcast %401 : vector<1x128xf32> to vector<12x128xf32>
    %403 = arith.addf %400, %402 : vector<12x128xf32>
    %cst_318 = arith.constant 0.000000e+00 : f32
    %404 = vector.broadcast %cst_318 : f32 to vector<12x128xf32>
    %405 = arith.maximumf %403, %404 : vector<12x128xf32>
    %406 = vector.extract_strided_slice %0 {offsets = [10, 0], sizes = [1, 128], strides = [1, 1]} : vector<20x128xf32> to vector<1x128xf32>
    %407 = vector.broadcast %406 : vector<1x128xf32> to vector<12x128xf32>
    %408 = arith.mulf %405, %407 : vector<12x128xf32>
    %409 = vector.extract_strided_slice %0 {offsets = [11, 0], sizes = [1, 128], strides = [1, 1]} : vector<20x128xf32> to vector<1x128xf32>
    %410 = vector.broadcast %409 : vector<1x128xf32> to vector<12x128xf32>
    %411 = arith.addf %408, %410 : vector<12x128xf32>
    %412 = arith.truncf %411 : vector<12x128xf32> to vector<12x128xbf16>
    %c22_319 = arith.constant 22 : index
    %c0_320 = arith.constant 0 : index
    %c0_321 = arith.constant 0 : index
    %413 = vector.load %arg2[%c22_319, %c0_320, %c0_321] : memref<27x128x128xbf16, #tpu.memory_space<vmem>>, vector<1x128x128xbf16>
    %414 = vector.shape_cast %413 : vector<1x128x128xbf16> to vector<128x128xbf16>
    %cst_322 = arith.constant dense<0.000000e+00> : vector<12x128xf32>
    %415 = tpu.matmul %412, %414, %cst_322 {dimension_numbers = #tpu.dot_dimension_numbers<[1], [0], [0], [1], [0, 0, 1, 1], [], []>} : vector<12x128xbf16>, vector<128x128xbf16>, vector<12x128xf32> -> vector<12x128xf32>
    %416 = vector.extract_strided_slice %0 {offsets = [12, 0], sizes = [1, 128], strides = [1, 1]} : vector<20x128xf32> to vector<1x128xf32>
    %417 = vector.broadcast %416 : vector<1x128xf32> to vector<12x128xf32>
    %418 = arith.addf %415, %417 : vector<12x128xf32>
    %cst_323 = arith.constant dense<0.000000e+00> : vector<128xf32>
    %419 = vector.multi_reduction <add>, %418, %cst_323 [0] : vector<12x128xf32> to vector<128xf32>
    %420 = vector.shape_cast %419 : vector<128xf32> to vector<1x128xf32>
    %421 = arith.mulf %418, %418 : vector<12x128xf32>
    %cst_324 = arith.constant dense<0.000000e+00> : vector<128xf32>
    %422 = vector.multi_reduction <add>, %421, %cst_324 [0] : vector<12x128xf32> to vector<128xf32>
    %423 = vector.shape_cast %422 : vector<128xf32> to vector<1x128xf32>
    %cst_325 = arith.constant 0.0833333358 : f32
    %424 = vector.broadcast %cst_325 : f32 to vector<1x128xf32>
    %425 = arith.mulf %420, %424 : vector<1x128xf32>
    %426 = arith.mulf %425, %420 : vector<1x128xf32>
    %427 = arith.subf %423, %426 : vector<1x128xf32>
    %cst_326 = arith.constant 0.000000e+00 : f32
    %428 = vector.broadcast %cst_326 : f32 to vector<1x128xf32>
    %429 = arith.maximumf %427, %428 : vector<1x128xf32>
    %cst_327 = arith.constant 0.0909090936 : f32
    %430 = vector.broadcast %cst_327 : f32 to vector<1x128xf32>
    %431 = arith.mulf %429, %430 : vector<1x128xf32>
    %432 = math.sqrt %431 : vector<1x128xf32>
    %433 = tpu.concatenate %209, %425 in 0 : vector<1x128xf32>, vector<1x128xf32> -> vector<2x128xf32>
    %434 = arith.truncf %433 : vector<2x128xf32> to vector<2x128xbf16>
    %435 = tpu.concatenate %216, %432 in 0 : vector<1x128xf32>, vector<1x128xf32> -> vector<2x128xf32>
    %436 = arith.truncf %435 : vector<2x128xf32> to vector<2x128xbf16>
    %c23 = arith.constant 23 : index
    %c0_328 = arith.constant 0 : index
    %c0_329 = arith.constant 0 : index
    %437 = vector.load %arg2[%c23, %c0_328, %c0_329] : memref<27x128x128xbf16, #tpu.memory_space<vmem>>, vector<1x128x128xbf16>
    %438 = vector.shape_cast %437 : vector<1x128x128xbf16> to vector<128x128xbf16>
    %cst_330 = arith.constant dense<0.000000e+00> : vector<2x128xf32>
    %439 = tpu.matmul %434, %438, %cst_330 {dimension_numbers = #tpu.dot_dimension_numbers<[1], [0], [0], [1], [0, 0, 1, 1], [], []>} : vector<2x128xbf16>, vector<128x128xbf16>, vector<2x128xf32> -> vector<2x128xf32>
    %c24 = arith.constant 24 : index
    %c0_331 = arith.constant 0 : index
    %c0_332 = arith.constant 0 : index
    %440 = vector.load %arg2[%c24, %c0_331, %c0_332] : memref<27x128x128xbf16, #tpu.memory_space<vmem>>, vector<1x128x128xbf16>
    %441 = vector.shape_cast %440 : vector<1x128x128xbf16> to vector<128x128xbf16>
    %cst_333 = arith.constant dense<0.000000e+00> : vector<2x128xf32>
    %442 = tpu.matmul %436, %441, %cst_333 {dimension_numbers = #tpu.dot_dimension_numbers<[1], [0], [0], [1], [0, 0, 1, 1], [], []>} : vector<2x128xbf16>, vector<128x128xbf16>, vector<2x128xf32> -> vector<2x128xf32>
    %443 = arith.addf %439, %442 : vector<2x128xf32>
    %444 = vector.extract_strided_slice %0 {offsets = [15, 0], sizes = [1, 128], strides = [1, 1]} : vector<20x128xf32> to vector<1x128xf32>
    %445 = vector.broadcast %444 : vector<1x128xf32> to vector<2x128xf32>
    %446 = arith.mulf %443, %445 : vector<2x128xf32>
    %447 = vector.extract_strided_slice %0 {offsets = [16, 0], sizes = [1, 128], strides = [1, 1]} : vector<20x128xf32> to vector<1x128xf32>
    %448 = vector.broadcast %447 : vector<1x128xf32> to vector<2x128xf32>
    %449 = arith.addf %446, %448 : vector<2x128xf32>
    %cst_334 = arith.constant 0.000000e+00 : f32
    %450 = vector.broadcast %cst_334 : f32 to vector<2x128xf32>
    %451 = arith.maximumf %449, %450 : vector<2x128xf32>
    %452 = arith.truncf %451 : vector<2x128xf32> to vector<2x128xbf16>
    %c25 = arith.constant 25 : index
    %c0_335 = arith.constant 0 : index
    %c0_336 = arith.constant 0 : index
    %453 = vector.load %arg2[%c25, %c0_335, %c0_336] : memref<27x128x128xbf16, #tpu.memory_space<vmem>>, vector<1x128x128xbf16>
    %454 = vector.shape_cast %453 : vector<1x128x128xbf16> to vector<128x128xbf16>
    %cst_337 = arith.constant dense<0.000000e+00> : vector<2x128xf32>
    %455 = tpu.matmul %452, %454, %cst_337 {dimension_numbers = #tpu.dot_dimension_numbers<[1], [0], [0], [1], [0, 0, 1, 1], [], []>} : vector<2x128xbf16>, vector<128x128xbf16>, vector<2x128xf32> -> vector<2x128xf32>
    %456 = vector.extract_strided_slice %0 {offsets = [17, 0], sizes = [1, 128], strides = [1, 1]} : vector<20x128xf32> to vector<1x128xf32>
    %457 = vector.broadcast %456 : vector<1x128xf32> to vector<2x128xf32>
    %458 = arith.mulf %455, %457 : vector<2x128xf32>
    %459 = vector.extract_strided_slice %0 {offsets = [18, 0], sizes = [1, 128], strides = [1, 1]} : vector<20x128xf32> to vector<1x128xf32>
    %460 = vector.broadcast %459 : vector<1x128xf32> to vector<2x128xf32>
    %461 = arith.addf %458, %460 : vector<2x128xf32>
    %cst_338 = arith.constant 0.000000e+00 : f32
    %462 = vector.broadcast %cst_338 : f32 to vector<2x128xf32>
    %463 = arith.maximumf %461, %462 : vector<2x128xf32>
    %464 = arith.truncf %463 : vector<2x128xf32> to vector<2x128xbf16>
    %c26 = arith.constant 26 : index
    %c0_339 = arith.constant 0 : index
    %c0_340 = arith.constant 0 : index
    %465 = vector.load %arg2[%c26, %c0_339, %c0_340] : memref<27x128x128xbf16, #tpu.memory_space<vmem>>, vector<1x128x128xbf16>
    %466 = vector.shape_cast %465 : vector<1x128x128xbf16> to vector<128x128xbf16>
    %cst_341 = arith.constant dense<0.000000e+00> : vector<2x128xf32>
    %467 = tpu.matmul %464, %466, %cst_341 {dimension_numbers = #tpu.dot_dimension_numbers<[1], [0], [0], [1], [0, 0, 1, 1], [], []>} : vector<2x128xbf16>, vector<128x128xbf16>, vector<2x128xf32> -> vector<2x128xf32>
    %468 = vector.extract_strided_slice %0 {offsets = [19, 0], sizes = [1, 128], strides = [1, 1]} : vector<20x128xf32> to vector<1x128xf32>
    %469 = vector.broadcast %468 : vector<1x128xf32> to vector<2x128xf32>
    %470 = arith.addf %467, %469 : vector<2x128xf32>
    %471 = vector.shape_cast %470 : vector<2x128xf32> to vector<2x1x128xf32>
    %472 = vector.shape_cast %451 : vector<2x128xf32> to vector<2x1x128xf32>
    %473 = tpu.concatenate %471, %472 in 1 : vector<2x1x128xf32>, vector<2x1x128xf32> -> vector<2x2x128xf32>
    %c0_342 = arith.constant 0 : index
    %c0_343 = arith.constant 0 : index
    %c0_344 = arith.constant 0 : index
    %474 = vector.load %arg4[%c0_342, %c0_343, %c0_344] : memref<2x2x128xf32, #tpu.memory_space<vmem>>, vector<2x2x128xf32>
    tpu.vector_store %arg4[%c0_342, %c0_343, %c0_344], %473 {strides = array<i32>} : memref<2x2x128xf32, #tpu.memory_space<vmem>>, vector<2x2x128xf32>,
    return
  }
  func.func @transform_0(%arg0: i32) -> (i32, i32, i32) {
    %c0_i32 = arith.constant 0 : i32
    %c0_i32_0 = arith.constant 0 : i32
    %c0_i32_1 = arith.constant 0 : i32
    return %arg0, %c0_i32, %c0_i32_0 : i32, i32, i32
  }
  func.func @transform_1(%arg0: i32) -> (i32, i32, i32) {
    %c0_i32 = arith.constant 0 : i32
    %c0_i32_0 = arith.constant 0 : i32
    %c0_i32_1 = arith.constant 0 : i32
    %c0_i32_2 = arith.constant 0 : i32
    return %c0_i32, %c0_i32_0, %c0_i32_1 : i32, i32, i32
  }
  func.func @transform_2(%arg0: i32) -> (i32, i32) {
    %c0_i32 = arith.constant 0 : i32
    %c0_i32_0 = arith.constant 0 : i32
    %c0_i32_1 = arith.constant 0 : i32
    return %c0_i32, %c0_i32_0 : i32, i32
  }
  func.func @transform_3(%arg0: i32) -> (i32, i32, i32) {
    %c0_i32 = arith.constant 0 : i32
    %c0_i32_0 = arith.constant 0 : i32
    %c0_i32_1 = arith.constant 0 : i32
    return %arg0, %c0_i32, %c0_i32_0 : i32, i32, i32
  }
}

</mosaic_0001>

<bundles_post_ra>
// kernel: tdnn_forward.1
= control target key start
LH: loop header
LB: loop body
LE: loop exit
PB: predicated region body
PF: predicated region fallthrough
CT: control target
= control target key end

     0   :  { %8 = vsyncpa [#allocation4], 0  ;;  %s8205_s12 = smov [#allocation3]   ;;  %s8921_s0 = inlined_call_operand.vmem [shape: f32[2,16,128], index: 0, kind: input, shape index: {}]   ;;  %s8922_s1 = inlined_call_operand.hbm [shape: bf16[27,128,128], index: 1, kind: input, shape index: {}]   ;;  %s8923_s2 = inlined_call_operand.vmem [shape: f32[20,128], index: 2, kind: input, shape index: {}]   ;;  %s8924_s3 = inlined_call_operand.vmem [shape: f32[2,2,128], index: 3, kind: output, shape index: {}]  }
   0x1   :  { %s16_s13 = sshll.u32 %s8205_s12, 4  ;;  %s17_s13 = int_to_ptr.vmem [resolvable:$true] %s16_s13 }
   0x2   :  { %s8191_s14 = scalar_lea.vmem %s17_s13, 27648  ;;  %p8196_p1 = scmp.lt.s32.totalorder %s17_s13, %s17_s13 }
   0x3   :  { %p8192_p0 = scmp.ne.s32.totalorder %s17_s13, %s8191_s14  ;;  %p8197_p2 = scmp.lt.s32.totalorder %s8191_s14, %s8191_s14 }
   0x5   :  { %p8198_p3 = por %p8197_p2, %p8196_p1 }
   0x7   :  { %p8199_p4 = pnand %p8198_p3, %p8192_p0 }
   0x9   :  { %8202 = shalt.err (!%p8199_p4)
}
   0xa   :  { %s8206_s15 = smov 64   ;;  %s8207_s16 = smov 4  }
   0xb   :  { %22 = dma.hbm_to_vmem [thread:$0]  %s8922_s1, 27648, %s17_s13, [#allocation4], %s8206_s15, %s8206_s15, %s8207_s16  }
   0xc   :  { %8203 = dma.done.wait [#allocation4], 27648  }
   0xd   :  { %8204 = vsyncadd [#allocation4], 4294939648  ;;  %v8208_v0 = vmov 0.0   ;;  %vm8209_vm0 = vmmov 0   ;;  %v7778_v1 = vld [vmem:[#allocation3 + $0x78] sm:$0xff]   ;;  %v7780_v3 = vld [vmem:[#allocation3 + $0x70] sm:$0xff]  }
   0xe   :  { %6772 = vmatprep.subr.bf16.mxu0 %v8208_v0  ;;  %34 = vst [vmem:[#allocation2] sm:$0x3] %v8208_v0  ;;  %35 = vst [vmem:[#allocation2 + $0x12] sm:$0x3] %v8208_v0  ;;  %6792 = vmatprep.subr.bf16.mxu1 %v8208_v0  ;;  %v7779_v2 = vld [vmem:[#allocation3 + $0x38] sm:$0xff]   ;;  %v7781_v4 = vld [vmem:[#allocation3 + $0x30] sm:$0xff]  }
   0xf   :  { %6788 = vmatprep.mubr.msk.bf16.mxu0 %vm8209_vm0, %v8208_v0  ;;  %6808 = vmatprep.mubr.msk.bf16.mxu1 %vm8209_vm0, %v8208_v0  ;;  %v7782_v5 = vld [vmem:[#allocation3 + $0x68] sm:$0xff]   ;;  %v7784_v7 = vld [vmem:[#allocation3 + $0x60] sm:$0xff]   ;;  %v7786_v9 = vld [vmem:[#allocation3 + $0x58] sm:$0xff]   ;;  %vm2717_vm1 = vcmask 1043456   ;;  %vm5390_vm2 = vcmask 1040384  }
  0x10   :  { %6773 = vmatpush3.bf16.msra.mxu0 %v7778_v1  ;;  %6793 = vmatpush3.bf16.msra.mxu1 %v7779_v2  ;;  %v7783_v6 = vld [vmem:[#allocation3 + $0x28] sm:$0xff]   ;;  %v7785_v8 = vld [vmem:[#allocation3 + $0x20] sm:$0xff]   ;;  %v7787_v10 = vld [vmem:[#allocation3 + $0x18] sm:$0xff]  }
  0x11   :  { %6774 = vmatprep.subr.bf16.mxu0 %v8208_v0  ;;  %6794 = vmatprep.subr.bf16.mxu1 %v8208_v0  ;;  %v8253_v11 = vld [vmem:[%s8921_s0] sm:$0xff]  ;;  %v8258_v12 = vld [vmem:[%s8921_s0 + $0x8] sm:$0xff]  ;;  %v7792_v19 = vld [vmem:[#allocation3 + $0x40] sm:$0xff]  }
  0x12   :  { %36 = vst [vmem:[#allocation2 + $0x2] sm:$0xff] %v8253_v11  ;;  %37 = vst [vmem:[#allocation2 + $0xa] sm:$0xff] %v8258_v12  ;;  %v7788_v13 = vld [vmem:[#allocation3 + $0x50] sm:$0xff]   ;;  %v7790_v15 = vld [vmem:[#allocation3 + $0x48] sm:$0xff]   ;;  %v257_v45 = vpack.c.bf16 %v8258_v12, %v8253_v11 }
  0x13   :  { %v7789_v14 = vld [vmem:[#allocation3 + $0x10] sm:$0xff]   ;;  %v7791_v16 = vld [vmem:[#allocation3 + $0x8] sm:$0xff]   ;;  %v7793_v20 = vld [vmem:[#allocation3] sm:$0xff]  }
  0x14   :  { %6775 = vmatpush3.bf16.msra.mxu0 %v7780_v3  ;;  %6795 = vmatpush3.bf16.msra.mxu1 %v7781_v4  ;;  %v7794_v25 = vld [vmem:[#allocation3 + $0xb8] sm:$0xff]   ;;  %v7796_v27 = vld [vmem:[#allocation3 + $0xb0] sm:$0xff]   ;;  %v7798_v31 = vld [vmem:[#allocation3 + $0xa8] sm:$0xff]  }
  0x15   :  { %6776 = vmatprep.subr.bf16.mxu0 %v8208_v0  ;;  %6796 = vmatprep.subr.bf16.mxu1 %v8208_v0  ;;  %v7795_v26 = vld [vmem:[#allocation3 + $0xf8] sm:$0xff]   ;;  %v7797_v28 = vld [vmem:[#allocation3 + $0xf0] sm:$0xff]   ;;  %v7799_v32 = vld [vmem:[#allocation3 + $0xe8] sm:$0xff]  }
  0x16   :  { %v7800_v33 = vld [vmem:[#allocation3 + $0xa0] sm:$0xff]   ;;  %v7802_v35 = vld [vmem:[#allocation3 + $0x98] sm:$0xff]   ;;  %v7804_v37 = vld [vmem:[#allocation3 + $0x90] sm:$0xff]  }
  0x17   :  { %v7801_v34 = vld [vmem:[#allocation3 + $0xe0] sm:$0xff]   ;;  %v7803_v36 = vld [vmem:[#allocation3 + $0xd8] sm:$0xff]   ;;  %v7805_v38 = vld [vmem:[#allocation3 + $0xd0] sm:$0xff]  }
  0x18   :  { %6777 = vmatpush3.bf16.msra.mxu0 %v7782_v5  ;;  %6797 = vmatpush3.bf16.msra.mxu1 %v7783_v6  ;;  %v7806_v39 = vld [vmem:[#allocation3 + $0x88] sm:$0xff]   ;;  %v7808_v41 = vld [vmem:[#allocation3 + $0x80] sm:$0xff]   ;;  %v7810_v44 = vld [vmem:[#allocation3 + $0x138] sm:$0xff]  }
  0x19   :  { %6778 = vmatprep.subr.bf16.mxu0 %v8208_v0  ;;  %6798 = vmatprep.subr.bf16.mxu1 %v8208_v0  ;;  %v57_v17 = vld [vmem:[#allocation2 + $0x1] sm:$0xff]  ;;  %v58_v21 = vld [vmem:[#allocation2 + $0x9] sm:$0xff]  ;;  %v7809_v42 = vld [vmem:[#allocation3 + $0xc0] sm:$0xff]  }
  0x1a   :  { %v38_v18 = vld [vmem:[#allocation2] sm:$0xff]  ;;  %v39_v22 = vld [vmem:[#allocation2 + $0x8] sm:$0xff]  ;;  %v59_v23 = vpack.c.bf16 %v58_v21, %v57_v17  ;;  %v7813_v49 = vld [vmem:[#allocation3 + $0x120] sm:$0xff]   ;;  %v588_v17 = vlaneseq }
  0x1b   :  { %608 = vst [vmem:[#allocation2] sm:$0x3] %v8208_v0  ;;  %v40_v24 = vpack.c.bf16 %v39_v22, %v38_v18  ;;  %v367_v29 = vld [vmem:[#allocation2 + $0xb] sm:$0xff]  ;;  %v7807_v40 = vld [vmem:[#allocation3 + $0xc8] sm:$0xff]   ;;  %v7817_v53 = vld [vmem:[#allocation3 + $0x100] sm:$0xff]  }
  0x1c   :  { %6779 = vmatpush3.bf16.msra.mxu0 %v7784_v7  ;;  %6799 = vmatpush3.bf16.msra.mxu1 %v7785_v8  ;;  %v8272_v30 = vld [vmem:[#allocation2 + $0xc] sm:$0xff]  ;;  %v366_v43 = vld [vmem:[#allocation2 + $0x3] sm:$0xff]  ;;  %v7824_v62 = vld [vmem:[#allocation3 + $0x1a0] sm:$0xff]   ;;  %v8327_v18 = vshrl.u32 %v588_v17, 7 }
  0x1d   :  { %6780 = vmatprep.subr.bf16.mxu0 %v8208_v0  ;;  %6800 = vmatprep.subr.bf16.mxu1 %v8208_v0  ;;  %609 = vst [vmem:[#allocation2 + $0x12] sm:$0x3] %v8208_v0  ;;  %v368_v46 = vpack.c.bf16 %v367_v29, %v366_v43  ;;  %v7811_v47 = vld [vmem:[#allocation3 + $0x130] sm:$0xff]   ;;  %v7812_v48 = vld [vmem:[#allocation3 + $0x128] sm:$0xff]   ;;  %v7814_v50 = vld [vmem:[#allocation3 + $0x118] sm:$0xff]  }
  0x1e   :  { %v7815_v51 = vld [vmem:[#allocation3 + $0x110] sm:$0xff]   ;;  %v7816_v52 = vld [vmem:[#allocation3 + $0x108] sm:$0xff]   ;;  %v7818_v56 = vld [vmem:[#allocation3 + $0x1b8] sm:$0xff]   ;;  %v8336_v21 = vsub.s32 2, %v8327_v18 }
  0x1f   :  { %v477_v54 = vld [vmem:[#allocation2 + $0x4] sm:$0xff]  ;;  %v7819_v57 = vld [vmem:[#allocation3 + $0x178] sm:$0xff]   ;;  %v7825_v63 = vld [vmem:[#allocation3 + $0x160] sm:$0xff]  }
  0x20   :  { %6781 = vmatpush3.bf16.msra.mxu0 %v7786_v9  ;;  %6801 = vmatpush3.bf16.msra.mxu1 %v7787_v10  ;;  %v479_v55 = vpack.c.bf16 %v8272_v30, %v477_v54  ;;  %v7820_v58 = vld [vmem:[#allocation3 + $0x1b0] sm:$0xff]   ;;  %v7822_v60 = vld [vmem:[#allocation3 + $0x1a8] sm:$0xff]   ;;  %v7826_v1 = vld [vmem:[#allocation3 + $0x198] sm:$0xff]  }
  0x21   :  { %6782 = vmatprep.subr.bf16.mxu0 %v8208_v0  ;;  %6802 = vmatprep.subr.bf16.mxu1 %v8208_v0  ;;  %v7821_v59 = vld [vmem:[#allocation3 + $0x170] sm:$0xff]   ;;  %v7823_v61 = vld [vmem:[#allocation3 + $0x168] sm:$0xff]   ;;  %v7827_v2 = vld [vmem:[#allocation3 + $0x158] sm:$0xff]  }
  0x22   :  { %v7828_v3 = vld [vmem:[#allocation3 + $0x190] sm:$0xff]   ;;  %v7830_v5 = vld [vmem:[#allocation3 + $0x188] sm:$0xff]   ;;  %v7832_v7 = vld [vmem:[#allocation3 + $0x180] sm:$0xff]  }
  0x23   :  { %v7829_v4 = vld [vmem:[#allocation3 + $0x150] sm:$0xff]   ;;  %v7831_v6 = vld [vmem:[#allocation3 + $0x148] sm:$0xff]   ;;  %v7833_v8 = vld [vmem:[#allocation3 + $0x140] sm:$0xff]  }
  0x24   :  { %6783 = vmatpush3.bf16.msra.mxu0 %v7788_v13  ;;  %6803 = vmatpush3.bf16.msra.mxu1 %v7789_v14 }
  0x25   :  { %6784 = vmatprep.subr.bf16.mxu0 %v8208_v0  ;;  %6804 = vmatprep.subr.bf16.mxu1 %v8208_v0 }
  0x28   :  { %6785 = vmatpush3.bf16.msra.mxu0 %v7790_v15  ;;  %6805 = vmatpush3.bf16.msra.mxu1 %v7791_v16 }
  0x29   :  { %6786 = vmatprep.subr.bf16.mxu0 %v8208_v0  ;;  %6806 = vmatprep.subr.bf16.mxu1 %v8208_v0 }
  0x2c   :  { %6787 = vmatpush3.bf16.msra.mxu0 %v7792_v19  ;;  %6807 = vmatpush3.bf16.msra.mxu1 %v7793_v20  ;;  %v8330_v19 = vsub.s32 0, %v8327_v18  ;;  %v8333_v20 = vsub.s32 1, %v8327_v18 }
  0x2d   :  { %6812 = vmatprep.subr.bf16.mxu0 %v8208_v0  ;;  %6832 = vmatprep.subr.bf16.mxu1 %v8208_v0 }
  0x2f   :  { %6789 = vmatmul.mubr.bf16.vlgmr.msra.gmra.mxu0 %v59_v23  ;;  %6809 = vmatmul.mubr.bf16.vlgmr.msra.gmra.mxu1 %v40_v24 }
  0x30   :  { %6813 = vmatpush3.bf16.msra.mxu0 %v7794_v25  ;;  %6833 = vmatpush3.bf16.msra.mxu1 %v7795_v26 }
  0x31   :  { %6814 = vmatprep.subr.bf16.mxu0 %v8208_v0  ;;  %6834 = vmatprep.subr.bf16.mxu1 %v8208_v0 }
  0x32   :  { %6828 = vmatprep.mubr.msk.bf16.mxu0 %vm8209_vm0, %v8208_v0  ;;  %6848 = vmatprep.mubr.msk.bf16.mxu1 %vm8209_vm0, %v8208_v0 }
  0x34   :  { %6815 = vmatpush3.bf16.msra.mxu0 %v7796_v27  ;;  %6835 = vmatpush3.bf16.msra.mxu1 %v7797_v28 }
  0x35   :  { %6816 = vmatprep.subr.bf16.mxu0 %v8208_v0  ;;  %6836 = vmatprep.subr.bf16.mxu1 %v8208_v0 }
  0x38   :  { %6817 = vmatpush3.bf16.msra.mxu0 %v7798_v31  ;;  %6837 = vmatpush3.bf16.msra.mxu1 %v7799_v32  ;;  %v8341_v31 = vld [vmem:[%s8923_s2] sm:$0xff] }
  0x39   :  { %6818 = vmatprep.subr.bf16.mxu0 %v8208_v0  ;;  %6838 = vmatprep.subr.bf16.mxu1 %v8208_v0 }
  0x3c   :  { %6819 = vmatpush3.bf16.msra.mxu0 %v7800_v33  ;;  %6839 = vmatpush3.bf16.msra.mxu1 %v7801_v34 }
  0x3d   :  { %6820 = vmatprep.subr.bf16.mxu0 %v8208_v0  ;;  %6840 = vmatprep.subr.bf16.mxu1 %v8208_v0 }
  0x40   :  { %6821 = vmatpush3.bf16.msra.mxu0 %v7802_v35  ;;  %6841 = vmatpush3.bf16.msra.mxu1 %v7803_v36  ;;  %v8345_v36 = vrot.slane %v8341_v31, %v8330_v19 }
  0x41   :  { %6822 = vmatprep.subr.bf16.mxu0 %v8208_v0  ;;  %6842 = vmatprep.subr.bf16.mxu1 %v8208_v0 }
  0x44   :  { %6823 = vmatpush3.bf16.msra.mxu0 %v7804_v37  ;;  %6843 = vmatpush3.bf16.msra.mxu1 %v7805_v38 }
  0x45   :  { %6824 = vmatprep.subr.bf16.mxu0 %v8208_v0  ;;  %6844 = vmatprep.subr.bf16.mxu1 %v8208_v0 }
  0x48   :  { %6825 = vmatpush3.bf16.msra.mxu0 %v7806_v39  ;;  %6845 = vmatpush3.bf16.msra.mxu1 %v7807_v40 }
  0x49   :  { %6826 = vmatprep.subr.bf16.mxu0 %v8208_v0  ;;  %6846 = vmatprep.subr.bf16.mxu1 %v8208_v0 }
  0x4c   :  { %6827 = vmatpush3.bf16.msra.mxu0 %v7808_v41  ;;  %6847 = vmatpush3.bf16.msra.mxu1 %v7809_v42  ;;  %v8350_v42 = vrot.slane %v8341_v31, %v8333_v20 }
  0x4d   :  { %6852 = vmatprep.subr.bf16.mxu0 %v8208_v0  ;;  %6872 = vmatprep.subr.bf16.mxu1 %v8208_v0 }
  0x4f   :  { %6829 = vmatmul.mubr.bf16.vlgmr.msra.gmra.mxu0 %v257_v45  ;;  %6849 = vmatmul.mubr.bf16.vlgmr.msra.gmra.mxu1 %v368_v46  ;;  %v8354_v45 = vrot.slane %v8341_v31, %v8336_v21 }
  0x50   :  { %6853 = vmatpush3.bf16.msra.mxu0 %v7810_v44  ;;  %6868 = vmatprep.mubr.msk.bf16.mxu0 %vm8209_vm0, %v8208_v0 }
  0x51   :  { %6854 = vmatprep.subr.bf16.mxu0 %v8208_v0  ;;  %6888 = vmatprep.mubr.msk.bf16.mxu1 %vm8209_vm0, %v8208_v0 }
  0x52   :  { %6873 = vmatpush3.bf16.msra.mxu1 %v7818_v56  ;;  %v7834_v56 = vld [vmem:[#allocation3 + $0x1f8] sm:$0xff]  }
  0x53   :  { %6874 = vmatprep.subr.bf16.mxu1 %v8208_v0 }
  0x54   :  { %6855 = vmatpush3.bf16.msra.mxu0 %v7811_v47 }
  0x55   :  { %6856 = vmatprep.subr.bf16.mxu0 %v8208_v0 }
  0x56   :  { %6875 = vmatpush3.bf16.msra.mxu1 %v7820_v58 }
  0x57   :  { %6876 = vmatprep.subr.bf16.mxu1 %v8208_v0 }
  0x58   :  { %6857 = vmatpush3.bf16.msra.mxu0 %v7812_v48 }
  0x59   :  { %6858 = vmatprep.subr.bf16.mxu0 %v8208_v0 }
  0x5a   :  { %6877 = vmatpush3.bf16.msra.mxu1 %v7822_v60 }
  0x5b   :  { %6878 = vmatprep.subr.bf16.mxu1 %v8208_v0 }
  0x5c   :  { %6859 = vmatpush3.bf16.msra.mxu0 %v7813_v49 }
  0x5d   :  { %6860 = vmatprep.subr.bf16.mxu0 %v8208_v0 }
  0x5e   :  { %6879 = vmatpush3.bf16.msra.mxu1 %v7824_v62 }
  0x5f   :  { %6880 = vmatprep.subr.bf16.mxu1 %v8208_v0 }
  0x60   :  { %6861 = vmatpush3.bf16.msra.mxu0 %v7814_v50 }
  0x61   :  { %6862 = vmatprep.subr.bf16.mxu0 %v8208_v0 }
  0x62   :  { %6881 = vmatpush3.bf16.msra.mxu1 %v7826_v1  ;;  %v7837_v1 = vld [vmem:[#allocation3 + $0x230] sm:$0xff]  }
  0x63   :  { %6882 = vmatprep.subr.bf16.mxu1 %v8208_v0 }
  0x64   :  { %6863 = vmatpush3.bf16.msra.mxu0 %v7815_v51 }
  0x65   :  { %6864 = vmatprep.subr.bf16.mxu0 %v8208_v0 }
  0x66   :  { %6883 = vmatpush3.bf16.msra.mxu1 %v7828_v3  ;;  %v7839_v3 = vld [vmem:[#allocation3 + $0x228] sm:$0xff]  }
  0x67   :  { %6884 = vmatprep.subr.bf16.mxu1 %v8208_v0 }
  0x68   :  { %6865 = vmatpush3.bf16.msra.mxu0 %v7816_v52 }
  0x69   :  { %6866 = vmatprep.subr.bf16.mxu0 %v8208_v0 }
  0x6a   :  { %6885 = vmatpush3.bf16.msra.mxu1 %v7830_v5  ;;  %v7841_v5 = vld [vmem:[#allocation3 + $0x220] sm:$0xff]  }
  0x6b   :  { %6886 = vmatprep.subr.bf16.mxu1 %v8208_v0 }
  0x6c   :  { %6867 = vmatpush3.bf16.msra.mxu0 %v7817_v53 }
  0x6d   :  { %6892 = vmatprep.subr.bf16.mxu0 %v8208_v0 }
  0x6e   :  { %6887 = vmatpush3.bf16.msra.mxu1 %v7832_v7  ;;  %v7843_v7 = vld [vmem:[#allocation3 + $0x218] sm:$0xff]  }
  0x6f   :  { %6869 = vmatmul.mubr.bf16.vlgmr.msra.gmra.mxu0 %v479_v55  ;;  %6912 = vmatprep.subr.bf16.mxu1 %v8208_v0 }
  0x70   :  { %6908 = vmatprep.mubr.msk.bf16.mxu0 %vm8209_vm0, %v8208_v0  ;;  %6893 = vmatpush3.bf16.msra.mxu0 %v7819_v57 }
  0x71   :  { %6894 = vmatprep.subr.bf16.mxu0 %v8208_v0 }
  0x74   :  { %6895 = vmatpush3.bf16.msra.mxu0 %v7821_v59  ;;  %v7835_v59 = vld [vmem:[#allocation3 + $0x238] sm:$0xff]  }
  0x75   :  { %6896 = vmatprep.subr.bf16.mxu0 %v8208_v0 }
  0x78   :  { %6897 = vmatpush3.bf16.msra.mxu0 %v7823_v61 }
  0x79   :  { %6898 = vmatprep.subr.bf16.mxu0 %v8208_v0 }
  0x7c   :  { %6899 = vmatpush3.bf16.msra.mxu0 %v7825_v63  ;;  %v7836_v63 = vld [vmem:[#allocation3 + $0x1f0] sm:$0xff]  }
  0x7d   :  { %6900 = vmatprep.subr.bf16.mxu0 %v8208_v0 }
  0x80   :  { %6901 = vmatpush3.bf16.msra.mxu0 %v7827_v2  ;;  %v7838_v2 = vld [vmem:[#allocation3 + $0x1e8] sm:$0xff]  }
  0x81   :  { %6902 = vmatprep.subr.bf16.mxu0 %v8208_v0 }
  0x84   :  { %6903 = vmatpush3.bf16.msra.mxu0 %v7829_v4  ;;  %v7840_v4 = vld [vmem:[#allocation3 + $0x1e0] sm:$0xff]  }
  0x85   :  { %6904 = vmatprep.subr.bf16.mxu0 %v8208_v0 }
  0x88   :  { %6905 = vmatpush3.bf16.msra.mxu0 %v7831_v6  ;;  %v7842_v6 = vld [vmem:[#allocation3 + $0x1d8] sm:$0xff]  }
  0x89   :  { %6906 = vmatprep.subr.bf16.mxu0 %v8208_v0 }
  0x8c   :  { %6907 = vmatpush3.bf16.msra.mxu0 %v7833_v8  ;;  %v7844_v8 = vld [vmem:[#allocation3 + $0x1d0] sm:$0xff]  }
  0x8d   :  { %6932 = vmatprep.subr.bf16.mxu0 %v8208_v0 }
  0xef   :  { %v159_v9 = vpop.f32.mrf.mxu0  ;;  %v248_v10 = vpop.f32.mrf.mxu1 }
  0xf0   :  { %v249_v30 = vadd.f32 %v248_v10, %v159_v9  ;;  %v7845_v9 = vld [vmem:[#allocation3 + $0x210] sm:$0xff]   ;;  %v7846_v10 = vld [vmem:[#allocation3 + $0x1c8] sm:$0xff]  }
  0xf1   :  { %v6790_v11 = vpop.f32.mrf.mxu0  ;;  %v6810_v12 = vpop.f32.mrf.mxu1 }
  0xf2   :  { %v7847_v11 = vld [vmem:[#allocation3 + $0x208] sm:$0xff]   ;;  %v7848_v12 = vld [vmem:[#allocation3 + $0x1c0] sm:$0xff]  }
  0xf3   :  { %v162_v13 = vpop.f32.mrf.mxu0  ;;  %v251_v14 = vpop.f32.mrf.mxu1 }
  0xf4   :  { %v252_v33 = vadd.f32 %v251_v14, %v162_v13  ;;  %v7849_v13 = vld [vmem:[#allocation3 + $0x200] sm:$0xff]  }
  0xf5   :  { %v6791_v15 = vpop.f32.mrf.mxu0  ;;  %v6811_v16 = vpop.f32.mrf.mxu1 }
  0xf6   :  { %v7850_v16 = vld [vmem:[#allocation3 + $0x278] sm:$0xff]  }
 0x10f   :  { %v357_v22 = vpop.f32.mrf.mxu0  ;;  %v468_v23 = vpop.f32.mrf.mxu1 }
 0x110   :  { %v364_v32 = vadd.f32 %v357_v22, %v249_v30 }
 0x111   :  { %v6830_v24 = vpop.f32.mrf.mxu0  ;;  %v6850_v25 = vpop.f32.mrf.mxu1 }
 0x112   :  { %v475_v34 = vadd.f32 %v468_v23, %v364_v32  ;;  %v7851_v23 = vld [vmem:[#allocation3 + $0x270] sm:$0xff]   ;;  %v7852_v24 = vld [vmem:[#allocation3 + $0x268] sm:$0xff]   ;;  %v7853_v25 = vld [vmem:[#allocation3 + $0x260] sm:$0xff]  }
 0x113   :  { %v360_v26 = vpop.f32.mrf.mxu0  ;;  %v471_v27 = vpop.f32.mrf.mxu1 }
 0x114   :  { %v365_v35 = vadd.f32 %v360_v26, %v252_v33  ;;  %v7854_v26 = vld [vmem:[#allocation3 + $0x258] sm:$0xff]  }
 0x115   :  { %v6831_v28 = vpop.f32.mrf.mxu0  ;;  %v6851_v29 = vpop.f32.mrf.mxu1  ;;  %v7858_v33 = vld [vmem:[#allocation3 + $0x2f8] sm:$0xff]  }
 0x116   :  { %v476_v40 = vadd.f32 %v471_v27, %v365_v35  ;;  %v7855_v27 = vld [vmem:[#allocation3 + $0x250] sm:$0xff]   ;;  %v7856_v28 = vld [vmem:[#allocation3 + $0x248] sm:$0xff]   ;;  %v7857_v29 = vld [vmem:[#allocation3 + $0x240] sm:$0xff]  }
 0x117   :  { %v7860_v35 = vld [vmem:[#allocation3 + $0x2f0] sm:$0xff]  }
 0x12f   :  { %v579_v37 = vpop.f32.mrf.mxu0 }
 0x130   :  { %v586_v38 = vadd.f32 %v579_v37, %v475_v34  ;;  %v7859_v34 = vld [vmem:[#allocation3 + $0x2b8] sm:$0xff]   ;;  %v7861_v37 = vld [vmem:[#allocation3 + $0x2b0] sm:$0xff]  }
 0x131   :  { %v6870_v39 = vpop.f32.mrf.mxu0 }
 0x132   :  { %v592_v41 = vadd.f32 %v8345_v36, %v586_v38  ;;  %v7862_v38 = vld [vmem:[#allocation3 + $0x2e8] sm:$0xff]  }
 0x133   :  { %v582_v43 = vpop.f32.mrf.mxu0  ;;  %v7863_v39 = vld [vmem:[#allocation3 + $0x2a8] sm:$0xff]  }
 0x134   :  { %v594_v44 = vmax.f32 %v592_v41, 0.0  ;;  %v587_v46 = vadd.f32 %v582_v43, %v476_v40  ;;  %v7864_v40 = vld [vmem:[#allocation3 + $0x2e0] sm:$0xff]   ;;  %v7866_v43 = vld [vmem:[#allocation3 + $0x2d8] sm:$0xff]  }
 0x135   :  { %v6871_v47 = vpop.f32.mrf.mxu0  ;;  %v7865_v41 = vld [vmem:[#allocation3 + $0x2a0] sm:$0xff]  }
 0x136   :  { %v600_v48 = vmul.f32 %v8350_v42, %v594_v44  ;;  %v593_v49 = vadd.f32 %v8345_v36, %v587_v46  ;;  %v7867_v44 = vld [vmem:[#allocation3 + $0x298] sm:$0xff]   ;;  %v7868_v46 = vld [vmem:[#allocation3 + $0x2d0] sm:$0xff]  }
 0x137   :  { %v7869_v47 = vld [vmem:[#allocation3 + $0x290] sm:$0xff]  }
 0x138   :  { %v8359_v50 = vadd.f32 %v8354_v45, %v600_v48  ;;  %v595_v51 = vmax.f32 %v593_v49, 0.0  ;;  %v7870_v48 = vld [vmem:[#allocation3 + $0x2c8] sm:$0xff]  }
 0x139   :  { %v7871_v49 = vld [vmem:[#allocation3 + $0x288] sm:$0xff]  }
 0x13a   :  { %610 = vst [vmem:[#allocation2 + $0x2] sm:$0xff] %v8359_v50  ;;  %v601_v52 = vmul.f32 %v8350_v42, %v595_v51  ;;  %v7873_v51 = vld [vmem:[#allocation3 + $0x280] sm:$0xff]  }
 0x13c   :  { %v8364_v53 = vadd.f32 %v8354_v45, %v601_v52  ;;  %v8402_v52 = vld [vmem:[#allocation3 + $0x338] sm:$0xff]  }
 0x13e   :  { %611 = vst [vmem:[#allocation2 + $0xa] sm:$0xff] %v8364_v53  ;;  %v832_v17 = vpack.c.bf16 %v8364_v53, %v8359_v50  ;;  %v7872_v50 = vld [vmem:[#allocation3 + $0x2c0] sm:$0xff]   ;;  %v8405_v53 = vld [vmem:[#allocation3 + $0x378] sm:$0xff]  }
 0x141   :  { %v632_v54 = vld [vmem:[#allocation2 + $0x1] sm:$0xff] }
 0x142   :  { %v612_v55 = vld [vmem:[#allocation2] sm:$0xff] }
 0x143   :  { %1183 = vst [vmem:[#allocation2] sm:$0x7] %v8208_v0 }
 0x145   :  { %v633_v57 = vld [vmem:[#allocation2 + $0x9] sm:$0xff] }
 0x146   :  { %v613_v58 = vld [vmem:[#allocation2 + $0x8] sm:$0xff]  ;;  %v634_v60 = vpack.c.bf16 %v633_v57, %v632_v54 }
 0x147   :  { %v614_v61 = vpack.c.bf16 %v613_v58, %v612_v55  ;;  %v8368_v62 = vld [vmem:[#allocation2 + $0xc] sm:$0xff]  ;;  %v941_v14 = vld [vmem:[#allocation2 + $0x3] sm:$0xff] }
 0x148   :  { %1184 = vst [vmem:[#allocation2 + $0x13] sm:$0x7] %v8208_v0  ;;  %6889 = vmatmul.mubr.bf16.vlgmr.msra.gmra.mxu1 %v634_v60  ;;  %v942_v15 = vld [vmem:[#allocation2 + $0xb] sm:$0xff] }
 0x149   :  { %6909 = vmatmul.mubr.bf16.vlgmr.msra.gmra.mxu0 %v614_v61  ;;  %6913 = vmatpush3.bf16.msra.mxu1 %v7834_v56  ;;  %v943_v22 = vpack.c.bf16 %v942_v15, %v941_v14  ;;  %v1052_v30 = vld [vmem:[#allocation2 + $0x4] sm:$0xff]  ;;  %v1173_v14 = vsub.s32 4, %v8327_v18 }
 0x14a   :  { %6933 = vmatpush3.bf16.msra.mxu0 %v7835_v59  ;;  %6914 = vmatprep.subr.bf16.mxu1 %v8208_v0  ;;  %v1054_v32 = vpack.c.bf16 %v8368_v62, %v1052_v30 }
 0x14b   :  { %6934 = vmatprep.subr.bf16.mxu0 %v8208_v0  ;;  %6928 = vmatprep.mubr.msk.bf16.mxu1 %vm8209_vm0, %v8208_v0 }
 0x14c   :  { %6948 = vmatprep.mubr.msk.bf16.mxu0 %vm8209_vm0, %v8208_v0 }
 0x14d   :  { %6915 = vmatpush3.bf16.msra.mxu1 %v7836_v63 }
 0x14e   :  { %6935 = vmatpush3.bf16.msra.mxu0 %v7837_v1  ;;  %6916 = vmatprep.subr.bf16.mxu1 %v8208_v0 }
 0x14f   :  { %6936 = vmatprep.subr.bf16.mxu0 %v8208_v0 }
 0x151   :  { %6917 = vmatpush3.bf16.msra.mxu1 %v7838_v2 }
 0x152   :  { %6937 = vmatpush3.bf16.msra.mxu0 %v7839_v3  ;;  %6918 = vmatprep.subr.bf16.mxu1 %v8208_v0 }
 0x153   :  { %6938 = vmatprep.subr.bf16.mxu0 %v8208_v0 }
 0x155   :  { %6919 = vmatpush3.bf16.msra.mxu1 %v7840_v4 }
 0x156   :  { %6939 = vmatpush3.bf16.msra.mxu0 %v7841_v5  ;;  %6920 = vmatprep.subr.bf16.mxu1 %v8208_v0 }
 0x157   :  { %6940 = vmatprep.subr.bf16.mxu0 %v8208_v0 }
 0x159   :  { %6921 = vmatpush3.bf16.msra.mxu1 %v7842_v6 }
 0x15a   :  { %6941 = vmatpush3.bf16.msra.mxu0 %v7843_v7  ;;  %6922 = vmatprep.subr.bf16.mxu1 %v8208_v0 }
 0x15b   :  { %6942 = vmatprep.subr.bf16.mxu0 %v8208_v0 }
 0x15d   :  { %6923 = vmatpush3.bf16.msra.mxu1 %v7844_v8 }
 0x15e   :  { %6943 = vmatpush3.bf16.msra.mxu0 %v7845_v9  ;;  %6924 = vmatprep.subr.bf16.mxu1 %v8208_v0  ;;  %v8409_v9 = vsub.s32 3, %v8327_v18 }
 0x15f   :  { %6944 = vmatprep.subr.bf16.mxu0 %v8208_v0 }
 0x161   :  { %6925 = vmatpush3.bf16.msra.mxu1 %v7846_v10 }
 0x162   :  { %6945 = vmatpush3.bf16.msra.mxu0 %v7847_v11  ;;  %6926 = vmatprep.subr.bf16.mxu1 %v8208_v0 }
 0x163   :  { %6946 = vmatprep.subr.bf16.mxu0 %v8208_v0 }
 0x165   :  { %6927 = vmatpush3.bf16.msra.mxu1 %v7848_v12 }
 0x166   :  { %6947 = vmatpush3.bf16.msra.mxu0 %v7849_v13  ;;  %6952 = vmatprep.subr.bf16.mxu1 %v8208_v0  ;;  %v8413_v13 = vrot.slane %v8341_v31, %v8409_v9 }
 0x167   :  { %6972 = vmatprep.subr.bf16.mxu0 %v7858_v33 }
 0x168   :  { %6929 = vmatmul.mubr.bf16.vlgmr.msra.gmra.mxu1 %v832_v17  ;;  %v1179_v17 = vsub.s32 5, %v8327_v18 }
 0x169   :  { %6949 = vmatmul.mubr.bf16.vlgmr.msra.gmra.mxu0 %v943_v22  ;;  %6953 = vmatpush3.bf16.msra.mxu1 %v7850_v16 }
 0x16a   :  { %6968 = vmatprep.mubr.msk.bf16.mxu1 %vm8209_vm0, %v8208_v0  ;;  %6954 = vmatprep.subr.bf16.mxu1 %v8208_v0 }
 0x16b   :  { %6973 = vmatpush3.bf16.msra.mxu0 %v7858_v33 }
 0x16c   :  { %6974 = vmatprep.subr.bf16.mxu0 %v7860_v35 }
 0x16d   :  { %6955 = vmatpush3.bf16.msra.mxu1 %v7851_v23 }
 0x16e   :  { %6956 = vmatprep.subr.bf16.mxu1 %v8208_v0 }
 0x16f   :  { %6975 = vmatpush3.bf16.msra.mxu0 %v7860_v35 }
 0x170   :  { %6976 = vmatprep.subr.bf16.mxu0 %v7862_v38 }
 0x171   :  { %6957 = vmatpush3.bf16.msra.mxu1 %v7852_v24 }
 0x172   :  { %6958 = vmatprep.subr.bf16.mxu1 %v8208_v0 }
 0x173   :  { %6977 = vmatpush3.bf16.msra.mxu0 %v7862_v38 }
 0x174   :  { %6978 = vmatprep.subr.bf16.mxu0 %v7864_v40 }
 0x175   :  { %6959 = vmatpush3.bf16.msra.mxu1 %v7853_v25  ;;  %v8421_v25 = vrot.slane %v8341_v31, %v1173_v14 }
 0x176   :  { %6960 = vmatprep.subr.bf16.mxu1 %v8208_v0 }
 0x177   :  { %6979 = vmatpush3.bf16.msra.mxu0 %v7864_v40 }
 0x178   :  { %6980 = vmatprep.subr.bf16.mxu0 %v7866_v43 }
 0x179   :  { %6961 = vmatpush3.bf16.msra.mxu1 %v7854_v26 }
 0x17a   :  { %6962 = vmatprep.subr.bf16.mxu1 %v8208_v0 }
 0x17b   :  { %6981 = vmatpush3.bf16.msra.mxu0 %v7866_v43 }
 0x17c   :  { %6982 = vmatprep.subr.bf16.mxu0 %v7868_v46 }
 0x17d   :  { %6963 = vmatpush3.bf16.msra.mxu1 %v7855_v27 }
 0x17e   :  { %6964 = vmatprep.subr.bf16.mxu1 %v8208_v0 }
 0x17f   :  { %6983 = vmatpush3.bf16.msra.mxu0 %v7868_v46 }
 0x180   :  { %6984 = vmatprep.subr.bf16.mxu0 %v7870_v48 }
 0x181   :  { %6965 = vmatpush3.bf16.msra.mxu1 %v7856_v28  ;;  %v8424_v28 = vrot.slane %v8341_v31, %v1179_v17 }
 0x182   :  { %6966 = vmatprep.subr.bf16.mxu1 %v8208_v0 }
 0x183   :  { %6985 = vmatpush3.bf16.msra.mxu0 %v7870_v48 }
 0x184   :  { %6986 = vmatprep.subr.bf16.mxu0 %v7872_v50 }
 0x185   :  { %6967 = vmatpush3.bf16.msra.mxu1 %v7857_v29 }
 0x186   :  { %6992 = vmatprep.subr.bf16.mxu1 %v7859_v34 }
 0x187   :  { %6987 = vmatpush3.bf16.msra.mxu0 %v7872_v50 }
 0x188   :  { %6969 = vmatmul.mubr.bf16.vlgmr.msra.gmra.mxu1 %v1054_v32  ;;  %7012 = vmatprep.subr.bf16.mxu0 %v8402_v52 }
 0x189   :  { %6993 = vmatpush3.bf16.msra.mxu1 %v7859_v34 }
 0x18a   :  { %6994 = vmatprep.subr.bf16.mxu1 %v7861_v37 }
 0x18d   :  { %6995 = vmatpush3.bf16.msra.mxu1 %v7861_v37 }
 0x18e   :  { %6996 = vmatprep.subr.bf16.mxu1 %v7863_v39 }
 0x191   :  { %6997 = vmatpush3.bf16.msra.mxu1 %v7863_v39 }
 0x192   :  { %6998 = vmatprep.subr.bf16.mxu1 %v7865_v41 }
 0x195   :  { %6999 = vmatpush3.bf16.msra.mxu1 %v7865_v41 }
 0x196   :  { %7000 = vmatprep.subr.bf16.mxu1 %v7867_v44 }
 0x199   :  { %7001 = vmatpush3.bf16.msra.mxu1 %v7867_v44 }
 0x19a   :  { %7002 = vmatprep.subr.bf16.mxu1 %v7869_v47 }
 0x19d   :  { %7003 = vmatpush3.bf16.msra.mxu1 %v7869_v47 }
 0x19e   :  { %7004 = vmatprep.subr.bf16.mxu1 %v7871_v49 }
 0x1a1   :  { %7005 = vmatpush3.bf16.msra.mxu1 %v7871_v49 }
 0x1a2   :  { %7006 = vmatprep.subr.bf16.mxu1 %v7873_v51 }
 0x1a5   :  { %7007 = vmatpush3.bf16.msra.mxu1 %v7873_v51  ;;  %v8431_v51 = vld [vmem:[#allocation2 + $0x13] sm:$0x3] }
 0x1a6   :  { %7032 = vmatprep.subr.bf16.mxu1 %v8405_v53 }
 0x208   :  { %v734_v54 = vpop.f32.mrf.mxu1 }
 0x209   :  { %v823_v55 = vpop.f32.mrf.mxu0 }
 0x20a   :  { %v6890_v56 = vpop.f32.mrf.mxu1  ;;  %v824_v7 = vadd.f32 %v823_v55, %v734_v54 }
 0x20b   :  { %v6910_v57 = vpop.f32.mrf.mxu0 }
 0x20c   :  { %v737_v58 = vpop.f32.mrf.mxu1 }
 0x20d   :  { %v826_v59 = vpop.f32.mrf.mxu0 }
 0x20e   :  { %v6891_v60 = vpop.f32.mrf.mxu1  ;;  %v827_v10 = vadd.f32 %v826_v59, %v737_v58  ;;  %v7876_v59 = vld [vmem:[#allocation3 + $0x330] sm:$0xff]  }
 0x20f   :  { %v6911_v61 = vpop.f32.mrf.mxu0  ;;  %v7877_v60 = vld [vmem:[#allocation3 + $0x370] sm:$0xff]  }
 0x228   :  { %v932_v62 = vpop.f32.mrf.mxu1 }
 0x229   :  { %v1043_v63 = vpop.f32.mrf.mxu0  ;;  %v939_v8 = vadd.f32 %v932_v62, %v824_v7  ;;  %v7878_v62 = vld [vmem:[#allocation3 + $0x328] sm:$0xff]   ;;  %v7888_v7 = vld [vmem:[#allocation3 + $0x300] sm:$0xff]  }
 0x22a   :  { %v6930_v1 = vpop.f32.mrf.mxu1 }
 0x22b   :  { %v6950_v2 = vpop.f32.mrf.mxu0  ;;  %v1050_v11 = vadd.f32 %v1043_v63, %v939_v8  ;;  %v7879_v63 = vld [vmem:[#allocation3 + $0x368] sm:$0xff]   ;;  %v7880_v1 = vld [vmem:[#allocation3 + $0x320] sm:$0xff]  }
 0x22c   :  { %v935_v3 = vpop.f32.mrf.mxu1  ;;  %v7881_v2 = vld [vmem:[#allocation3 + $0x360] sm:$0xff]  }
 0x22d   :  { %v1046_v4 = vpop.f32.mrf.mxu0  ;;  %v940_v12 = vadd.f32 %v935_v3, %v827_v10  ;;  %v7882_v3 = vld [vmem:[#allocation3 + $0x318] sm:$0xff]   ;;  %v7889_v8 = vld [vmem:[#allocation3 + $0x340] sm:$0xff]  }
 0x22e   :  { %v6931_v5 = vpop.f32.mrf.mxu1  ;;  %v7890_v10 = vld [vmem:[#allocation3 + $0x3b8] sm:$0xff]  }
 0x22f   :  { %v6951_v6 = vpop.f32.mrf.mxu0  ;;  %v1051_v23 = vadd.f32 %v1046_v4, %v940_v12  ;;  %v7885_v4 = vld [vmem:[#allocation3 + $0x350] sm:$0xff]   ;;  %v7886_v5 = vld [vmem:[#allocation3 + $0x308] sm:$0xff]  }
 0x230   :  { %v7887_v6 = vld [vmem:[#allocation3 + $0x348] sm:$0xff]  }
 0x248   :  { %v1154_v15 = vpop.f32.mrf.mxu1 }
 0x249   :  { %v1161_v16 = vadd.f32 %v1154_v15, %v1050_v11  ;;  %v1548_v15 = vpack.c.bf16 %v8431_v51, %v8431_v51  ;;  %v7913_v51 = vld [vmem:[#allocation3 + $0x3c0] sm:$0xff]  }
 0x24a   :  { %v6970_v22 = vpop.f32.mrf.mxu1 }
 0x24b   :  { %v1167_v24 = vadd.f32 %v8413_v13, %v1161_v16  ;;  %v7891_v16 = vld [vmem:[#allocation3 + $0x3b0] sm:$0xff]   ;;  %v7892_v22 = vld [vmem:[#allocation3 + $0x3a8] sm:$0xff]  }
 0x24c   :  { %v1157_v26 = vpop.f32.mrf.mxu1 }
 0x24d   :  { %v1169_v27 = vmax.f32 %v1167_v24, 0.0  ;;  %v1162_v29 = vadd.f32 %v1157_v26, %v1051_v23  ;;  %v7893_v23 = vld [vmem:[#allocation3 + $0x3a0] sm:$0xff]   ;;  %v7894_v24 = vld [vmem:[#allocation3 + $0x398] sm:$0xff]   ;;  %v7895_v26 = vld [vmem:[#allocation3 + $0x390] sm:$0xff]  }
 0x24e   :  { %v6971_v30 = vpop.f32.mrf.mxu1 }
 0x24f   :  { %v1175_v32 = vmul.f32 %v8421_v25, %v1169_v27  ;;  %v1168_v33 = vadd.f32 %v8413_v13, %v1162_v29  ;;  %v7896_v27 = vld [vmem:[#allocation3 + $0x388] sm:$0xff]   ;;  %v7897_v29 = vld [vmem:[#allocation3 + $0x380] sm:$0xff]   ;;  %v1667_v30 = vld [vmem:[#allocation2 + $0x14] sm:$0x3] }
 0x251   :  { %v1181_v34 = vadd.f32 %v8424_v28, %v1175_v32  ;;  %v1170_v35 = vmax.f32 %v1168_v33, 0.0  ;;  %v1669_v32 = vpack.c.bf16 %v1667_v30, %v1667_v30  ;;  %v7898_v33 = vld [vmem:[#allocation3 + $0x438] sm:$0xff]  }
 0x253   :  { %1185 = vst [vmem:[#allocation2 + $0x3] sm:$0xff] %v1181_v34  ;;  %v1176_v37 = vmul.f32 %v8421_v25, %v1170_v35  ;;  %v7900_v35 = vld [vmem:[#allocation3 + $0x430] sm:$0xff]  }
 0x255   :  { %v1182_v38 = vadd.f32 %v8424_v28, %v1176_v37  ;;  %v7901_v37 = vld [vmem:[#allocation3 + $0x3f0] sm:$0xff]  }
 0x257   :  { %1186 = vst [vmem:[#allocation2 + $0xb] sm:$0xff] %v1182_v38  ;;  %v1547_v61 = vpack.c.bf16 %v1182_v38, %v1181_v34  ;;  %v7899_v34 = vld [vmem:[#allocation3 + $0x3f8] sm:$0xff]   ;;  %v7902_v38 = vld [vmem:[#allocation3 + $0x428] sm:$0xff]  }
 0x25a   :  { %v1209_v39 = vld [vmem:[#allocation2 + $0x1] sm:$0xff] }
 0x25b   :  { %v1187_v40 = vld [vmem:[#allocation2] sm:$0xff] }
 0x25c   :  { %v1423_v55 = vld [vmem:[#allocation2 + $0x2] sm:$0xff] }
 0x25e   :  { %v1210_v41 = vld [vmem:[#allocation2 + $0x9] sm:$0xff]  ;;  %v1211_v44 = vld [vmem:[#allocation2 + $0x11] sm:$0x3] }
 0x25f   :  { %v1188_v43 = vld [vmem:[#allocation2 + $0x8] sm:$0xff]  ;;  %v1212_v46 = vpack.c.bf16 %v1210_v41, %v1209_v39  ;;  %v1213_v48 = vpack.c.bf16 %v1211_v44, %v1211_v44  ;;  %v1189_v49 = vld [vmem:[#allocation2 + $0x10] sm:$0x3]  ;;  %v8433_v56 = vld [vmem:[#allocation2 + $0x12] sm:$0x3] }
 0x260   :  { %v1190_v47 = vpack.c.bf16 %v1188_v43, %v1187_v40  ;;  %v1424_v50 = vld [vmem:[#allocation2 + $0xa] sm:$0xff]  ;;  %v1191_v54 = vpack.c.bf16 %v1189_v49, %v1189_v49  ;;  %v1427_v12 = vpack.c.bf16 %v8433_v56, %v8433_v56  ;;  %v7903_v39 = vld [vmem:[#allocation3 + $0x3e8] sm:$0xff]   ;;  %v7904_v40 = vld [vmem:[#allocation3 + $0x420] sm:$0xff]  }
 0x261   :  { %v8435_v57 = vld [vmem:[#allocation2 + $0xc] sm:$0xff]  ;;  %6988 = vmatprep.mubr.bf16.mxu0 %v1212_v46  ;;  %v1426_v58 = vpack.c.bf16 %v1424_v50, %v1423_v55  ;;  %v1665_v11 = vld [vmem:[#allocation2 + $0x4] sm:$0xff]  ;;  %v7905_v41 = vld [vmem:[#allocation3 + $0x3e0] sm:$0xff]  }
 0x262   :  { %7008 = vmatprep.mubr.bf16.mxu1 %v1190_v47  ;;  %2752 = vst [vmem:[#allocation2 + $0x12] sm:$0x3] %v8208_v0  ;;  %6989 = vmatmul.mubr.bf16.vlgmr.msra.gmra.mxu0 %v1213_v48  ;;  %v1668_v17 = vpack.c.bf16 %v8435_v57, %v1665_v11  ;;  %v7906_v43 = vld [vmem:[#allocation3 + $0x418] sm:$0xff]   ;;  %v7908_v46 = vld [vmem:[#allocation3 + $0x410] sm:$0xff]   ;;  %v7910_v48 = vld [vmem:[#allocation3 + $0x408] sm:$0xff]  }
 0x263   :  { %7009 = vmatmul.mubr.bf16.vlgmr.msra.gmra.mxu1 %v1191_v54  ;;  %7013 = vmatpush3.bf16.msra.mxu0 %v8402_v52  ;;  %v7883_v52 = vld [vmem:[#allocation3 + $0x358] sm:$0xff]   ;;  %v7909_v47 = vld [vmem:[#allocation3 + $0x3d0] sm:$0xff]   ;;  %v7911_v49 = vld [vmem:[#allocation3 + $0x3c8] sm:$0xff]  }
 0x264   :  { %7028 = vmatprep.mubr.bf16.mxu0 %v1426_v58  ;;  %7048 = vmatprep.mubr.bf16.mxu1 %v1547_v61  ;;  %v7907_v44 = vld [vmem:[#allocation3 + $0x3d8] sm:$0xff]   ;;  %v7912_v50 = vld [vmem:[#allocation3 + $0x400] sm:$0xff]  }
 0x265   :  { %7033 = vmatpush3.bf16.msra.mxu1 %v8405_v53  ;;  %7014 = vmatprep.subr.bf16.mxu0 %v7876_v59  ;;  %v7884_v53 = vld [vmem:[#allocation3 + $0x310] sm:$0xff]  }
 0x266   :  { %7034 = vmatprep.subr.bf16.mxu1 %v7877_v60 }
 0x267   :  { %7015 = vmatpush3.bf16.msra.mxu0 %v7876_v59 }
 0x268   :  { %7016 = vmatprep.subr.bf16.mxu0 %v7878_v62 }
 0x269   :  { %7035 = vmatpush3.bf16.msra.mxu1 %v7877_v60 }
 0x26a   :  { %7036 = vmatprep.subr.bf16.mxu1 %v7879_v63 }
 0x26b   :  { %7017 = vmatpush3.bf16.msra.mxu0 %v7878_v62 }
 0x26c   :  { %7018 = vmatprep.subr.bf16.mxu0 %v7880_v1 }
 0x26d   :  { %7037 = vmatpush3.bf16.msra.mxu1 %v7879_v63 }
 0x26e   :  { %7038 = vmatprep.subr.bf16.mxu1 %v7881_v2 }
 0x26f   :  { %7019 = vmatpush3.bf16.msra.mxu0 %v7880_v1 }
 0x270   :  { %7020 = vmatprep.subr.bf16.mxu0 %v7882_v3 }
 0x271   :  { %7039 = vmatpush3.bf16.msra.mxu1 %v7881_v2 }
 0x272   :  { %7040 = vmatprep.subr.bf16.mxu1 %v7883_v52 }
 0x273   :  { %7021 = vmatpush3.bf16.msra.mxu0 %v7882_v3 }
 0x274   :  { %7022 = vmatprep.subr.bf16.mxu0 %v7884_v53 }
 0x275   :  { %7041 = vmatpush3.bf16.msra.mxu1 %v7883_v52 }
 0x276   :  { %7042 = vmatprep.subr.bf16.mxu1 %v7885_v4 }
 0x277   :  { %7023 = vmatpush3.bf16.msra.mxu0 %v7884_v53 }
 0x278   :  { %7024 = vmatprep.subr.bf16.mxu0 %v7886_v5 }
 0x279   :  { %7043 = vmatpush3.bf16.msra.mxu1 %v7885_v4 }
 0x27a   :  { %7044 = vmatprep.subr.bf16.mxu1 %v7887_v6 }
 0x27b   :  { %7025 = vmatpush3.bf16.msra.mxu0 %v7886_v5 }
 0x27c   :  { %7026 = vmatprep.subr.bf16.mxu0 %v7888_v7 }
 0x27d   :  { %7045 = vmatpush3.bf16.msra.mxu1 %v7887_v6  ;;  %v1788_v6 = vsub.s32 6, %v8327_v18 }
 0x27e   :  { %7046 = vmatprep.subr.bf16.mxu1 %v7889_v8 }
 0x27f   :  { %7027 = vmatpush3.bf16.msra.mxu0 %v7888_v7 }
 0x280   :  { %7052 = vmatprep.subr.bf16.mxu0 %v7890_v10 }
 0x281   :  { %7047 = vmatpush3.bf16.msra.mxu1 %v7889_v8 }
 0x282   :  { %7072 = vmatprep.subr.bf16.mxu1 %v8208_v0  ;;  %7029 = vmatmul.mubr.bf16.vlgmr.msra.gmra.mxu0 %v1427_v12  ;;  %v8469_v12 = vrot.slane %v8341_v31, %v1788_v6  ;;  %v7927_v6 = vld [vmem:[#allocation3 + $0x488] sm:$0xff]  }
 0x283   :  { %7053 = vmatpush3.bf16.msra.mxu0 %v7890_v10  ;;  %7068 = vmatprep.mubr.bf16.mxu0 %v1668_v17 }
 0x284   :  { %7049 = vmatmul.mubr.bf16.vlgmr.msra.gmra.mxu1 %v1548_v15  ;;  %7054 = vmatprep.subr.bf16.mxu0 %v7891_v16  ;;  %v1798_v15 = vsub.s32 7, %v8327_v18 }
 0x285   :  { %7088 = vmatprep.mubr.msk.bf16.mxu1 %vm8209_vm0, %v8208_v0  ;;  %7073 = vmatpush3.bf16.msra.mxu1 %v7898_v33 }
 0x286   :  { %7074 = vmatprep.subr.bf16.mxu1 %v8208_v0  ;;  %v8481_v30 = vrot.slane %v8341_v31, %v1798_v15 }
 0x287   :  { %7055 = vmatpush3.bf16.msra.mxu0 %v7891_v16 }
 0x288   :  { %7056 = vmatprep.subr.bf16.mxu0 %v7892_v22 }
 0x289   :  { %7075 = vmatpush3.bf16.msra.mxu1 %v7900_v35 }
 0x28a   :  { %7076 = vmatprep.subr.bf16.mxu1 %v8208_v0 }
 0x28b   :  { %7057 = vmatpush3.bf16.msra.mxu0 %v7892_v22 }
 0x28c   :  { %7058 = vmatprep.subr.bf16.mxu0 %v7893_v23 }
 0x28d   :  { %7077 = vmatpush3.bf16.msra.mxu1 %v7902_v38 }
 0x28e   :  { %7078 = vmatprep.subr.bf16.mxu1 %v8208_v0 }
 0x28f   :  { %7059 = vmatpush3.bf16.msra.mxu0 %v7893_v23 }
 0x290   :  { %7060 = vmatprep.subr.bf16.mxu0 %v7894_v24 }
 0x291   :  { %7079 = vmatpush3.bf16.msra.mxu1 %v7904_v40 }
 0x292   :  { %7080 = vmatprep.subr.bf16.mxu1 %v8208_v0 }
 0x293   :  { %7061 = vmatpush3.bf16.msra.mxu0 %v7894_v24 }
 0x294   :  { %7062 = vmatprep.subr.bf16.mxu0 %v7895_v26 }
 0x295   :  { %7081 = vmatpush3.bf16.msra.mxu1 %v7906_v43 }
 0x296   :  { %7082 = vmatprep.subr.bf16.mxu1 %v8208_v0 }
 0x297   :  { %7063 = vmatpush3.bf16.msra.mxu0 %v7895_v26  ;;  %v8475_v26 = vld [vmem:[%s8923_s2 + $0x8] sm:$0xff] }
 0x298   :  { %7064 = vmatprep.subr.bf16.mxu0 %v7896_v27 }
 0x299   :  { %7083 = vmatpush3.bf16.msra.mxu1 %v7908_v46 }
 0x29a   :  { %7084 = vmatprep.subr.bf16.mxu1 %v8208_v0 }
 0x29b   :  { %7065 = vmatpush3.bf16.msra.mxu0 %v7896_v27 }
 0x29c   :  { %7066 = vmatprep.subr.bf16.mxu0 %v7897_v29 }
 0x29d   :  { %7085 = vmatpush3.bf16.msra.mxu1 %v7910_v48 }
 0x29e   :  { %7086 = vmatprep.subr.bf16.mxu1 %v8208_v0 }
 0x29f   :  { %7067 = vmatpush3.bf16.msra.mxu0 %v7897_v29 }
 0x2a0   :  { %7092 = vmatprep.subr.bf16.mxu0 %v8208_v0 }
 0x2a1   :  { %7087 = vmatpush3.bf16.msra.mxu1 %v7912_v50 }
 0x2a2   :  { %7069 = vmatmul.mubr.bf16.vlgmr.msra.gmra.mxu0 %v1669_v32  ;;  %7112 = vmatprep.subr.bf16.mxu1 %v8208_v0 }
 0x2a3   :  { %7108 = vmatprep.mubr.msk.bf16.mxu0 %vm8209_vm0, %v8208_v0  ;;  %7093 = vmatpush3.bf16.msra.mxu0 %v7899_v34 }
 0x2a4   :  { %7094 = vmatprep.subr.bf16.mxu0 %v8208_v0 }
 0x2a7   :  { %7095 = vmatpush3.bf16.msra.mxu0 %v7901_v37  ;;  %v8485_v37 = vrot.slane %v8475_v26, %v8330_v19 }
 0x2a8   :  { %7096 = vmatprep.subr.bf16.mxu0 %v8208_v0 }
 0x2ab   :  { %7097 = vmatpush3.bf16.msra.mxu0 %v7903_v39 }
 0x2ac   :  { %7098 = vmatprep.subr.bf16.mxu0 %v8208_v0 }
 0x2af   :  { %7099 = vmatpush3.bf16.msra.mxu0 %v7905_v41 }
 0x2b0   :  { %7100 = vmatprep.subr.bf16.mxu0 %v8208_v0 }
 0x2b3   :  { %7101 = vmatpush3.bf16.msra.mxu0 %v7907_v44 }
 0x2b4   :  { %7102 = vmatprep.subr.bf16.mxu0 %v8208_v0 }
 0x2b7   :  { %7103 = vmatpush3.bf16.msra.mxu0 %v7909_v47 }
 0x2b8   :  { %7104 = vmatprep.subr.bf16.mxu0 %v8208_v0 }
 0x2bb   :  { %7105 = vmatpush3.bf16.msra.mxu0 %v7911_v49 }
 0x2bc   :  { %7106 = vmatprep.subr.bf16.mxu0 %v8208_v0 }
 0x2bf   :  { %7107 = vmatpush3.bf16.msra.mxu0 %v7913_v51  ;;  %v7914_v51 = vld [vmem:[#allocation3 + $0x478] sm:$0xff]  }
 0x2c0   :  { %7132 = vmatprep.subr.bf16.mxu0 %v8208_v0 }
 0x322   :  { %v6990_v54 = vpop.f32.mrf.mxu0 }
 0x323   :  { %v7010_v55 = vpop.f32.mrf.mxu1 }
 0x324   :  { %v1313_v56 = vpop.f32.mrf.mxu0  ;;  %v1418_v53 = vadd.f32 %v7010_v55, %v6990_v54  ;;  %v7915_v54 = vld [vmem:[#allocation3 + $0x4b8] sm:$0xff]  }
 0x325   :  { %v1409_v57 = vpop.f32.mrf.mxu1 }
 0x326   :  { %v6991_v58 = vpop.f32.mrf.mxu0  ;;  %v1410_v4 = vadd.f32 %v1409_v57, %v1313_v56 }
 0x327   :  { %v7011_v59 = vpop.f32.mrf.mxu1 }
 0x328   :  { %v1316_v60 = vpop.f32.mrf.mxu0 }
 0x329   :  { %v1412_v61 = vpop.f32.mrf.mxu1 }
 0x32a   :  { %v1413_v10 = vadd.f32 %v1412_v61, %v1316_v60  ;;  %v7916_v60 = vld [vmem:[#allocation3 + $0x470] sm:$0xff]  }
 0x32b   :  { %v7917_v61 = vld [vmem:[#allocation3 + $0x4b0] sm:$0xff]  }
 0x342   :  { %v7030_v62 = vpop.f32.mrf.mxu0 }
 0x343   :  { %v1543_v5 = vadd.f32 %v7030_v62, %v1418_v53  ;;  %v7918_v62 = vld [vmem:[#allocation3 + $0x468] sm:$0xff]   ;;  %v7924_v53 = vld [vmem:[#allocation3 + $0x450] sm:$0xff]  }
 0x344   :  { %v1527_v63 = vpop.f32.mrf.mxu0  ;;  %v7050_v1 = vpop.f32.mrf.mxu1 }
 0x345   :  { %v1541_v7 = vadd.f32 %v1527_v63, %v1410_v4  ;;  %v1664_v11 = vadd.f32 %v7050_v1, %v1543_v5  ;;  %v7919_v63 = vld [vmem:[#allocation3 + $0x4a8] sm:$0xff]   ;;  %v7920_v1 = vld [vmem:[#allocation3 + $0x460] sm:$0xff]   ;;  %v7925_v4 = vld [vmem:[#allocation3 + $0x490] sm:$0xff]  }
 0x346   :  { %v7031_v2 = vpop.f32.mrf.mxu0  ;;  %v1648_v3 = vpop.f32.mrf.mxu1  ;;  %v7926_v5 = vld [vmem:[#allocation3 + $0x448] sm:$0xff]  }
 0x347   :  { %v1662_v17 = vadd.f32 %v1648_v3, %v1541_v7  ;;  %v7921_v2 = vld [vmem:[#allocation3 + $0x4a0] sm:$0xff]   ;;  %v7922_v3 = vld [vmem:[#allocation3 + $0x458] sm:$0xff]  }
 0x348   :  { %v7051_v52 = vpop.f32.mrf.mxu1  ;;  %v1530_v8 = vpop.f32.mrf.mxu0  ;;  %v7928_v7 = vld [vmem:[#allocation3 + $0x440] sm:$0xff]  }
 0x349   :  { %v1542_v22 = vadd.f32 %v1530_v8, %v1413_v10  ;;  %v7923_v52 = vld [vmem:[#allocation3 + $0x498] sm:$0xff]   ;;  %v7929_v8 = vld [vmem:[#allocation3 + $0x480] sm:$0xff]  }
 0x34a   :  { %v1651_v24 = vpop.f32.mrf.mxu1 }
 0x34b   :  { %v1663_v34 = vadd.f32 %v1651_v24, %v1542_v22  ;;  %v7930_v22 = vld [vmem:[#allocation3 + $0x4f8] sm:$0xff]  }
 0x362   :  { %v7070_v16 = vpop.f32.mrf.mxu0 }
 0x363   :  { %v1785_v23 = vadd.f32 %v7070_v16, %v1664_v11 }
 0x364   :  { %v1769_v27 = vpop.f32.mrf.mxu0 }
 0x365   :  { %v1792_v29 = vadd.f32 %v8469_v12, %v1785_v23  ;;  %v1783_v32 = vadd.f32 %v1769_v27, %v1662_v17  ;;  %v7931_v23 = vld [vmem:[#allocation3 + $0x538] sm:$0xff]  }
 0x366   :  { %v7071_v33 = vpop.f32.mrf.mxu0 }
 0x367   :  { %v1795_v35 = vmax.f32 %v1792_v29, 0.0  ;;  %v1790_v38 = vadd.f32 %v8469_v12, %v1783_v32  ;;  %v7932_v29 = vld [vmem:[#allocation3 + $0x4f0] sm:$0xff]   ;;  %v7934_v33 = vld [vmem:[#allocation3 + $0x4e8] sm:$0xff]  }
 0x368   :  { %v1772_v39 = vpop.f32.mrf.mxu0  ;;  %v7933_v32 = vld [vmem:[#allocation3 + $0x530] sm:$0xff]  }
 0x369   :  { %v1802_v40 = vmul.f32 %v8481_v30, %v1795_v35  ;;  %v1793_v41 = vmax.f32 %v1790_v38, 0.0  ;;  %v1784_v43 = vadd.f32 %v1772_v39, %v1663_v34  ;;  %v7935_v34 = vld [vmem:[#allocation3 + $0x528] sm:$0xff]   ;;  %v7936_v35 = vld [vmem:[#allocation3 + $0x4e0] sm:$0xff]   ;;  %v7938_v39 = vld [vmem:[#allocation3 + $0x4d8] sm:$0xff]  }
 0x36a   :  { %v7937_v38 = vld [vmem:[#allocation3 + $0x520] sm:$0xff]  }
 0x36b   :  { %v1809_v44 = vadd.f32 %v8485_v37, %v1802_v40  ;;  %v1800_v31 = vmul.f32 %v8481_v30, %v1793_v41  ;;  %v1791_v46 = vadd.f32 %v8469_v12, %v1784_v43  ;;  %v7939_v40 = vld [vmem:[#allocation3 + $0x518] sm:$0xff]   ;;  %v7940_v41 = vld [vmem:[#allocation3 + $0x4d0] sm:$0xff]  }
 0x36c   :  { %v7941_v43 = vld [vmem:[#allocation3 + $0x510] sm:$0xff]  }
 0x36d   :  { %1812 = vst [vmem:[#allocation2 + $0x10] sm:$0x3] %v1809_v44  ;;  %v1807_v47 = vadd.f32 %v8485_v37, %v1800_v31  ;;  %v1794_v48 = vmax.f32 %v1791_v46, 0.0  ;;  %v7942_v44 = vld [vmem:[#allocation3 + $0x4c8] sm:$0xff]   ;;  %v7944_v46 = vld [vmem:[#allocation3 + $0x4c0] sm:$0xff]  }
 0x36e   :  { %v7943_v31 = vld [vmem:[#allocation3 + $0x508] sm:$0xff]  }
 0x36f   :  { %1810 = vst [vmem:[#allocation2] sm:$0xff] %v1807_v47  ;;  %v1801_v49 = vmul.f32 %v8481_v30, %v1794_v48 }
 0x371   :  { %v1808_v50 = vadd.f32 %v8485_v37, %v1801_v49 }
 0x373   :  { %1811 = vst [vmem:[#allocation2 + $0x8] sm:$0xff] %v1808_v50 }
 0x37a   :  { %v1833_v55 = vld [vmem:[#allocation2 + $0x1] sm:$0xff]  ;;  %v1834_v56 = vld [vmem:[#allocation2 + $0x9] sm:$0xf] }
 0x37b   :  { %v1814_v57 = vld [vmem:[#allocation2 + $0x8] sm:$0xf]  ;;  %v1835_v58 = vpack.c.bf16 %v1834_v56, %v1833_v55  ;;  %2751 = vst [vmem:[#allocation2] sm:$0x3] %v8208_v0  ;;  %v2254_v49 = vld [vmem:[#allocation2 + $0xc] sm:$0xf] }
 0x37c   :  { %v1815_v59 = vpack.c.bf16 %v1814_v57, %v1807_v47  ;;  %v2031_v10 = vld [vmem:[#allocation2 + $0x2] sm:$0xff]  ;;  %v2032_v11 = vld [vmem:[#allocation2 + $0xa] sm:$0xf]  ;;  %v7945_v47 = vld [vmem:[#allocation3 + $0x500] sm:$0xff]  }
 0x37d   :  { %7089 = vmatmul.mubr.bf16.vlgmr.msra.gmra.mxu1 %v1835_v58  ;;  %v2142_v16 = vld [vmem:[#allocation2 + $0x3] sm:$0xff]  ;;  %v2143_v17 = vld [vmem:[#allocation2 + $0xb] sm:$0xf]  ;;  %v2033_v24 = vpack.c.bf16 %v2032_v11, %v2031_v10  ;;  %v7961_v10 = vld [vmem:[#allocation3 + $0x5a0] sm:$0xff]  }
 0x37e   :  { %7109 = vmatmul.mubr.bf16.vlgmr.msra.gmra.mxu0 %v1815_v59  ;;  %7113 = vmatpush3.bf16.msra.mxu1 %v7914_v51  ;;  %v2144_v27 = vpack.c.bf16 %v2143_v17, %v2142_v16  ;;  %v2253_v48 = vld [vmem:[#allocation2 + $0x4] sm:$0xff]  ;;  %v2365_v51 = vld [vmem:[#allocation2 + $0xd] sm:$0xf]  ;;  %v7949_v59 = vld [vmem:[#allocation3 + $0x560] sm:$0xff]  }
 0x37f   :  { %7133 = vmatpush3.bf16.msra.mxu0 %v7915_v54  ;;  %7114 = vmatprep.subr.bf16.mxu1 %v8208_v0  ;;  %v2364_v50 = vld [vmem:[#allocation2 + $0x5] sm:$0xff]  ;;  %v7946_v54 = vld [vmem:[#allocation3 + $0x578] sm:$0xff]   ;;  %v2255_v55 = vpack.c.bf16 %v2254_v49, %v2253_v48 }
 0x380   :  { %7134 = vmatprep.subr.bf16.mxu0 %v8208_v0  ;;  %7128 = vmatprep.mubr.msk.bf16.mxu1 %vm8209_vm0, %v8208_v0  ;;  %v2366_v56 = vpack.c.bf16 %v2365_v51, %v2364_v50  ;;  %v7947_v57 = vld [vmem:[#allocation3 + $0x570] sm:$0xff]   ;;  %v7948_v58 = vld [vmem:[#allocation3 + $0x568] sm:$0xff]   ;;  %v7962_v11 = vld [vmem:[#allocation3 + $0x58] sm:$0xff]  }
 0x381   :  { %7148 = vmatprep.mubr.msk.bf16.mxu0 %vm8209_vm0, %v8208_v0  ;;  %v7963_v16 = vld [vmem:[#allocation3 + $0x598] sm:$0xff]   ;;  %v7964_v17 = vld [vmem:[#allocation3 + $0x50] sm:$0xff]  }
 0x382   :  { %7115 = vmatpush3.bf16.msra.mxu1 %v7916_v60  ;;  %v7950_v60 = vld [vmem:[#allocation3 + $0x558] sm:$0xff]   ;;  %v7980_v50 = vld [vmem:[#allocation3 + $0x90] sm:$0xff]  }
 0x383   :  { %7135 = vmatpush3.bf16.msra.mxu0 %v7917_v61  ;;  %7116 = vmatprep.subr.bf16.mxu1 %v8208_v0  ;;  %v7951_v61 = vld [vmem:[#allocation3 + $0x550] sm:$0xff]  }
 0x384   :  { %7136 = vmatprep.subr.bf16.mxu0 %v8208_v0 }
 0x386   :  { %7117 = vmatpush3.bf16.msra.mxu1 %v7918_v62  ;;  %v7952_v62 = vld [vmem:[#allocation3 + $0x548] sm:$0xff]  }
 0x387   :  { %7137 = vmatpush3.bf16.msra.mxu0 %v7919_v63  ;;  %7118 = vmatprep.subr.bf16.mxu1 %v8208_v0  ;;  %v7953_v63 = vld [vmem:[#allocation3 + $0x540] sm:$0xff]  }
 0x388   :  { %7138 = vmatprep.subr.bf16.mxu0 %v8208_v0 }
 0x38a   :  { %7119 = vmatpush3.bf16.msra.mxu1 %v7920_v1  ;;  %v2475_v1 = vld [vmem:[#allocation2 + $0x6] sm:$0xff] }
 0x38b   :  { %7139 = vmatpush3.bf16.msra.mxu0 %v7921_v2  ;;  %7120 = vmatprep.subr.bf16.mxu1 %v8208_v0  ;;  %v2476_v2 = vld [vmem:[#allocation2 + $0xe] sm:$0xf] }
 0x38c   :  { %7140 = vmatprep.subr.bf16.mxu0 %v8208_v0 }
 0x38e   :  { %7121 = vmatpush3.bf16.msra.mxu1 %v7922_v3  ;;  %v2477_v3 = vpack.c.bf16 %v2476_v2, %v2475_v1  ;;  %v7990_v1 = vld [vmem:[#allocation3 + $0x128] sm:$0xff]   ;;  %v7992_v2 = vld [vmem:[#allocation3 + $0x120] sm:$0xff]  }
 0x38f   :  { %7141 = vmatpush3.bf16.msra.mxu0 %v7923_v52  ;;  %7122 = vmatprep.subr.bf16.mxu1 %v8208_v0  ;;  %v7954_v52 = vld [vmem:[#allocation3 + $0x78] sm:$0xff]  }
 0x390   :  { %7142 = vmatprep.subr.bf16.mxu0 %v8208_v0 }
 0x392   :  { %7123 = vmatpush3.bf16.msra.mxu1 %v7924_v53  ;;  %v7955_v53 = vld [vmem:[#allocation3 + $0x5b8] sm:$0xff]  }
 0x393   :  { %7143 = vmatpush3.bf16.msra.mxu0 %v7925_v4  ;;  %7124 = vmatprep.subr.bf16.mxu1 %v8208_v0  ;;  %v7956_v4 = vld [vmem:[#allocation3 + $0x70] sm:$0xff]  }
 0x394   :  { %7144 = vmatprep.subr.bf16.mxu0 %v8208_v0 }
 0x396   :  { %7125 = vmatpush3.bf16.msra.mxu1 %v7926_v5  ;;  %v7957_v5 = vld [vmem:[#allocation3 + $0x5b0] sm:$0xff]  }
 0x397   :  { %7145 = vmatpush3.bf16.msra.mxu0 %v7927_v6  ;;  %7126 = vmatprep.subr.bf16.mxu1 %v8208_v0  ;;  %v7958_v6 = vld [vmem:[#allocation3 + $0x68] sm:$0xff]  }
 0x398   :  { %7146 = vmatprep.subr.bf16.mxu0 %v8208_v0 }
 0x39a   :  { %7127 = vmatpush3.bf16.msra.mxu1 %v7928_v7  ;;  %v7959_v7 = vld [vmem:[#allocation3 + $0x5a8] sm:$0xff]  }
 0x39b   :  { %7147 = vmatpush3.bf16.msra.mxu0 %v7929_v8  ;;  %7152 = vmatprep.subr.bf16.mxu1 %v8208_v0  ;;  %v7960_v8 = vld [vmem:[#allocation3 + $0x60] sm:$0xff]  }
 0x39c   :  { %7172 = vmatprep.subr.bf16.mxu0 %v8208_v0 }
 0x39d   :  { %7129 = vmatmul.mubr.bf16.vlgmr.msra.gmra.mxu1 %v2033_v24  ;;  %v7965_v24 = vld [vmem:[#allocation3 + $0x590] sm:$0xff]  }
 0x39e   :  { %7149 = vmatmul.mubr.bf16.vlgmr.msra.gmra.mxu0 %v2144_v27  ;;  %7153 = vmatpush3.bf16.msra.mxu1 %v7930_v22  ;;  %v6094_v22 = vld [vmem:[%s8921_s0 + $0x10] sm:$0xff]  ;;  %v7966_v27 = vld [vmem:[#allocation3 + $0x48] sm:$0xff]  }
 0x39f   :  { %7173 = vmatpush3.bf16.msra.mxu0 %v7931_v23  ;;  %7154 = vmatprep.subr.bf16.mxu1 %v8208_v0  ;;  %v6095_v23 = vld [vmem:[%s8921_s0 + $0x18] sm:$0xff]  ;;  %2753 = vst [vmem:[#allocation2 + $0x2] sm:$0xff] %v6094_v22 }
 0x3a0   :  { %7174 = vmatprep.subr.bf16.mxu0 %v8208_v0  ;;  %7168 = vmatprep.mubr.msk.bf16.mxu1 %vm8209_vm0, %v8208_v0  ;;  %2754 = vst [vmem:[#allocation2 + $0xa] sm:$0xff] %v6095_v23 }
 0x3a1   :  { %7188 = vmatprep.mubr.msk.bf16.mxu0 %vm8209_vm0, %v8208_v0 }
 0x3a2   :  { %7155 = vmatpush3.bf16.msra.mxu1 %v7932_v29  ;;  %v7967_v29 = vld [vmem:[#allocation3 + $0x588] sm:$0xff]  }
 0x3a3   :  { %7175 = vmatpush3.bf16.msra.mxu0 %v7933_v32  ;;  %7156 = vmatprep.subr.bf16.mxu1 %v8208_v0  ;;  %v7968_v32 = vld [vmem:[#allocation3 + $0x40] sm:$0xff]  }
 0x3a4   :  { %7176 = vmatprep.subr.bf16.mxu0 %v8208_v0 }
 0x3a6   :  { %7157 = vmatpush3.bf16.msra.mxu1 %v7934_v33  ;;  %v7969_v33 = vld [vmem:[#allocation3 + $0x580] sm:$0xff]  }
 0x3a7   :  { %7177 = vmatpush3.bf16.msra.mxu0 %v7935_v34  ;;  %7158 = vmatprep.subr.bf16.mxu1 %v8208_v0  ;;  %v2774_v34 = vld [vmem:[#allocation2 + $0x1] sm:$0xff] }
 0x3a8   :  { %7178 = vmatprep.subr.bf16.mxu0 %v8208_v0 }
 0x3aa   :  { %7159 = vmatpush3.bf16.msra.mxu1 %v7936_v35  ;;  %v2775_v35 = vld [vmem:[#allocation2 + $0x9] sm:$0xff] }
 0x3ab   :  { %7179 = vmatpush3.bf16.msra.mxu0 %v7937_v38  ;;  %7160 = vmatprep.subr.bf16.mxu1 %v8208_v0  ;;  %v2776_v38 = vpack.c.bf16 %v2775_v35, %v2774_v34 }
 0x3ac   :  { %7180 = vmatprep.subr.bf16.mxu0 %v8208_v0 }
 0x3ae   :  { %7161 = vmatpush3.bf16.msra.mxu1 %v7938_v39  ;;  %v7970_v39 = vld [vmem:[#allocation3 + $0xb8] sm:$0xff]  }
 0x3af   :  { %7181 = vmatpush3.bf16.msra.mxu0 %v7939_v40  ;;  %7162 = vmatprep.subr.bf16.mxu1 %v8208_v0  ;;  %v7972_v40 = vld [vmem:[#allocation3 + $0xb0] sm:$0xff]  }
 0x3b0   :  { %7182 = vmatprep.subr.bf16.mxu0 %v8208_v0 }
 0x3b2   :  { %7163 = vmatpush3.bf16.msra.mxu1 %v7940_v41  ;;  %v7974_v41 = vld [vmem:[#allocation3 + $0xa8] sm:$0xff]  }
 0x3b3   :  { %7183 = vmatpush3.bf16.msra.mxu0 %v7941_v43  ;;  %7164 = vmatprep.subr.bf16.mxu1 %v8208_v0  ;;  %v7976_v43 = vld [vmem:[#allocation3 + $0xa0] sm:$0xff]  }
 0x3b4   :  { %7184 = vmatprep.subr.bf16.mxu0 %v8208_v0 }
 0x3b6   :  { %7165 = vmatpush3.bf16.msra.mxu1 %v7942_v44  ;;  %v7978_v44 = vld [vmem:[#allocation3 + $0x98] sm:$0xff]  }
 0x3b7   :  { %7185 = vmatpush3.bf16.msra.mxu0 %v7943_v31  ;;  %7166 = vmatprep.subr.bf16.mxu1 %v8208_v0 }
 0x3b8   :  { %7186 = vmatprep.subr.bf16.mxu0 %v8208_v0 }
 0x3ba   :  { %7167 = vmatpush3.bf16.msra.mxu1 %v7944_v46 }
 0x3bb   :  { %7187 = vmatpush3.bf16.msra.mxu0 %v7945_v47  ;;  %7192 = vmatprep.subr.bf16.mxu1 %v8208_v0 }
 0x3bc   :  { %7212 = vmatprep.subr.bf16.mxu0 %v8208_v0 }
 0x3bd   :  { %7169 = vmatmul.mubr.bf16.vlgmr.msra.gmra.mxu1 %v2255_v55 }
 0x3be   :  { %7189 = vmatmul.mubr.bf16.vlgmr.msra.gmra.mxu0 %v2366_v56  ;;  %7193 = vmatpush3.bf16.msra.mxu1 %v7946_v54 }
 0x3bf   :  { %7208 = vmatprep.mubr.msk.bf16.mxu1 %vm8209_vm0, %v8208_v0  ;;  %7194 = vmatprep.subr.bf16.mxu1 %v8208_v0 }
 0x3c0   :  { %7228 = vmatprep.mubr.msk.bf16.mxu0 %vm8209_vm0, %v8208_v0  ;;  %7213 = vmatpush3.bf16.msra.mxu0 %v7955_v53 }
 0x3c1   :  { %7214 = vmatprep.subr.bf16.mxu0 %v8208_v0 }
 0x3c2   :  { %7195 = vmatpush3.bf16.msra.mxu1 %v7947_v57 }
 0x3c3   :  { %7196 = vmatprep.subr.bf16.mxu1 %v8208_v0 }
 0x3c4   :  { %7215 = vmatpush3.bf16.msra.mxu0 %v7957_v5 }
 0x3c5   :  { %7216 = vmatprep.subr.bf16.mxu0 %v8208_v0 }
 0x3c6   :  { %7197 = vmatpush3.bf16.msra.mxu1 %v7948_v58  ;;  %v7982_v58 = vld [vmem:[#allocation3 + $0x88] sm:$0xff]  }
 0x3c7   :  { %7198 = vmatprep.subr.bf16.mxu1 %v8208_v0 }
 0x3c8   :  { %7217 = vmatpush3.bf16.msra.mxu0 %v7959_v7 }
 0x3c9   :  { %7218 = vmatprep.subr.bf16.mxu0 %v8208_v0 }
 0x3ca   :  { %7199 = vmatpush3.bf16.msra.mxu1 %v7949_v59  ;;  %v7984_v59 = vld [vmem:[#allocation3 + $0x80] sm:$0xff]  }
 0x3cb   :  { %7200 = vmatprep.subr.bf16.mxu1 %v8208_v0 }
 0x3cc   :  { %7219 = vmatpush3.bf16.msra.mxu0 %v7961_v10 }
 0x3cd   :  { %7220 = vmatprep.subr.bf16.mxu0 %v8208_v0 }
 0x3ce   :  { %7201 = vmatpush3.bf16.msra.mxu1 %v7950_v60  ;;  %v2973_v60 = vpack.c.bf16 %v6095_v23, %v6094_v22  ;;  %v3191_v22 = vld [vmem:[#allocation2 + $0x4] sm:$0xff]  ;;  %v3192_v23 = vld [vmem:[#allocation2 + $0xc] sm:$0xff] }
 0x3cf   :  { %7202 = vmatprep.subr.bf16.mxu1 %v8208_v0 }
 0x3d0   :  { %7221 = vmatpush3.bf16.msra.mxu0 %v7963_v16  ;;  %v7998_v16 = vld [vmem:[#allocation3 + $0x108] sm:$0xff]  }
 0x3d1   :  { %7222 = vmatprep.subr.bf16.mxu0 %v8208_v0 }
 0x3d2   :  { %7203 = vmatpush3.bf16.msra.mxu1 %v7951_v61  ;;  %v7986_v61 = vld [vmem:[#allocation3 + $0x138] sm:$0xff]  }
 0x3d3   :  { %7204 = vmatprep.subr.bf16.mxu1 %v8208_v0 }
 0x3d4   :  { %7223 = vmatpush3.bf16.msra.mxu0 %v7965_v24  ;;  %v3193_v24 = vpack.c.bf16 %v3192_v23, %v3191_v22  ;;  %v7985_v22 = vld [vmem:[#allocation3] sm:$0xff]   ;;  %v2756_v23 = vld [vmem:[#allocation2 + $0x8] sm:$0xff] }
 0x3d5   :  { %7224 = vmatprep.subr.bf16.mxu0 %v8208_v0 }
 0x3d6   :  { %7205 = vmatpush3.bf16.msra.mxu1 %v7952_v62  ;;  %v8586_v62 = vld [vmem:[#allocation2] sm:$0xff] }
 0x3d7   :  { %7206 = vmatprep.subr.bf16.mxu1 %v8208_v0  ;;  %3309 = vst [vmem:[#allocation2] sm:$0x3] %v8208_v0 }
 0x3d8   :  { %7225 = vmatpush3.bf16.msra.mxu0 %v7967_v29 }
 0x3d9   :  { %7226 = vmatprep.subr.bf16.mxu0 %v8208_v0 }
 0x3da   :  { %7207 = vmatpush3.bf16.msra.mxu1 %v7953_v63  ;;  %v7988_v63 = vld [vmem:[#allocation3 + $0x130] sm:$0xff]  }
 0x3db   :  { %7232 = vmatprep.subr.bf16.mxu1 %v8208_v0 }
 0x3dc   :  { %7227 = vmatpush3.bf16.msra.mxu0 %v7969_v33 }
 0x3dd   :  { %7209 = vmatmul.mubr.bf16.vlgmr.msra.gmra.mxu1 %v2477_v3  ;;  %7252 = vmatprep.subr.bf16.mxu0 %v8208_v0  ;;  %v7994_v3 = vld [vmem:[#allocation3 + $0x118] sm:$0xff]  }
 0x3de   :  { %7248 = vmatprep.mubr.msk.bf16.mxu1 %vm8209_vm0, %v8208_v0  ;;  %7233 = vmatpush3.bf16.msra.mxu1 %v7954_v52 }
 0x3df   :  { %7234 = vmatprep.subr.bf16.mxu1 %v8208_v0 }
 0x3e2   :  { %7235 = vmatpush3.bf16.msra.mxu1 %v7956_v4 }
 0x3e3   :  { %7236 = vmatprep.subr.bf16.mxu1 %v8208_v0 }
 0x3e6   :  { %7237 = vmatpush3.bf16.msra.mxu1 %v7958_v6  ;;  %v7996_v6 = vld [vmem:[#allocation3 + $0x110] sm:$0xff]  }
 0x3e7   :  { %7238 = vmatprep.subr.bf16.mxu1 %v8208_v0 }
 0x3ea   :  { %7239 = vmatpush3.bf16.msra.mxu1 %v7960_v8 }
 0x3eb   :  { %7240 = vmatprep.subr.bf16.mxu1 %v8208_v0 }
 0x3ee   :  { %7241 = vmatpush3.bf16.msra.mxu1 %v7962_v11 }
 0x3ef   :  { %7242 = vmatprep.subr.bf16.mxu1 %v8208_v0 }
 0x3f2   :  { %7243 = vmatpush3.bf16.msra.mxu1 %v7964_v17  ;;  %v8000_v17 = vld [vmem:[#allocation3 + $0x100] sm:$0xff]  }
 0x3f3   :  { %7244 = vmatprep.subr.bf16.mxu1 %v8208_v0 }
 0x3f6   :  { %7245 = vmatpush3.bf16.msra.mxu1 %v7966_v27  ;;  %v8598_v27 = vld [vmem:[#allocation2 + $0xb] sm:$0xff] }
 0x3f7   :  { %7246 = vmatprep.subr.bf16.mxu1 %v8208_v0  ;;  %3310 = vst [vmem:[#allocation2 + $0x12] sm:$0x3] %v8208_v0 }
 0x3fa   :  { %7247 = vmatpush3.bf16.msra.mxu1 %v7968_v32 }
 0x3fb   :  { %7272 = vmatprep.subr.bf16.mxu1 %v8208_v0 }
 0x3fd   :  { %7249 = vmatmul.mubr.bf16.vlgmr.msra.gmra.mxu1 %v2776_v38 }
 0x3fe   :  { %7273 = vmatpush3.bf16.msra.mxu1 %v7970_v39  ;;  %7288 = vmatprep.mubr.msk.bf16.mxu1 %vm8209_vm0, %v8208_v0 }
 0x3ff   :  { %7274 = vmatprep.subr.bf16.mxu1 %v8208_v0 }
 0x402   :  { %7275 = vmatpush3.bf16.msra.mxu1 %v7972_v40 }
 0x403   :  { %7276 = vmatprep.subr.bf16.mxu1 %v8208_v0 }
 0x406   :  { %7277 = vmatpush3.bf16.msra.mxu1 %v7974_v41 }
 0x407   :  { %7278 = vmatprep.subr.bf16.mxu1 %v8208_v0 }
 0x40a   :  { %7279 = vmatpush3.bf16.msra.mxu1 %v7976_v43 }
 0x40b   :  { %7280 = vmatprep.subr.bf16.mxu1 %v8208_v0 }
 0x40e   :  { %7281 = vmatpush3.bf16.msra.mxu1 %v7978_v44 }
 0x40f   :  { %7282 = vmatprep.subr.bf16.mxu1 %v8208_v0 }
 0x412   :  { %7283 = vmatpush3.bf16.msra.mxu1 %v7980_v50  ;;  %v8608_v50 = vrot.slane %v8475_v26, %v8333_v20 }
 0x413   :  { %7284 = vmatprep.subr.bf16.mxu1 %v8208_v0 }
 0x416   :  { %7285 = vmatpush3.bf16.msra.mxu1 %v7982_v58 }
 0x417   :  { %7286 = vmatprep.subr.bf16.mxu1 %v8208_v0 }
 0x41a   :  { %7287 = vmatpush3.bf16.msra.mxu1 %v7984_v59 }
 0x41b   :  { %7312 = vmatprep.subr.bf16.mxu1 %v8208_v0 }
 0x41d   :  { %7289 = vmatmul.mubr.bf16.vlgmr.msra.gmra.mxu1 %v2973_v60 }
 0x41e   :  { %7313 = vmatpush3.bf16.msra.mxu1 %v7986_v61  ;;  %7328 = vmatprep.mubr.msk.bf16.mxu1 %vm8209_vm0, %v8208_v0 }
 0x41f   :  { %7314 = vmatprep.subr.bf16.mxu1 %v8208_v0 }
 0x422   :  { %7315 = vmatpush3.bf16.msra.mxu1 %v7988_v63 }
 0x423   :  { %7316 = vmatprep.subr.bf16.mxu1 %v8208_v0 }
 0x426   :  { %7317 = vmatpush3.bf16.msra.mxu1 %v7990_v1 }
 0x427   :  { %7318 = vmatprep.subr.bf16.mxu1 %v8208_v0 }
 0x42a   :  { %7319 = vmatpush3.bf16.msra.mxu1 %v7992_v2  ;;  %v8619_v2 = vrot.slane %v8475_v26, %v8409_v9 }
 0x42b   :  { %7320 = vmatprep.subr.bf16.mxu1 %v8208_v0 }
 0x42e   :  { %7321 = vmatpush3.bf16.msra.mxu1 %v7994_v3 }
 0x42f   :  { %7322 = vmatprep.subr.bf16.mxu1 %v8208_v0 }
 0x432   :  { %7323 = vmatpush3.bf16.msra.mxu1 %v7996_v6 }
 0x433   :  { %7324 = vmatprep.subr.bf16.mxu1 %v8208_v0 }
 0x436   :  { %7325 = vmatpush3.bf16.msra.mxu1 %v7998_v16  ;;  %v7981_v16 = vld [vmem:[#allocation3 + $0x10] sm:$0xff]  }
 0x437   :  { %7326 = vmatprep.subr.bf16.mxu1 %v8208_v0 }
 0x43a   :  { %7327 = vmatpush3.bf16.msra.mxu1 %v8000_v17  ;;  %v7983_v17 = vld [vmem:[#allocation3 + $0x8] sm:$0xff]  }
 0x43b   :  { %7352 = vmatprep.subr.bf16.mxu1 %v8208_v0 }
 0x43d   :  { %v1935_v31 = vpop.f32.mrf.mxu1  ;;  %7329 = vmatmul.mubr.bf16.vlgmr.msra.gmra.mxu1 %v3193_v24  ;;  %v2757_v24 = vpack.c.bf16 %v2756_v23, %v8586_v62  ;;  %v7995_v62 = vld [vmem:[#allocation3 + $0xd8] sm:$0xff]  }
 0x43e   :  { %v2024_v46 = vpop.f32.mrf.mxu0  ;;  %7368 = vmatprep.mubr.msk.bf16.mxu1 %vm8209_vm0, %v8208_v0 }
 0x43f   :  { %v8578_v47 = vadd.f32 %v2024_v46, %v1935_v31  ;;  %v7090_v48 = vpop.f32.mrf.mxu1 }
 0x440   :  { %v7110_v49 = vpop.f32.mrf.mxu0 }
 0x441   :  { %v1938_v51 = vpop.f32.mrf.mxu1 }
 0x442   :  { %v2027_v54 = vpop.f32.mrf.mxu0 }
 0x443   :  { %v8581_v55 = vadd.f32 %v2027_v54, %v1938_v51  ;;  %v7091_v56 = vpop.f32.mrf.mxu1 }
 0x444   :  { %v7111_v57 = vpop.f32.mrf.mxu0 }
 0x45d   :  { %v2133_v52 = vpop.f32.mrf.mxu1 }
 0x45e   :  { %v2244_v53 = vpop.f32.mrf.mxu0  ;;  %v2140_v41 = vadd.f32 %v2133_v52, %v8578_v47  ;;  %v8613_v47 = vrot.slane %v8475_v26, %v8336_v21 }
 0x45f   :  { %v7130_v4 = vpop.f32.mrf.mxu1 }
 0x460   :  { %v7150_v5 = vpop.f32.mrf.mxu0  ;;  %v2251_v43 = vadd.f32 %v2244_v53, %v2140_v41 }
 0x461   :  { %v2136_v7 = vpop.f32.mrf.mxu1  ;;  %v7971_v5 = vld [vmem:[#allocation3 + $0x38] sm:$0xff]  }
 0x462   :  { %v2247_v8 = vpop.f32.mrf.mxu0  ;;  %v2141_v44 = vadd.f32 %v2136_v7, %v8581_v55  ;;  %v7973_v7 = vld [vmem:[#allocation3 + $0x30] sm:$0xff]  }
 0x463   :  { %v7131_v10 = vpop.f32.mrf.mxu1 }
 0x464   :  { %v7151_v11 = vpop.f32.mrf.mxu0  ;;  %v2252_v46 = vadd.f32 %v2247_v8, %v2141_v44  ;;  %v7975_v8 = vld [vmem:[#allocation3 + $0x28] sm:$0xff]   ;;  %v7977_v10 = vld [vmem:[#allocation3 + $0x20] sm:$0xff]  }
 0x465   :  { %v7979_v11 = vld [vmem:[#allocation3 + $0x18] sm:$0xff]  }
 0x47d   :  { %v2355_v29 = vpop.f32.mrf.mxu1 }
 0x47e   :  { %v2466_v32 = vpop.f32.mrf.mxu0  ;;  %v2362_v31 = vadd.f32 %v2355_v29, %v2251_v43  ;;  %v7987_v29 = vld [vmem:[#allocation3 + $0xf8] sm:$0xff]  }
 0x47f   :  { %v7170_v33 = vpop.f32.mrf.mxu1 }
 0x480   :  { %v7190_v34 = vpop.f32.mrf.mxu0  ;;  %v2473_v48 = vadd.f32 %v2466_v32, %v2362_v31  ;;  %v7989_v32 = vld [vmem:[#allocation3 + $0xf0] sm:$0xff]   ;;  %v7991_v33 = vld [vmem:[#allocation3 + $0xe8] sm:$0xff]  }
 0x481   :  { %v2358_v35 = vpop.f32.mrf.mxu1  ;;  %v7993_v34 = vld [vmem:[#allocation3 + $0xe0] sm:$0xff]  }
 0x482   :  { %v2469_v38 = vpop.f32.mrf.mxu0  ;;  %v2363_v49 = vadd.f32 %v2358_v35, %v2252_v46  ;;  %v7997_v35 = vld [vmem:[#allocation3 + $0xd0] sm:$0xff]  }
 0x483   :  { %v7171_v39 = vpop.f32.mrf.mxu1 }
 0x484   :  { %v7191_v40 = vpop.f32.mrf.mxu0  ;;  %v2474_v57 = vadd.f32 %v2469_v38, %v2363_v49  ;;  %v7999_v38 = vld [vmem:[#allocation3 + $0xc8] sm:$0xff]   ;;  %v8001_v39 = vld [vmem:[#allocation3 + $0xc0] sm:$0xff]  }
 0x485   :  { %v3081_v40 = vld [vmem:[#allocation2 + $0x3] sm:$0xff] }
 0x486   :  { %v3083_v41 = vpack.c.bf16 %v8598_v27, %v3081_v40  ;;  %v8002_v27 = vld [vmem:[#allocation3 + $0x1b8] sm:$0xff]  }
 0x49d   :  { %v2577_v51 = vpop.f32.mrf.mxu1 }
 0x49e   :  { %v2584_v54 = vadd.f32 %v2577_v51, %v2473_v48 }
 0x49f   :  { %v7210_v56 = vpop.f32.mrf.mxu1 }
 0x4a0   :  { %v2590_v58 = vadd.f32 %v8608_v50, %v2584_v54  ;;  %v8003_v56 = vld [vmem:[#allocation3 + $0x178] sm:$0xff]  }
 0x4a1   :  { %v2580_v59 = vpop.f32.mrf.mxu1  ;;  %7353 = vmatpush3.bf16.msra.mxu1 %v8003_v56 }
 0x4a2   :  { %v2592_v60 = vmax.f32 %v2590_v58, 0.0  ;;  %v2585_v55 = vadd.f32 %v2580_v59, %v2474_v57  ;;  %v8004_v57 = vld [vmem:[#allocation3 + $0x1b0] sm:$0xff]   ;;  %7354 = vmatprep.subr.bf16.mxu1 %v8208_v0 }
 0x4a3   :  { %v7211_v61 = vpop.f32.mrf.mxu1  ;;  %v8005_v58 = vld [vmem:[#allocation3 + $0x170] sm:$0xff]  }
 0x4a4   :  { %v2591_v63 = vadd.f32 %v8608_v50, %v2585_v55  ;;  %v2598_v1 = vmul.f32 %v8613_v47, %v2592_v60  ;;  %v8006_v61 = vld [vmem:[#allocation3 + $0x1a8] sm:$0xff]  }
 0x4a5   :  { %7355 = vmatpush3.bf16.msra.mxu1 %v8005_v58 }
 0x4a6   :  { %v2593_v3 = vmax.f32 %v2591_v63, 0.0  ;;  %v2604_v53 = vadd.f32 %v8619_v2, %v2598_v1  ;;  %7356 = vmatprep.subr.bf16.mxu1 %v8208_v0  ;;  %v8007_v63 = vld [vmem:[#allocation3 + $0x168] sm:$0xff]  }
 0x4a8   :  { %v2599_v52 = vmul.f32 %v8613_v47, %v2593_v3  ;;  %v8008_v3 = vld [vmem:[#allocation3 + $0x1a0] sm:$0xff]  }
 0x4a9   :  { %7357 = vmatpush3.bf16.msra.mxu1 %v8007_v63 }
 0x4aa   :  { %v2605_v4 = vadd.f32 %v8619_v2, %v2599_v52  ;;  %7358 = vmatprep.subr.bf16.mxu1 %v8208_v0  ;;  %v8009_v52 = vld [vmem:[#allocation3 + $0x160] sm:$0xff]  }
 0x4ac   :  { %v2606_v6 = vpack.c.bf16 %v2605_v4, %v2604_v53  ;;  %v8010_v53 = vld [vmem:[#allocation3 + $0x198] sm:$0xff]  }
 0x4ad   :  { %7359 = vmatpush3.bf16.msra.mxu1 %v8009_v52  ;;  %v8011_v4 = vld [vmem:[#allocation3 + $0x158] sm:$0xff]  }
 0x4ae   :  { %7229 = vmatmul.mubr.bf16.vlgmr.msra.gmra.mxu0 %v2606_v6  ;;  %7360 = vmatprep.subr.bf16.mxu1 %v8208_v0  ;;  %v8013_v6 = vld [vmem:[#allocation3 + $0x150] sm:$0xff]  }
 0x4af   :  { %7253 = vmatpush3.bf16.msra.mxu0 %v7971_v5  ;;  %7268 = vmatprep.mubr.msk.bf16.mxu0 %vm8209_vm0, %v8208_v0  ;;  %v8012_v5 = vld [vmem:[#allocation3 + $0x190] sm:$0xff]  }
 0x4b0   :  { %7254 = vmatprep.subr.bf16.mxu0 %v8208_v0 }
 0x4b1   :  { %7361 = vmatpush3.bf16.msra.mxu1 %v8011_v4 }
 0x4b2   :  { %7362 = vmatprep.subr.bf16.mxu1 %v8208_v0 }
 0x4b3   :  { %7255 = vmatpush3.bf16.msra.mxu0 %v7973_v7  ;;  %v8014_v7 = vld [vmem:[#allocation3 + $0x188] sm:$0xff]  }
 0x4b4   :  { %7256 = vmatprep.subr.bf16.mxu0 %v8208_v0 }
 0x4b5   :  { %7363 = vmatpush3.bf16.msra.mxu1 %v8013_v6 }
 0x4b6   :  { %7364 = vmatprep.subr.bf16.mxu1 %v8208_v0 }
 0x4b7   :  { %7257 = vmatpush3.bf16.msra.mxu0 %v7975_v8  ;;  %v8015_v8 = vld [vmem:[#allocation3 + $0x148] sm:$0xff]  }
 0x4b8   :  { %7258 = vmatprep.subr.bf16.mxu0 %v8208_v0 }
 0x4b9   :  { %7365 = vmatpush3.bf16.msra.mxu1 %v8015_v8 }
 0x4ba   :  { %7366 = vmatprep.subr.bf16.mxu1 %v8208_v0 }
 0x4bb   :  { %7259 = vmatpush3.bf16.msra.mxu0 %v7977_v10  ;;  %v8016_v10 = vld [vmem:[#allocation3 + $0x180] sm:$0xff]  }
 0x4bc   :  { %7260 = vmatprep.subr.bf16.mxu0 %v8208_v0 }
 0x4bd   :  { %v8646_v43 = vpop.f32.mrf.mxu1 }
 0x4bf   :  { %7261 = vmatpush3.bf16.msra.mxu0 %v7979_v11  ;;  %v7250_v44 = vpop.f32.mrf.mxu1  ;;  %v8017_v11 = vld [vmem:[#allocation3 + $0x140] sm:$0xff]  }
 0x4c0   :  { %7262 = vmatprep.subr.bf16.mxu0 %v8208_v0  ;;  %7367 = vmatpush3.bf16.msra.mxu1 %v8017_v11 }
 0x4c1   :  { %v8650_v31 = vpop.f32.mrf.mxu1  ;;  %7392 = vmatprep.subr.bf16.mxu1 %v8208_v0 }
 0x4c3   :  { %7263 = vmatpush3.bf16.msra.mxu0 %v7981_v16  ;;  %v7251_v46 = vpop.f32.mrf.mxu1  ;;  %v8679_v16 = vrot.slane %v8475_v26, %v1173_v14 }
 0x4c4   :  { %7264 = vmatprep.subr.bf16.mxu0 %v8208_v0 }
 0x4c7   :  { %7265 = vmatpush3.bf16.msra.mxu0 %v7983_v17 }
 0x4c8   :  { %7266 = vmatprep.subr.bf16.mxu0 %v8208_v0 }
 0x4cb   :  { %7267 = vmatpush3.bf16.msra.mxu0 %v7985_v22 }
 0x4cc   :  { %7292 = vmatprep.subr.bf16.mxu0 %v8208_v0 }
 0x4ce   :  { %7269 = vmatmul.mubr.bf16.vlgmr.msra.gmra.mxu0 %v2757_v24 }
 0x4cf   :  { %7293 = vmatpush3.bf16.msra.mxu0 %v7987_v29  ;;  %7308 = vmatprep.mubr.msk.bf16.mxu0 %vm8209_vm0, %v8208_v0 }
 0x4d0   :  { %7294 = vmatprep.subr.bf16.mxu0 %v8208_v0 }
 0x4d3   :  { %7295 = vmatpush3.bf16.msra.mxu0 %v7989_v32 }
 0x4d4   :  { %7296 = vmatprep.subr.bf16.mxu0 %v8208_v0 }
 0x4d7   :  { %7297 = vmatpush3.bf16.msra.mxu0 %v7991_v33 }
 0x4d8   :  { %7298 = vmatprep.subr.bf16.mxu0 %v8208_v0 }
 0x4db   :  { %7299 = vmatpush3.bf16.msra.mxu0 %v7993_v34 }
 0x4dc   :  { %7300 = vmatprep.subr.bf16.mxu0 %v8208_v0 }
 0x4dd   :  { %v8652_v48 = vpop.f32.mrf.mxu1 }
 0x4df   :  { %7301 = vmatpush3.bf16.msra.mxu0 %v7995_v62  ;;  %v7290_v49 = vpop.f32.mrf.mxu1 }
 0x4e0   :  { %7302 = vmatprep.subr.bf16.mxu0 %v8208_v0 }
 0x4e1   :  { %v8654_v51 = vpop.f32.mrf.mxu1 }
 0x4e3   :  { %7303 = vmatpush3.bf16.msra.mxu0 %v7997_v35  ;;  %v7291_v54 = vpop.f32.mrf.mxu1 }
 0x4e4   :  { %7304 = vmatprep.subr.bf16.mxu0 %v8208_v0 }
 0x4e7   :  { %7305 = vmatpush3.bf16.msra.mxu0 %v7999_v38 }
 0x4e8   :  { %7306 = vmatprep.subr.bf16.mxu0 %v8208_v0 }
 0x4eb   :  { %7307 = vmatpush3.bf16.msra.mxu0 %v8001_v39 }
 0x4ec   :  { %7332 = vmatprep.subr.bf16.mxu0 %v8208_v0 }
 0x4ee   :  { %7309 = vmatmul.mubr.bf16.vlgmr.msra.gmra.mxu0 %v3083_v41 }
 0x4ef   :  { %7348 = vmatprep.mubr.msk.bf16.mxu0 %vm8209_vm0, %v8208_v0  ;;  %7333 = vmatpush3.bf16.msra.mxu0 %v8002_v27 }
 0x4f0   :  { %7334 = vmatprep.subr.bf16.mxu0 %v8208_v0 }
 0x4f3   :  { %7335 = vmatpush3.bf16.msra.mxu0 %v8004_v57 }
 0x4f4   :  { %7336 = vmatprep.subr.bf16.mxu0 %v8208_v0 }
 0x4f7   :  { %7337 = vmatpush3.bf16.msra.mxu0 %v8006_v61 }
 0x4f8   :  { %7338 = vmatprep.subr.bf16.mxu0 %v8208_v0 }
 0x4fb   :  { %7339 = vmatpush3.bf16.msra.mxu0 %v8008_v3 }
 0x4fc   :  { %7340 = vmatprep.subr.bf16.mxu0 %v8208_v0 }
 0x4fd   :  { %v8660_v59 = vpop.f32.mrf.mxu1 }
 0x4ff   :  { %v7330_v60 = vpop.f32.mrf.mxu1  ;;  %7341 = vmatpush3.bf16.msra.mxu0 %v8010_v53 }
 0x500   :  { %7342 = vmatprep.subr.bf16.mxu0 %v8208_v0 }
 0x501   :  { %v8662_v55 = vpop.f32.mrf.mxu1 }
 0x503   :  { %v7331_v1 = vpop.f32.mrf.mxu1  ;;  %7343 = vmatpush3.bf16.msra.mxu0 %v8012_v5 }
 0x504   :  { %7344 = vmatprep.subr.bf16.mxu0 %v8208_v0 }
 0x507   :  { %7345 = vmatpush3.bf16.msra.mxu0 %v8014_v7 }
 0x508   :  { %7346 = vmatprep.subr.bf16.mxu0 %v8208_v0 }
 0x50b   :  { %7347 = vmatpush3.bf16.msra.mxu0 %v8016_v10 }
 0x50c   :  { %7372 = vmatprep.subr.bf16.mxu0 %v8208_v0 }
 0x56e   :  { %v2710_v17 = vpop.f32.mrf.mxu0 }
 0x56f   :  { %v2711_v23 = vadd.f32 %v2710_v17, %v8679_v16 }
 0x570   :  { %v7230_v22 = vpop.f32.mrf.mxu0 }
 0x571   :  { %v2726_v62 = vmul.f32 %v2711_v23, %v2711_v23 }
 0x572   :  { %v2713_v24 = vpop.f32.mrf.mxu0 }
 0x573   :  { %v2714_v29 = vadd.f32 %v2713_v24, %v8679_v16 }
 0x574   :  { %v7231_v32 = vpop.f32.mrf.mxu0 }
 0x575   :  { %v2718_v33 = vsel %vm2717_vm1, %v2714_v29, 0.0  ;;  %v2727_v34 = vmul.f32 %v2714_v29, %v2714_v29 }
 0x576   :  { %v2719_v35 = vadd.f32 %v2718_v33, %v2711_v23 }
 0x577   :  { %v2728_v38 = vsel %vm2717_vm1, %v2727_v34, 0.0 }
 0x578   :  { %v2720_v39 = vrot.slane %v2719_v35, 4  ;;  %v2729_v40 = vadd.f32 %v2728_v38, %v2726_v62 }
 0x57a   :  { %v2721_v14 = vadd.f32 %v2720_v39, %v2719_v35  ;;  %v2730_v26 = vrot.slane %v2729_v40, 4  ;;  %v8019_v39 = vld [vmem:[#allocation3 + $0x238] sm:$0xff]  }
 0x57c   :  { %v2722_v41 = vrot.slane %v2721_v14, 2  ;;  %v2731_v44 = vadd.f32 %v2730_v26, %v2729_v40 }
 0x57e   :  { %v2723_v46 = vadd.f32 %v2722_v41, %v2721_v14  ;;  %v2732_v49 = vrot.slane %v2731_v44, 2  ;;  %v8022_v41 = vld [vmem:[#allocation3 + $0x1e8] sm:$0xff]  }
 0x580   :  { %v2724_v54 = vrot.slane %v2723_v46, 1  ;;  %v2733_v27 = vadd.f32 %v2732_v49, %v2731_v44  ;;  %v8023_v44 = vld [vmem:[#allocation3 + $0x228] sm:$0xff]   ;;  %v8025_v49 = vld [vmem:[#allocation3 + $0x220] sm:$0xff]  }
 0x582   :  { %v2725_v56 = vadd.f32 %v2724_v54, %v2723_v46  ;;  %v2734_v57 = vrot.slane %v2733_v27, 1  ;;  %v8024_v46 = vld [vmem:[#allocation3 + $0x1e0] sm:$0xff]   ;;  %v8026_v54 = vld [vmem:[#allocation3 + $0x1d8] sm:$0xff]  }
 0x584   :  { %v8685_v58 = vmul.f32 0.083333336, %v2725_v56  ;;  %v8687_v60 = vadd.f32 %v2734_v57, %v2733_v27  ;;  %v8027_v27 = vld [vmem:[#allocation3 + $0x218] sm:$0xff]   ;;  %v8029_v57 = vld [vmem:[#allocation3 + $0x210] sm:$0xff]  }
 0x586   :  { %v8690_v61 = vmul.f32 %v8685_v58, %v2725_v56  ;;  %v8028_v56 = vld [vmem:[#allocation3 + $0x1d0] sm:$0xff]  }
 0x588   :  { %v2738_v63 = vsub.f32 %v8687_v60, %v8690_v61 }
 0x58e   :  { %v2964_v1 = vpop.f32.mrf.mxu0 }
 0x58f   :  { %v2965_v4 = vadd.f32 %v2964_v1, %v8646_v43  ;;  %v8030_v1 = vld [vmem:[#allocation3 + $0x1c8] sm:$0xff]  }
 0x590   :  { %v7270_v3 = vpop.f32.mrf.mxu0 }
 0x591   :  { %v3079_v6 = vadd.f32 %v8652_v48, %v2965_v4  ;;  %v8031_v3 = vld [vmem:[#allocation3 + $0x208] sm:$0xff]  }
 0x592   :  { %v2967_v52 = vpop.f32.mrf.mxu0 }
 0x593   :  { %v2968_v5 = vadd.f32 %v2967_v52, %v8650_v31  ;;  %v8032_v52 = vld [vmem:[#allocation3 + $0x1c0] sm:$0xff]  }
 0x594   :  { %v7271_v53 = vpop.f32.mrf.mxu0 }
 0x595   :  { %v3080_v17 = vadd.f32 %v8654_v51, %v2968_v5  ;;  %v8033_v53 = vld [vmem:[#allocation3 + $0x200] sm:$0xff]  }
 0x5ae   :  { %v3182_v7 = vpop.f32.mrf.mxu0 }
 0x5af   :  { %v3189_v8 = vadd.f32 %v3182_v7, %v3079_v6  ;;  %v8034_v6 = vld [vmem:[#allocation3 + $0x278] sm:$0xff]  }
 0x5b0   :  { %v7310_v10 = vpop.f32.mrf.mxu0 }
 0x5b1   :  { %v3299_v11 = vadd.f32 %v8660_v59, %v3189_v8  ;;  %v8035_v10 = vld [vmem:[#allocation3 + $0x270] sm:$0xff]  }
 0x5b2   :  { %v3185_v22 = vpop.f32.mrf.mxu0 }
 0x5b3   :  { %v3301_v23 = vadd.f32 %v3299_v11, %v8345_v36  ;;  %v3190_v24 = vadd.f32 %v3185_v22, %v3080_v17  ;;  %v8036_v11 = vld [vmem:[#allocation3 + $0x268] sm:$0xff]   ;;  %v8037_v17 = vld [vmem:[#allocation3 + $0x260] sm:$0xff]   ;;  %v8038_v22 = vld [vmem:[#allocation3 + $0x258] sm:$0xff]  }
 0x5b4   :  { %v7311_v29 = vpop.f32.mrf.mxu0 }
 0x5b5   :  { %v3303_v32 = vmax.f32 %v3301_v23, 0.0  ;;  %v3300_v33 = vadd.f32 %v8662_v55, %v3190_v24  ;;  %v8018_v55 = vld [vmem:[#allocation3 + $0x1f8] sm:$0xff]   ;;  %v8039_v23 = vld [vmem:[#allocation3 + $0x250] sm:$0xff]   ;;  %v8040_v24 = vld [vmem:[#allocation3 + $0x248] sm:$0xff]  }
 0x5b6   :  { %v8041_v29 = vld [vmem:[#allocation3 + $0x240] sm:$0xff]  }
 0x5b7   :  { %v3305_v43 = vmul.f32 %v3303_v32, %v8350_v42  ;;  %v3302_v31 = vadd.f32 %v3300_v33, %v8345_v36 }
 0x5b9   :  { %v8704_v48 = vadd.f32 %v3305_v43, %v8354_v45  ;;  %v3304_v34 = vmax.f32 %v3302_v31, 0.0  ;;  %v8042_v43 = vld [vmem:[#allocation3 + $0x2f8] sm:$0xff]  }
 0x5ba   :  { %v8043_v31 = vld [vmem:[#allocation3 + $0x2b8] sm:$0xff]  }
 0x5bb   :  { %3311 = vst [vmem:[#allocation2 + $0x2] sm:$0xff] %v8704_v48  ;;  %v3306_v51 = vmul.f32 %v3304_v34, %v8350_v42  ;;  %v8020_v42 = vld [vmem:[#allocation3 + $0x1f0] sm:$0xff]  }
 0x5bc   :  { %v8045_v34 = vld [vmem:[#allocation3 + $0x2b0] sm:$0xff]  }
 0x5bd   :  { %v8709_v59 = vadd.f32 %v3306_v51, %v8354_v45  ;;  %v8021_v45 = vld [vmem:[#allocation3 + $0x230] sm:$0xff]   ;;  %v8046_v51 = vld [vmem:[#allocation3 + $0x2e8] sm:$0xff]  }
 0x5bf   :  { %3312 = vst [vmem:[#allocation2 + $0xa] sm:$0xff] %v8709_v59  ;;  %v3531_v7 = vpack.c.bf16 %v8709_v59, %v8704_v48  ;;  %v8044_v48 = vld [vmem:[#allocation3 + $0x2f0] sm:$0xff]   ;;  %v8047_v59 = vld [vmem:[#allocation3 + $0x2a8] sm:$0xff]  }
 0x5c2   :  { %v3332_v62 = vld [vmem:[#allocation2 + $0x1] sm:$0xff] }
 0x5c3   :  { %v3313_v35 = vld [vmem:[#allocation2] sm:$0xff] }
 0x5c4   :  { %3867 = vst [vmem:[#allocation2] sm:$0x7] %v8208_v0 }
 0x5c6   :  { %v3333_v38 = vld [vmem:[#allocation2 + $0x9] sm:$0xff] }
 0x5c7   :  { %v3314_v36 = vld [vmem:[#allocation2 + $0x8] sm:$0xff]  ;;  %v3334_v40 = vpack.c.bf16 %v3333_v38, %v3332_v62  ;;  %v8048_v62 = vld [vmem:[#allocation3 + $0x2e0] sm:$0xff]   ;;  %v8051_v38 = vld [vmem:[#allocation3 + $0x298] sm:$0xff]  }
 0x5c8   :  { %v3315_v14 = vpack.c.bf16 %v3314_v36, %v3313_v35  ;;  %v8713_v26 = vld [vmem:[#allocation2 + $0xc] sm:$0xff]  ;;  %v3639_v4 = vld [vmem:[#allocation2 + $0x3] sm:$0xff]  ;;  %v8049_v35 = vld [vmem:[#allocation3 + $0x2a0] sm:$0xff]  }
 0x5c9   :  { %3868 = vst [vmem:[#allocation2 + $0x13] sm:$0x7] %v8208_v0  ;;  %7349 = vmatmul.mubr.bf16.vlgmr.msra.gmra.mxu0 %v3334_v40  ;;  %v3640_v5 = vld [vmem:[#allocation2 + $0xb] sm:$0xff]  ;;  %v8054_v40 = vld [vmem:[#allocation3 + $0x2c8] sm:$0xff]  }
 0x5ca   :  { %7369 = vmatmul.mubr.bf16.vlgmr.msra.gmra.mxu1 %v3315_v14  ;;  %7373 = vmatpush3.bf16.msra.mxu0 %v8018_v55  ;;  %v3641_v8 = vpack.c.bf16 %v3640_v5, %v3639_v4  ;;  %v3749_v32 = vld [vmem:[#allocation2 + $0x4] sm:$0xff]  ;;  %v8050_v55 = vld [vmem:[#allocation3 + $0x2d8] sm:$0xff]  }
 0x5cb   :  { %7393 = vmatpush3.bf16.msra.mxu1 %v8019_v39  ;;  %7374 = vmatprep.subr.bf16.mxu0 %v8208_v0  ;;  %v3751_v33 = vpack.c.bf16 %v8713_v26, %v3749_v32  ;;  %v8052_v36 = vld [vmem:[#allocation3 + $0x2d0] sm:$0xff]   ;;  %v8055_v14 = vld [vmem:[#allocation3 + $0x288] sm:$0xff]   ;;  %v8056_v26 = vld [vmem:[#allocation3 + $0x2c0] sm:$0xff]  }
 0x5cc   :  { %7394 = vmatprep.subr.bf16.mxu1 %v8208_v0  ;;  %7388 = vmatprep.mubr.msk.bf16.mxu0 %vm8209_vm0, %v8208_v0  ;;  %v8053_v39 = vld [vmem:[#allocation3 + $0x290] sm:$0xff]  }
 0x5cd   :  { %7408 = vmatprep.mubr.msk.bf16.mxu1 %vm8209_vm0, %v8208_v0 }
 0x5ce   :  { %7375 = vmatpush3.bf16.msra.mxu0 %v8020_v42  ;;  %v8057_v42 = vld [vmem:[#allocation3 + $0x280] sm:$0xff]  }
 0x5cf   :  { %7395 = vmatpush3.bf16.msra.mxu1 %v8021_v45  ;;  %7376 = vmatprep.subr.bf16.mxu0 %v8208_v0  ;;  %v8058_v45 = vld [vmem:[#allocation3 + $0x338] sm:$0xff]  }
 0x5d0   :  { %7396 = vmatprep.subr.bf16.mxu1 %v8208_v0 }
 0x5d2   :  { %7377 = vmatpush3.bf16.msra.mxu0 %v8022_v41  ;;  %v8059_v41 = vld [vmem:[#allocation3 + $0x378] sm:$0xff]  }
 0x5d3   :  { %7397 = vmatpush3.bf16.msra.mxu1 %v8023_v44  ;;  %7378 = vmatprep.subr.bf16.mxu0 %v8208_v0 }
 0x5d4   :  { %7398 = vmatprep.subr.bf16.mxu1 %v8208_v0 }
 0x5d6   :  { %7379 = vmatpush3.bf16.msra.mxu0 %v8024_v46 }
 0x5d7   :  { %7399 = vmatpush3.bf16.msra.mxu1 %v8025_v49  ;;  %7380 = vmatprep.subr.bf16.mxu0 %v8208_v0 }
 0x5d8   :  { %7400 = vmatprep.subr.bf16.mxu1 %v8208_v0 }
 0x5da   :  { %7381 = vmatpush3.bf16.msra.mxu0 %v8026_v54 }
 0x5db   :  { %7401 = vmatpush3.bf16.msra.mxu1 %v8027_v27  ;;  %7382 = vmatprep.subr.bf16.mxu0 %v8208_v0 }
 0x5dc   :  { %7402 = vmatprep.subr.bf16.mxu1 %v8208_v0 }
 0x5de   :  { %7383 = vmatpush3.bf16.msra.mxu0 %v8028_v56 }
 0x5df   :  { %7403 = vmatpush3.bf16.msra.mxu1 %v8029_v57  ;;  %7384 = vmatprep.subr.bf16.mxu0 %v8208_v0 }
 0x5e0   :  { %7404 = vmatprep.subr.bf16.mxu1 %v8208_v0 }
 0x5e2   :  { %7385 = vmatpush3.bf16.msra.mxu0 %v8030_v1 }
 0x5e3   :  { %7405 = vmatpush3.bf16.msra.mxu1 %v8031_v3  ;;  %7386 = vmatprep.subr.bf16.mxu0 %v8208_v0 }
 0x5e4   :  { %7406 = vmatprep.subr.bf16.mxu1 %v8208_v0 }
 0x5e6   :  { %7387 = vmatpush3.bf16.msra.mxu0 %v8032_v52 }
 0x5e7   :  { %7407 = vmatpush3.bf16.msra.mxu1 %v8033_v53  ;;  %7412 = vmatprep.subr.bf16.mxu0 %v8208_v0 }
 0x5e8   :  { %7432 = vmatprep.subr.bf16.mxu1 %v8042_v43 }
 0x5e9   :  { %7389 = vmatmul.mubr.bf16.vlgmr.msra.gmra.mxu0 %v3531_v7 }
 0x5ea   :  { %7409 = vmatmul.mubr.bf16.vlgmr.msra.gmra.mxu1 %v3641_v8  ;;  %7413 = vmatpush3.bf16.msra.mxu0 %v8034_v6 }
 0x5eb   :  { %7428 = vmatprep.mubr.msk.bf16.mxu0 %vm8209_vm0, %v8208_v0  ;;  %7414 = vmatprep.subr.bf16.mxu0 %v8208_v0 }
 0x5ec   :  { %7433 = vmatpush3.bf16.msra.mxu1 %v8042_v43 }
 0x5ed   :  { %7434 = vmatprep.subr.bf16.mxu1 %v8044_v48 }
 0x5ee   :  { %7415 = vmatpush3.bf16.msra.mxu0 %v8035_v10 }
 0x5ef   :  { %7416 = vmatprep.subr.bf16.mxu0 %v8208_v0 }
 0x5f0   :  { %7435 = vmatpush3.bf16.msra.mxu1 %v8044_v48 }
 0x5f1   :  { %7436 = vmatprep.subr.bf16.mxu1 %v8046_v51 }
 0x5f2   :  { %7417 = vmatpush3.bf16.msra.mxu0 %v8036_v11 }
 0x5f3   :  { %7418 = vmatprep.subr.bf16.mxu0 %v8208_v0 }
 0x5f4   :  { %7437 = vmatpush3.bf16.msra.mxu1 %v8046_v51 }
 0x5f5   :  { %7438 = vmatprep.subr.bf16.mxu1 %v8048_v62 }
 0x5f6   :  { %7419 = vmatpush3.bf16.msra.mxu0 %v8037_v17 }
 0x5f7   :  { %7420 = vmatprep.subr.bf16.mxu0 %v8208_v0 }
 0x5f8   :  { %7439 = vmatpush3.bf16.msra.mxu1 %v8048_v62 }
 0x5f9   :  { %7440 = vmatprep.subr.bf16.mxu1 %v8050_v55 }
 0x5fa   :  { %7421 = vmatpush3.bf16.msra.mxu0 %v8038_v22 }
 0x5fb   :  { %7422 = vmatprep.subr.bf16.mxu0 %v8208_v0 }
 0x5fc   :  { %7441 = vmatpush3.bf16.msra.mxu1 %v8050_v55 }
 0x5fd   :  { %7442 = vmatprep.subr.bf16.mxu1 %v8052_v36 }
 0x5fe   :  { %7423 = vmatpush3.bf16.msra.mxu0 %v8039_v23 }
 0x5ff   :  { %7424 = vmatprep.subr.bf16.mxu0 %v8208_v0 }
 0x600   :  { %7443 = vmatpush3.bf16.msra.mxu1 %v8052_v36 }
 0x601   :  { %7444 = vmatprep.subr.bf16.mxu1 %v8054_v40 }
 0x602   :  { %7425 = vmatpush3.bf16.msra.mxu0 %v8040_v24 }
 0x603   :  { %7426 = vmatprep.subr.bf16.mxu0 %v8208_v0 }
 0x604   :  { %7445 = vmatpush3.bf16.msra.mxu1 %v8054_v40 }
 0x605   :  { %7446 = vmatprep.subr.bf16.mxu1 %v8056_v26 }
 0x606   :  { %7427 = vmatpush3.bf16.msra.mxu0 %v8041_v29 }
 0x607   :  { %7452 = vmatprep.subr.bf16.mxu0 %v8043_v31 }
 0x608   :  { %7447 = vmatpush3.bf16.msra.mxu1 %v8056_v26 }
 0x609   :  { %7429 = vmatmul.mubr.bf16.vlgmr.msra.gmra.mxu0 %v3751_v33  ;;  %7472 = vmatprep.subr.bf16.mxu1 %v8058_v45 }
 0x60a   :  { %7453 = vmatpush3.bf16.msra.mxu0 %v8043_v31 }
 0x60b   :  { %7454 = vmatprep.subr.bf16.mxu0 %v8045_v34 }
 0x60e   :  { %7455 = vmatpush3.bf16.msra.mxu0 %v8045_v34 }
 0x60f   :  { %7456 = vmatprep.subr.bf16.mxu0 %v8047_v59 }
 0x612   :  { %7457 = vmatpush3.bf16.msra.mxu0 %v8047_v59 }
 0x613   :  { %7458 = vmatprep.subr.bf16.mxu0 %v8049_v35 }
 0x616   :  { %7459 = vmatpush3.bf16.msra.mxu0 %v8049_v35 }
 0x617   :  { %7460 = vmatprep.subr.bf16.mxu0 %v8051_v38 }
 0x61a   :  { %7461 = vmatpush3.bf16.msra.mxu0 %v8051_v38 }
 0x61b   :  { %7462 = vmatprep.subr.bf16.mxu0 %v8053_v39 }
 0x61e   :  { %7463 = vmatpush3.bf16.msra.mxu0 %v8053_v39 }
 0x61f   :  { %7464 = vmatprep.subr.bf16.mxu0 %v8055_v14 }
 0x622   :  { %7465 = vmatpush3.bf16.msra.mxu0 %v8055_v14 }
 0x623   :  { %7466 = vmatprep.subr.bf16.mxu0 %v8057_v42 }
 0x626   :  { %7467 = vmatpush3.bf16.msra.mxu0 %v8057_v42 }
 0x627   :  { %7492 = vmatprep.subr.bf16.mxu0 %v8059_v41 }
 0x689   :  { %v3433_v44 = vpop.f32.mrf.mxu0 }
 0x68a   :  { %v3522_v46 = vpop.f32.mrf.mxu1 }
 0x68b   :  { %v7350_v49 = vpop.f32.mrf.mxu0  ;;  %v3523_v10 = vadd.f32 %v3522_v46, %v3433_v44 }
 0x68c   :  { %v7370_v54 = vpop.f32.mrf.mxu1 }
 0x68d   :  { %v3436_v27 = vpop.f32.mrf.mxu0 }
 0x68e   :  { %v3525_v56 = vpop.f32.mrf.mxu1 }
 0x68f   :  { %v7351_v57 = vpop.f32.mrf.mxu0  ;;  %v3526_v17 = vadd.f32 %v3525_v56, %v3436_v27 }
 0x690   :  { %v7371_v1 = vpop.f32.mrf.mxu1 }
 0x691   :  { %v8060_v1 = vld [vmem:[#allocation3 + $0x330] sm:$0xff]  }
 0x6a9   :  { %v3630_v3 = vpop.f32.mrf.mxu0 }
 0x6aa   :  { %v3740_v52 = vpop.f32.mrf.mxu1  ;;  %v3637_v11 = vadd.f32 %v3630_v3, %v3523_v10  ;;  %v8062_v3 = vld [vmem:[#allocation3 + $0x328] sm:$0xff]   ;;  %v8072_v10 = vld [vmem:[#allocation3 + $0x300] sm:$0xff]  }
 0x6ab   :  { %v7390_v53 = vpop.f32.mrf.mxu0 }
 0x6ac   :  { %v7410_v4 = vpop.f32.mrf.mxu1  ;;  %v3747_v22 = vadd.f32 %v3740_v52, %v3637_v11  ;;  %v8063_v52 = vld [vmem:[#allocation3 + $0x368] sm:$0xff]   ;;  %v8064_v53 = vld [vmem:[#allocation3 + $0x320] sm:$0xff]  }
 0x6ad   :  { %v3633_v5 = vpop.f32.mrf.mxu0  ;;  %v8065_v4 = vld [vmem:[#allocation3 + $0x360] sm:$0xff]  }
 0x6ae   :  { %v3743_v6 = vpop.f32.mrf.mxu1  ;;  %v3638_v23 = vadd.f32 %v3633_v5, %v3526_v17  ;;  %v8066_v5 = vld [vmem:[#allocation3 + $0x318] sm:$0xff]   ;;  %v8073_v11 = vld [vmem:[#allocation3 + $0x340] sm:$0xff]  }
 0x6af   :  { %v7391_v7 = vpop.f32.mrf.mxu0  ;;  %v8074_v17 = vld [vmem:[#allocation3 + $0x3b8] sm:$0xff]  }
 0x6b0   :  { %v7411_v8 = vpop.f32.mrf.mxu1  ;;  %v3748_v33 = vadd.f32 %v3743_v6, %v3638_v23  ;;  %v8067_v6 = vld [vmem:[#allocation3 + $0x358] sm:$0xff]   ;;  %v8070_v7 = vld [vmem:[#allocation3 + $0x308] sm:$0xff]  }
 0x6b1   :  { %v8071_v8 = vld [vmem:[#allocation3 + $0x348] sm:$0xff]   ;;  %v4227_v23 = vld [vmem:[#allocation2 + $0x13] sm:$0x3] }
 0x6c9   :  { %v3850_v24 = vpop.f32.mrf.mxu0 }
 0x6ca   :  { %v3857_v29 = vadd.f32 %v3850_v24, %v3747_v22 }
 0x6cb   :  { %v7430_v32 = vpop.f32.mrf.mxu0 }
 0x6cc   :  { %v3859_v43 = vadd.f32 %v3857_v29, %v8413_v13 }
 0x6cd   :  { %v3853_v31 = vpop.f32.mrf.mxu0 }
 0x6ce   :  { %v3861_v48 = vmax.f32 %v3859_v43, 0.0  ;;  %v3858_v34 = vadd.f32 %v3853_v31, %v3748_v33  ;;  %v4229_v33 = vpack.c.bf16 %v4227_v23, %v4227_v23  ;;  %v8075_v43 = vld [vmem:[#allocation3 + $0x3b0] sm:$0xff]  }
 0x6cf   :  { %v7431_v51 = vpop.f32.mrf.mxu0 }
 0x6d0   :  { %v3863_v59 = vmul.f32 %v3861_v48, %v8421_v25  ;;  %v3860_v62 = vadd.f32 %v3858_v34, %v8413_v13  ;;  %v8076_v48 = vld [vmem:[#allocation3 + $0x3a8] sm:$0xff]   ;;  %v8077_v34 = vld [vmem:[#allocation3 + $0x3a0] sm:$0xff]   ;;  %v8078_v51 = vld [vmem:[#allocation3 + $0x398] sm:$0xff]  }
 0x6d2   :  { %v3865_v35 = vadd.f32 %v3863_v59, %v8424_v28  ;;  %v3862_v55 = vmax.f32 %v3860_v62, 0.0  ;;  %v8079_v59 = vld [vmem:[#allocation3 + $0x390] sm:$0xff]   ;;  %v8080_v62 = vld [vmem:[#allocation3 + $0x388] sm:$0xff]  }
 0x6d4   :  { %3869 = vst [vmem:[#allocation2 + $0x3] sm:$0xff] %v3865_v35  ;;  %v3864_v38 = vmul.f32 %v3862_v55, %v8421_v25  ;;  %v8061_v25 = vld [vmem:[#allocation3 + $0x370] sm:$0xff]   ;;  %v4347_v55 = vld [vmem:[#allocation2 + $0x14] sm:$0x3] }
 0x6d6   :  { %v3866_v36 = vadd.f32 %v3864_v38, %v8424_v28  ;;  %v4349_v38 = vpack.c.bf16 %v4347_v55, %v4347_v55 }
 0x6d8   :  { %3870 = vst [vmem:[#allocation2 + $0xb] sm:$0xff] %v3866_v36  ;;  %v4228_v28 = vpack.c.bf16 %v3866_v36, %v3865_v35  ;;  %v8081_v35 = vld [vmem:[#allocation3 + $0x380] sm:$0xff]   ;;  %v8082_v36 = vld [vmem:[#allocation3 + $0x438] sm:$0xff]  }
 0x6db   :  { %v3892_v39 = vld [vmem:[#allocation2 + $0x1] sm:$0xff] }
 0x6dc   :  { %v3871_v40 = vld [vmem:[#allocation2] sm:$0xff] }
 0x6dd   :  { %v4105_v56 = vld [vmem:[#allocation2 + $0x2] sm:$0xff] }
 0x6df   :  { %v3893_v14 = vld [vmem:[#allocation2 + $0x9] sm:$0xff]  ;;  %v3894_v42 = vld [vmem:[#allocation2 + $0x11] sm:$0x3] }
 0x6e0   :  { %v3872_v26 = vld [vmem:[#allocation2 + $0x8] sm:$0xff]  ;;  %v3895_v44 = vpack.c.bf16 %v3893_v14, %v3892_v39  ;;  %v3896_v49 = vpack.c.bf16 %v3894_v42, %v3894_v42  ;;  %v3873_v54 = vld [vmem:[#allocation2 + $0x10] sm:$0x3]  ;;  %v4107_v22 = vld [vmem:[#allocation2 + $0x12] sm:$0x3] }
 0x6e1   :  { %v3874_v46 = vpack.c.bf16 %v3872_v26, %v3871_v40  ;;  %v4106_v27 = vld [vmem:[#allocation2 + $0xa] sm:$0xff]  ;;  %v3875_v13 = vpack.c.bf16 %v3873_v54, %v3873_v54  ;;  %v4109_v32 = vpack.c.bf16 %v4107_v22, %v4107_v22  ;;  %v8086_v26 = vld [vmem:[#allocation3 + $0x428] sm:$0xff]  }
 0x6e2   :  { %7448 = vmatprep.mubr.bf16.mxu1 %v3895_v44  ;;  %v4108_v57 = vpack.c.bf16 %v4106_v27, %v4105_v56  ;;  %v4345_v24 = vld [vmem:[#allocation2 + $0x4] sm:$0xff]  ;;  %v4346_v29 = vld [vmem:[#allocation2 + $0xc] sm:$0xff]  ;;  %v8088_v44 = vld [vmem:[#allocation3 + $0x420] sm:$0xff]  }
 0x6e3   :  { %7468 = vmatprep.mubr.bf16.mxu0 %v3874_v46  ;;  %7449 = vmatmul.mubr.bf16.vlgmr.msra.gmra.mxu1 %v3896_v49  ;;  %v4348_v31 = vpack.c.bf16 %v4346_v29, %v4345_v24  ;;  %v8083_v39 = vld [vmem:[#allocation3 + $0x3f8] sm:$0xff]   ;;  %v8084_v40 = vld [vmem:[#allocation3 + $0x430] sm:$0xff]   ;;  %v8087_v42 = vld [vmem:[#allocation3 + $0x3e8] sm:$0xff]  }
 0x6e4   :  { %7469 = vmatmul.mubr.bf16.vlgmr.msra.gmra.mxu0 %v3875_v13  ;;  %7473 = vmatpush3.bf16.msra.mxu1 %v8058_v45  ;;  %v8068_v45 = vld [vmem:[#allocation3 + $0x310] sm:$0xff]   ;;  %v8089_v46 = vld [vmem:[#allocation3 + $0x3e0] sm:$0xff]   ;;  %v8090_v49 = vld [vmem:[#allocation3 + $0x418] sm:$0xff]  }
 0x6e5   :  { %7488 = vmatprep.mubr.bf16.mxu1 %v4108_v57  ;;  %7508 = vmatprep.mubr.bf16.mxu0 %v4228_v28  ;;  %v8085_v14 = vld [vmem:[#allocation3 + $0x3f0] sm:$0xff]   ;;  %v8091_v54 = vld [vmem:[#allocation3 + $0x3d8] sm:$0xff]   ;;  %v8094_v56 = vld [vmem:[#allocation3 + $0x408] sm:$0xff]  }
 0x6e6   :  { %7493 = vmatpush3.bf16.msra.mxu0 %v8059_v41  ;;  %7474 = vmatprep.subr.bf16.mxu1 %v8060_v1  ;;  %v8069_v41 = vld [vmem:[#allocation3 + $0x350] sm:$0xff]   ;;  %v8095_v57 = vld [vmem:[#allocation3 + $0x3c8] sm:$0xff]  }
 0x6e7   :  { %7494 = vmatprep.subr.bf16.mxu0 %v8061_v25  ;;  %v8092_v27 = vld [vmem:[#allocation3 + $0x410] sm:$0xff]  }
 0x6e8   :  { %7475 = vmatpush3.bf16.msra.mxu1 %v8060_v1  ;;  %v8093_v13 = vld [vmem:[#allocation3 + $0x3d0] sm:$0xff]   ;;  %v8096_v1 = vld [vmem:[#allocation3 + $0x400] sm:$0xff]  }
 0x6e9   :  { %7476 = vmatprep.subr.bf16.mxu1 %v8062_v3 }
 0x6ea   :  { %7495 = vmatpush3.bf16.msra.mxu0 %v8061_v25  ;;  %v8097_v25 = vld [vmem:[#allocation3 + $0x3c0] sm:$0xff]  }
 0x6eb   :  { %7496 = vmatprep.subr.bf16.mxu0 %v8063_v52 }
 0x6ec   :  { %7477 = vmatpush3.bf16.msra.mxu1 %v8062_v3 }
 0x6ed   :  { %7478 = vmatprep.subr.bf16.mxu1 %v8064_v53 }
 0x6ee   :  { %7497 = vmatpush3.bf16.msra.mxu0 %v8063_v52 }
 0x6ef   :  { %7498 = vmatprep.subr.bf16.mxu0 %v8065_v4 }
 0x6f0   :  { %7479 = vmatpush3.bf16.msra.mxu1 %v8064_v53 }
 0x6f1   :  { %7480 = vmatprep.subr.bf16.mxu1 %v8066_v5 }
 0x6f2   :  { %7499 = vmatpush3.bf16.msra.mxu0 %v8065_v4 }
 0x6f3   :  { %7500 = vmatprep.subr.bf16.mxu0 %v8067_v6 }
 0x6f4   :  { %7481 = vmatpush3.bf16.msra.mxu1 %v8066_v5 }
 0x6f5   :  { %7482 = vmatprep.subr.bf16.mxu1 %v8068_v45 }
 0x6f6   :  { %7501 = vmatpush3.bf16.msra.mxu0 %v8067_v6 }
 0x6f7   :  { %7502 = vmatprep.subr.bf16.mxu0 %v8069_v41 }
 0x6f8   :  { %7483 = vmatpush3.bf16.msra.mxu1 %v8068_v45 }
 0x6f9   :  { %7484 = vmatprep.subr.bf16.mxu1 %v8070_v7 }
 0x6fa   :  { %7503 = vmatpush3.bf16.msra.mxu0 %v8069_v41 }
 0x6fb   :  { %7504 = vmatprep.subr.bf16.mxu0 %v8071_v8 }
 0x6fc   :  { %7485 = vmatpush3.bf16.msra.mxu1 %v8070_v7 }
 0x6fd   :  { %7486 = vmatprep.subr.bf16.mxu1 %v8072_v10 }
 0x6fe   :  { %7505 = vmatpush3.bf16.msra.mxu0 %v8071_v8 }
 0x6ff   :  { %7506 = vmatprep.subr.bf16.mxu0 %v8073_v11 }
 0x700   :  { %7487 = vmatpush3.bf16.msra.mxu1 %v8072_v10 }
 0x701   :  { %7512 = vmatprep.subr.bf16.mxu1 %v8074_v17 }
 0x702   :  { %7507 = vmatpush3.bf16.msra.mxu0 %v8073_v11 }
 0x703   :  { %7532 = vmatprep.subr.bf16.mxu0 %v8208_v0  ;;  %7489 = vmatmul.mubr.bf16.vlgmr.msra.gmra.mxu1 %v4109_v32 }
 0x704   :  { %7513 = vmatpush3.bf16.msra.mxu1 %v8074_v17  ;;  %7528 = vmatprep.mubr.bf16.mxu1 %v4348_v31 }
 0x705   :  { %7509 = vmatmul.mubr.bf16.vlgmr.msra.gmra.mxu0 %v4229_v33  ;;  %7514 = vmatprep.subr.bf16.mxu1 %v8075_v43 }
 0x706   :  { %7548 = vmatprep.mubr.msk.bf16.mxu0 %vm8209_vm0, %v8208_v0  ;;  %7533 = vmatpush3.bf16.msra.mxu0 %v8082_v36 }
 0x707   :  { %7534 = vmatprep.subr.bf16.mxu0 %v8208_v0 }
 0x708   :  { %7515 = vmatpush3.bf16.msra.mxu1 %v8075_v43 }
 0x709   :  { %7516 = vmatprep.subr.bf16.mxu1 %v8076_v48 }
 0x70a   :  { %7535 = vmatpush3.bf16.msra.mxu0 %v8084_v40 }
 0x70b   :  { %7536 = vmatprep.subr.bf16.mxu0 %v8208_v0 }
 0x70c   :  { %7517 = vmatpush3.bf16.msra.mxu1 %v8076_v48 }
 0x70d   :  { %7518 = vmatprep.subr.bf16.mxu1 %v8077_v34 }
 0x70e   :  { %7537 = vmatpush3.bf16.msra.mxu0 %v8086_v26 }
 0x70f   :  { %7538 = vmatprep.subr.bf16.mxu0 %v8208_v0 }
 0x710   :  { %7519 = vmatpush3.bf16.msra.mxu1 %v8077_v34 }
 0x711   :  { %7520 = vmatprep.subr.bf16.mxu1 %v8078_v51 }
 0x712   :  { %7539 = vmatpush3.bf16.msra.mxu0 %v8088_v44 }
 0x713   :  { %7540 = vmatprep.subr.bf16.mxu0 %v8208_v0 }
 0x714   :  { %7521 = vmatpush3.bf16.msra.mxu1 %v8078_v51 }
 0x715   :  { %7522 = vmatprep.subr.bf16.mxu1 %v8079_v59 }
 0x716   :  { %7541 = vmatpush3.bf16.msra.mxu0 %v8090_v49 }
 0x717   :  { %7542 = vmatprep.subr.bf16.mxu0 %v8208_v0 }
 0x718   :  { %7523 = vmatpush3.bf16.msra.mxu1 %v8079_v59 }
 0x719   :  { %7524 = vmatprep.subr.bf16.mxu1 %v8080_v62 }
 0x71a   :  { %7543 = vmatpush3.bf16.msra.mxu0 %v8092_v27 }
 0x71b   :  { %7544 = vmatprep.subr.bf16.mxu0 %v8208_v0 }
 0x71c   :  { %7525 = vmatpush3.bf16.msra.mxu1 %v8080_v62 }
 0x71d   :  { %7526 = vmatprep.subr.bf16.mxu1 %v8081_v35 }
 0x71e   :  { %7545 = vmatpush3.bf16.msra.mxu0 %v8094_v56 }
 0x71f   :  { %7546 = vmatprep.subr.bf16.mxu0 %v8208_v0 }
 0x720   :  { %7527 = vmatpush3.bf16.msra.mxu1 %v8081_v35 }
 0x721   :  { %7552 = vmatprep.subr.bf16.mxu1 %v8208_v0 }
 0x722   :  { %7547 = vmatpush3.bf16.msra.mxu0 %v8096_v1  ;;  %v8098_v1 = vld [vmem:[#allocation3 + $0x478] sm:$0xff]  }
 0x723   :  { %7529 = vmatmul.mubr.bf16.vlgmr.msra.gmra.mxu1 %v4349_v38  ;;  %7572 = vmatprep.subr.bf16.mxu0 %v8208_v0 }
 0x724   :  { %7568 = vmatprep.mubr.msk.bf16.mxu1 %vm8209_vm0, %v8208_v0  ;;  %7553 = vmatpush3.bf16.msra.mxu1 %v8083_v39 }
 0x725   :  { %7554 = vmatprep.subr.bf16.mxu1 %v8208_v0 }
 0x728   :  { %7555 = vmatpush3.bf16.msra.mxu1 %v8085_v14 }
 0x729   :  { %7556 = vmatprep.subr.bf16.mxu1 %v8208_v0 }
 0x72c   :  { %7557 = vmatpush3.bf16.msra.mxu1 %v8087_v42 }
 0x72d   :  { %7558 = vmatprep.subr.bf16.mxu1 %v8208_v0 }
 0x730   :  { %7559 = vmatpush3.bf16.msra.mxu1 %v8089_v46 }
 0x731   :  { %7560 = vmatprep.subr.bf16.mxu1 %v8208_v0 }
 0x734   :  { %7561 = vmatpush3.bf16.msra.mxu1 %v8091_v54 }
 0x735   :  { %7562 = vmatprep.subr.bf16.mxu1 %v8208_v0 }
 0x738   :  { %7563 = vmatpush3.bf16.msra.mxu1 %v8093_v13 }
 0x739   :  { %7564 = vmatprep.subr.bf16.mxu1 %v8208_v0 }
 0x73c   :  { %7565 = vmatpush3.bf16.msra.mxu1 %v8095_v57 }
 0x73d   :  { %7566 = vmatprep.subr.bf16.mxu1 %v8208_v0 }
 0x740   :  { %7567 = vmatpush3.bf16.msra.mxu1 %v8097_v25  ;;  %v8099_v25 = vld [vmem:[#allocation3 + $0x4b8] sm:$0xff]  }
 0x741   :  { %7592 = vmatprep.subr.bf16.mxu1 %v8208_v0 }
 0x7a3   :  { %v7450_v28 = vpop.f32.mrf.mxu1 }
 0x7a4   :  { %v7470_v3 = vpop.f32.mrf.mxu0 }
 0x7a5   :  { %v3995_v52 = vpop.f32.mrf.mxu1  ;;  %v4100_v22 = vadd.f32 %v7470_v3, %v7450_v28 }
 0x7a6   :  { %v4091_v53 = vpop.f32.mrf.mxu0 }
 0x7a7   :  { %v7451_v4 = vpop.f32.mrf.mxu1  ;;  %v4092_v23 = vadd.f32 %v4091_v53, %v3995_v52 }
 0x7a8   :  { %v7471_v5 = vpop.f32.mrf.mxu0 }
 0x7a9   :  { %v3998_v6 = vpop.f32.mrf.mxu1  ;;  %v8101_v5 = vld [vmem:[#allocation3 + $0x4b0] sm:$0xff]  }
 0x7aa   :  { %v4094_v45 = vpop.f32.mrf.mxu0 }
 0x7ab   :  { %v4095_v33 = vadd.f32 %v4094_v45, %v3998_v6  ;;  %v8104_v6 = vld [vmem:[#allocation3 + $0x460] sm:$0xff]  }
 0x7ac   :  { %v8105_v45 = vld [vmem:[#allocation3 + $0x4a0] sm:$0xff]  }
 0x7c3   :  { %v7490_v41 = vpop.f32.mrf.mxu1 }
 0x7c4   :  { %v4224_v24 = vadd.f32 %v7490_v41, %v4100_v22  ;;  %v8106_v41 = vld [vmem:[#allocation3 + $0x458] sm:$0xff]   ;;  %v8112_v22 = vld [vmem:[#allocation3 + $0x440] sm:$0xff]  }
 0x7c5   :  { %v4208_v7 = vpop.f32.mrf.mxu1  ;;  %v7510_v8 = vpop.f32.mrf.mxu0 }
 0x7c6   :  { %v4222_v29 = vadd.f32 %v4208_v7, %v4092_v23  ;;  %v4344_v43 = vadd.f32 %v7510_v8, %v4224_v24  ;;  %v8107_v7 = vld [vmem:[#allocation3 + $0x498] sm:$0xff]   ;;  %v8108_v8 = vld [vmem:[#allocation3 + $0x450] sm:$0xff]   ;;  %v8113_v23 = vld [vmem:[#allocation3 + $0x480] sm:$0xff]  }
 0x7c7   :  { %v7491_v10 = vpop.f32.mrf.mxu1  ;;  %v4328_v11 = vpop.f32.mrf.mxu0 }
 0x7c8   :  { %v4342_v48 = vadd.f32 %v4328_v11, %v4222_v29  ;;  %v8109_v10 = vld [vmem:[#allocation3 + $0x490] sm:$0xff]   ;;  %v8110_v11 = vld [vmem:[#allocation3 + $0x448] sm:$0xff]  }
 0x7c9   :  { %v7511_v17 = vpop.f32.mrf.mxu0  ;;  %v4211_v32 = vpop.f32.mrf.mxu1 }
 0x7ca   :  { %v4223_v34 = vadd.f32 %v4211_v32, %v4095_v33  ;;  %v8111_v17 = vld [vmem:[#allocation3 + $0x488] sm:$0xff]  }
 0x7cb   :  { %v4331_v59 = vpop.f32.mrf.mxu0 }
 0x7cc   :  { %v4343_v36 = vadd.f32 %v4331_v59, %v4223_v34  ;;  %v8117_v59 = vld [vmem:[#allocation3 + $0x530] sm:$0xff]  }
 0x7e3   :  { %v7530_v31 = vpop.f32.mrf.mxu1 }
 0x7e4   :  { %v4464_v51 = vadd.f32 %v7530_v31, %v4344_v43  ;;  %v8114_v43 = vld [vmem:[#allocation3 + $0x4f8] sm:$0xff]  }
 0x7e5   :  { %v4448_v62 = vpop.f32.mrf.mxu1  ;;  %v8115_v31 = vld [vmem:[#allocation3 + $0x538] sm:$0xff]  }
 0x7e6   :  { %v4467_v35 = vadd.f32 %v4464_v51, %v8469_v12  ;;  %v4462_v55 = vadd.f32 %v4448_v62, %v4342_v48  ;;  %v8116_v51 = vld [vmem:[#allocation3 + $0x4f0] sm:$0xff]   ;;  %v8118_v62 = vld [vmem:[#allocation3 + $0x4e8] sm:$0xff]  }
 0x7e7   :  { %v7531_v38 = vpop.f32.mrf.mxu1 }
 0x7e8   :  { %v4470_v39 = vmax.f32 %v4467_v35, 0.0  ;;  %v4465_v40 = vadd.f32 %v4462_v55, %v8469_v12  ;;  %v8119_v35 = vld [vmem:[#allocation3 + $0x528] sm:$0xff]   ;;  %v8120_v55 = vld [vmem:[#allocation3 + $0x4e0] sm:$0xff]  }
 0x7e9   :  { %v4451_v14 = vpop.f32.mrf.mxu1  ;;  %v8121_v38 = vld [vmem:[#allocation3 + $0x520] sm:$0xff]  }
 0x7ea   :  { %v4473_v26 = vmul.f32 %v4470_v39, %v8481_v30  ;;  %v4468_v42 = vmax.f32 %v4465_v40, 0.0  ;;  %v4463_v44 = vadd.f32 %v4451_v14, %v4343_v36  ;;  %v8122_v36 = vld [vmem:[#allocation3 + $0x4d8] sm:$0xff]   ;;  %v8124_v40 = vld [vmem:[#allocation3 + $0x4d0] sm:$0xff]  }
 0x7eb   :  { %v8123_v39 = vld [vmem:[#allocation3 + $0x518] sm:$0xff]   ;;  %v8125_v14 = vld [vmem:[#allocation3 + $0x510] sm:$0xff]  }
 0x7ec   :  { %v4476_v46 = vadd.f32 %v4473_v26, %v8485_v37  ;;  %v4471_v49 = vmul.f32 %v4468_v42, %v8481_v30  ;;  %v4466_v54 = vadd.f32 %v4463_v44, %v8469_v12  ;;  %v8100_v12 = vld [vmem:[#allocation3 + $0x470] sm:$0xff]   ;;  %v8126_v26 = vld [vmem:[#allocation3 + $0x4c8] sm:$0xff]   ;;  %v8128_v44 = vld [vmem:[#allocation3 + $0x4c0] sm:$0xff]  }
 0x7ed   :  { %v8127_v42 = vld [vmem:[#allocation3 + $0x508] sm:$0xff]  }
 0x7ee   :  { %4479 = vst [vmem:[#allocation2 + $0x10] sm:$0x3] %v4476_v46  ;;  %v4474_v27 = vadd.f32 %v4471_v49, %v8485_v37  ;;  %v4469_v13 = vmax.f32 %v4466_v54, 0.0  ;;  %v8129_v46 = vld [vmem:[#allocation3 + $0x500] sm:$0xff]  }
 0x7f0   :  { %4477 = vst [vmem:[#allocation2] sm:$0xff] %v4474_v27  ;;  %v4472_v56 = vmul.f32 %v4469_v13, %v8481_v30  ;;  %v8102_v30 = vld [vmem:[#allocation3 + $0x468] sm:$0xff]  }
 0x7f2   :  { %v4475_v57 = vadd.f32 %v4472_v56, %v8485_v37  ;;  %v8103_v37 = vld [vmem:[#allocation3 + $0x4a8] sm:$0xff]   ;;  %v8130_v56 = vld [vmem:[#allocation3 + $0x578] sm:$0xff]  }
 0x7f4   :  { %4478 = vst [vmem:[#allocation2 + $0x8] sm:$0xff] %v4475_v57 }
 0x7fb   :  { %v4499_v28 = vld [vmem:[#allocation2 + $0x1] sm:$0xff]  ;;  %v4500_v3 = vld [vmem:[#allocation2 + $0x9] sm:$0xf]  ;;  %v5027_v13 = vld [vmem:[#allocation2 + $0xd] sm:$0xf] }
 0x7fc   :  { %v4481_v52 = vld [vmem:[#allocation2 + $0x8] sm:$0xf]  ;;  %v4501_v53 = vpack.c.bf16 %v4500_v3, %v4499_v28  ;;  %v4917_v54 = vld [vmem:[#allocation2 + $0xc] sm:$0xf]  ;;  %v8132_v28 = vld [vmem:[#allocation3 + $0x568] sm:$0xff]  }
 0x7fd   :  { %v4482_v4 = vpack.c.bf16 %v4481_v52, %v4474_v27  ;;  %v4696_v24 = vld [vmem:[#allocation2 + $0x2] sm:$0xff]  ;;  %v4697_v29 = vld [vmem:[#allocation2 + $0xa] sm:$0xf]  ;;  %v8133_v3 = vld [vmem:[#allocation3 + $0x560] sm:$0xff]  }
 0x7fe   :  { %7549 = vmatmul.mubr.bf16.vlgmr.msra.gmra.mxu0 %v4501_v53  ;;  %v4806_v32 = vld [vmem:[#allocation2 + $0x3] sm:$0xff]  ;;  %v4807_v33 = vld [vmem:[#allocation2 + $0xb] sm:$0xf]  ;;  %v4698_v48 = vpack.c.bf16 %v4697_v29, %v4696_v24  ;;  %v8134_v52 = vld [vmem:[#allocation3 + $0x558] sm:$0xff]  }
 0x7ff   :  { %7569 = vmatmul.mubr.bf16.vlgmr.msra.gmra.mxu1 %v4482_v4  ;;  %7573 = vmatpush3.bf16.msra.mxu0 %v8098_v1  ;;  %v4808_v34 = vpack.c.bf16 %v4807_v33, %v4806_v32  ;;  %v4916_v49 = vld [vmem:[#allocation2 + $0x4] sm:$0xff] }
 0x800   :  { %7593 = vmatpush3.bf16.msra.mxu1 %v8099_v25  ;;  %7574 = vmatprep.subr.bf16.mxu0 %v8208_v0  ;;  %v5026_v27 = vld [vmem:[#allocation2 + $0x5] sm:$0xff]  ;;  %v4918_v57 = vpack.c.bf16 %v4917_v54, %v4916_v49 }
 0x801   :  { %7594 = vmatprep.subr.bf16.mxu1 %v8208_v0  ;;  %7588 = vmatprep.mubr.msk.bf16.mxu0 %vm8209_vm0, %v8208_v0  ;;  %v5028_v1 = vpack.c.bf16 %v5027_v13, %v5026_v27  ;;  %v8131_v25 = vld [vmem:[#allocation3 + $0x570] sm:$0xff]   ;;  %v8136_v4 = vld [vmem:[#allocation3 + $0x548] sm:$0xff]  }
 0x802   :  { %7608 = vmatprep.mubr.msk.bf16.mxu1 %vm8209_vm0, %v8208_v0  ;;  %v8135_v53 = vld [vmem:[#allocation3 + $0x550] sm:$0xff]  }
 0x803   :  { %7575 = vmatpush3.bf16.msra.mxu0 %v8100_v12  ;;  %v8137_v12 = vld [vmem:[#allocation3 + $0x540] sm:$0xff]  }
 0x804   :  { %7595 = vmatpush3.bf16.msra.mxu1 %v8101_v5  ;;  %7576 = vmatprep.subr.bf16.mxu0 %v8208_v0  ;;  %v5136_v5 = vld [vmem:[#allocation2 + $0x6] sm:$0xff] }
 0x805   :  { %7596 = vmatprep.subr.bf16.mxu1 %v8208_v0 }
 0x807   :  { %7577 = vmatpush3.bf16.msra.mxu0 %v8102_v30  ;;  %v5137_v30 = vld [vmem:[#allocation2 + $0xe] sm:$0xf] }
 0x808   :  { %7597 = vmatpush3.bf16.msra.mxu1 %v8103_v37  ;;  %7578 = vmatprep.subr.bf16.mxu0 %v8208_v0  ;;  %v5138_v37 = vpack.c.bf16 %v5137_v30, %v5136_v5 }
 0x809   :  { %7598 = vmatprep.subr.bf16.mxu1 %v8208_v0 }
 0x80b   :  { %7579 = vmatpush3.bf16.msra.mxu0 %v8104_v6  ;;  %v8138_v6 = vld [vmem:[#allocation3 + $0x5b8] sm:$0xff]  }
 0x80c   :  { %7599 = vmatpush3.bf16.msra.mxu1 %v8105_v45  ;;  %7580 = vmatprep.subr.bf16.mxu0 %v8208_v0  ;;  %v8139_v45 = vld [vmem:[#allocation3 + $0x5b0] sm:$0xff]  }
 0x80d   :  { %7600 = vmatprep.subr.bf16.mxu1 %v8208_v0 }
 0x80f   :  { %7581 = vmatpush3.bf16.msra.mxu0 %v8106_v41  ;;  %v8140_v41 = vld [vmem:[#allocation3 + $0x5a8] sm:$0xff]  }
 0x810   :  { %7601 = vmatpush3.bf16.msra.mxu1 %v8107_v7  ;;  %7582 = vmatprep.subr.bf16.mxu0 %v8208_v0  ;;  %v8141_v7 = vld [vmem:[#allocation3 + $0x5a0] sm:$0xff]  }
 0x811   :  { %7602 = vmatprep.subr.bf16.mxu1 %v8208_v0 }
 0x813   :  { %7583 = vmatpush3.bf16.msra.mxu0 %v8108_v8  ;;  %v8142_v8 = vld [vmem:[#allocation3 + $0x598] sm:$0xff]  }
 0x814   :  { %7603 = vmatpush3.bf16.msra.mxu1 %v8109_v10  ;;  %7584 = vmatprep.subr.bf16.mxu0 %v8208_v0  ;;  %v8143_v10 = vld [vmem:[#allocation3 + $0x590] sm:$0xff]  }
 0x815   :  { %7604 = vmatprep.subr.bf16.mxu1 %v8208_v0 }
 0x817   :  { %7585 = vmatpush3.bf16.msra.mxu0 %v8110_v11  ;;  %v8144_v11 = vld [vmem:[#allocation3 + $0x588] sm:$0xff]  }
 0x818   :  { %7605 = vmatpush3.bf16.msra.mxu1 %v8111_v17  ;;  %7586 = vmatprep.subr.bf16.mxu0 %v8208_v0  ;;  %v8145_v17 = vld [vmem:[#allocation3 + $0x580] sm:$0xff]  }
 0x819   :  { %7606 = vmatprep.subr.bf16.mxu1 %v8208_v0 }
 0x81b   :  { %7587 = vmatpush3.bf16.msra.mxu0 %v8112_v22 }
 0x81c   :  { %7607 = vmatpush3.bf16.msra.mxu1 %v8113_v23  ;;  %7612 = vmatprep.subr.bf16.mxu0 %v8208_v0 }
 0x81d   :  { %7632 = vmatprep.subr.bf16.mxu1 %v8208_v0 }
 0x81e   :  { %7589 = vmatmul.mubr.bf16.vlgmr.msra.gmra.mxu0 %v4698_v48 }
 0x81f   :  { %7609 = vmatmul.mubr.bf16.vlgmr.msra.gmra.mxu1 %v4808_v34  ;;  %7613 = vmatpush3.bf16.msra.mxu0 %v8114_v43 }
 0x820   :  { %7633 = vmatpush3.bf16.msra.mxu1 %v8115_v31  ;;  %7614 = vmatprep.subr.bf16.mxu0 %v8208_v0 }
 0x821   :  { %7634 = vmatprep.subr.bf16.mxu1 %v8208_v0  ;;  %7628 = vmatprep.mubr.msk.bf16.mxu0 %vm8209_vm0, %v8208_v0 }
 0x822   :  { %7648 = vmatprep.mubr.msk.bf16.mxu1 %vm8209_vm0, %v8208_v0 }
 0x823   :  { %7615 = vmatpush3.bf16.msra.mxu0 %v8116_v51 }
 0x824   :  { %7635 = vmatpush3.bf16.msra.mxu1 %v8117_v59  ;;  %7616 = vmatprep.subr.bf16.mxu0 %v8208_v0 }
 0x825   :  { %7636 = vmatprep.subr.bf16.mxu1 %v8208_v0 }
 0x827   :  { %7617 = vmatpush3.bf16.msra.mxu0 %v8118_v62 }
 0x828   :  { %7637 = vmatpush3.bf16.msra.mxu1 %v8119_v35  ;;  %7618 = vmatprep.subr.bf16.mxu0 %v8208_v0 }
 0x829   :  { %7638 = vmatprep.subr.bf16.mxu1 %v8208_v0 }
 0x82b   :  { %7619 = vmatpush3.bf16.msra.mxu0 %v8120_v55 }
 0x82c   :  { %7639 = vmatpush3.bf16.msra.mxu1 %v8121_v38  ;;  %7620 = vmatprep.subr.bf16.mxu0 %v8208_v0 }
 0x82d   :  { %7640 = vmatprep.subr.bf16.mxu1 %v8208_v0 }
 0x82f   :  { %7621 = vmatpush3.bf16.msra.mxu0 %v8122_v36 }
 0x830   :  { %7641 = vmatpush3.bf16.msra.mxu1 %v8123_v39  ;;  %7622 = vmatprep.subr.bf16.mxu0 %v8208_v0 }
 0x831   :  { %7642 = vmatprep.subr.bf16.mxu1 %v8208_v0 }
 0x833   :  { %7623 = vmatpush3.bf16.msra.mxu0 %v8124_v40 }
 0x834   :  { %7643 = vmatpush3.bf16.msra.mxu1 %v8125_v14  ;;  %7624 = vmatprep.subr.bf16.mxu0 %v8208_v0 }
 0x835   :  { %7644 = vmatprep.subr.bf16.mxu1 %v8208_v0 }
 0x837   :  { %7625 = vmatpush3.bf16.msra.mxu0 %v8126_v26 }
 0x838   :  { %7645 = vmatpush3.bf16.msra.mxu1 %v8127_v42  ;;  %7626 = vmatprep.subr.bf16.mxu0 %v8208_v0 }
 0x839   :  { %7646 = vmatprep.subr.bf16.mxu1 %v8208_v0 }
 0x83b   :  { %7627 = vmatpush3.bf16.msra.mxu0 %v8128_v44 }
 0x83c   :  { %7647 = vmatpush3.bf16.msra.mxu1 %v8129_v46  ;;  %7652 = vmatprep.subr.bf16.mxu0 %v8208_v0 }
 0x83d   :  { %7672 = vmatprep.subr.bf16.mxu1 %v8208_v0 }
 0x83e   :  { %7629 = vmatmul.mubr.bf16.vlgmr.msra.gmra.mxu0 %v4918_v57 }
 0x83f   :  { %7649 = vmatmul.mubr.bf16.vlgmr.msra.gmra.mxu1 %v5028_v1  ;;  %7653 = vmatpush3.bf16.msra.mxu0 %v8130_v56 }
 0x840   :  { %7668 = vmatprep.mubr.msk.bf16.mxu0 %vm8209_vm0, %v8208_v0  ;;  %7654 = vmatprep.subr.bf16.mxu0 %v8208_v0 }
 0x841   :  { %7688 = vmatprep.mubr.msk.bf16.mxu1 %vm8209_vm0, %v8208_v0  ;;  %7673 = vmatpush3.bf16.msra.mxu1 %v8138_v6 }
 0x842   :  { %7674 = vmatprep.subr.bf16.mxu1 %v8208_v0 }
 0x843   :  { %7655 = vmatpush3.bf16.msra.mxu0 %v8131_v25 }
 0x844   :  { %7656 = vmatprep.subr.bf16.mxu0 %v8208_v0 }
 0x845   :  { %7675 = vmatpush3.bf16.msra.mxu1 %v8139_v45 }
 0x846   :  { %7676 = vmatprep.subr.bf16.mxu1 %v8208_v0 }
 0x847   :  { %7657 = vmatpush3.bf16.msra.mxu0 %v8132_v28 }
 0x848   :  { %7658 = vmatprep.subr.bf16.mxu0 %v8208_v0 }
 0x849   :  { %7677 = vmatpush3.bf16.msra.mxu1 %v8140_v41 }
 0x84a   :  { %7678 = vmatprep.subr.bf16.mxu1 %v8208_v0 }
 0x84b   :  { %7659 = vmatpush3.bf16.msra.mxu0 %v8133_v3 }
 0x84c   :  { %7660 = vmatprep.subr.bf16.mxu0 %v8208_v0 }
 0x84d   :  { %7679 = vmatpush3.bf16.msra.mxu1 %v8141_v7 }
 0x84e   :  { %7680 = vmatprep.subr.bf16.mxu1 %v8208_v0 }
 0x84f   :  { %7661 = vmatpush3.bf16.msra.mxu0 %v8134_v52 }
 0x850   :  { %7662 = vmatprep.subr.bf16.mxu0 %v8208_v0 }
 0x851   :  { %7681 = vmatpush3.bf16.msra.mxu1 %v8142_v8 }
 0x852   :  { %7682 = vmatprep.subr.bf16.mxu1 %v8208_v0 }
 0x853   :  { %7663 = vmatpush3.bf16.msra.mxu0 %v8135_v53 }
 0x854   :  { %7664 = vmatprep.subr.bf16.mxu0 %v8208_v0 }
 0x855   :  { %7683 = vmatpush3.bf16.msra.mxu1 %v8143_v10 }
 0x856   :  { %7684 = vmatprep.subr.bf16.mxu1 %v8208_v0 }
 0x857   :  { %7665 = vmatpush3.bf16.msra.mxu0 %v8136_v4 }
 0x858   :  { %7666 = vmatprep.subr.bf16.mxu0 %v8208_v0 }
 0x859   :  { %7685 = vmatpush3.bf16.msra.mxu1 %v8144_v11 }
 0x85a   :  { %7686 = vmatprep.subr.bf16.mxu1 %v8208_v0 }
 0x85b   :  { %7667 = vmatpush3.bf16.msra.mxu0 %v8137_v12 }
 0x85c   :  { %7692 = vmatprep.subr.bf16.mxu0 %v8208_v0 }
 0x85d   :  { %7687 = vmatpush3.bf16.msra.mxu1 %v8145_v17  ;;  %v8146_v17 = vld [vmem:[#allocation3 + $0x5f8] sm:$0xff]  }
 0x85e   :  { %7669 = vmatmul.mubr.bf16.vlgmr.msra.gmra.mxu0 %v5138_v37  ;;  %7712 = vmatprep.subr.bf16.mxu1 %v8208_v0 }
 0x85f   :  { %7708 = vmatprep.mubr.msk.bf16.mxu0 %vm8209_vm0, %v8208_v0 }
 0x8be   :  { %v4600_v22 = vpop.f32.mrf.mxu0 }
 0x8bf   :  { %v4689_v23 = vpop.f32.mrf.mxu1 }
 0x8c0   :  { %v4690_v24 = vadd.f32 %v4689_v23, %v4600_v22  ;;  %v7550_v29 = vpop.f32.mrf.mxu0  ;;  %v8147_v23 = vld [vmem:[#allocation3 + $0x5f0] sm:$0xff]  }
 0x8c1   :  { %v7570_v32 = vpop.f32.mrf.mxu1  ;;  %v8152_v29 = vld [vmem:[#allocation3 + $0x5c8] sm:$0xff]  }
 0x8c2   :  { %v4603_v33 = vpop.f32.mrf.mxu0  ;;  %v8153_v32 = vld [vmem:[#allocation3 + $0x638] sm:$0xff]  }
 0x8c3   :  { %v4692_v43 = vpop.f32.mrf.mxu1  ;;  %7693 = vmatpush3.bf16.msra.mxu0 %v8153_v32  ;;  %v8165_v32 = vld [vmem:[#allocation3 + $0x660] sm:$0xff]  }
 0x8c4   :  { %v4693_v31 = vadd.f32 %v4692_v43, %v4603_v33  ;;  %v7551_v48 = vpop.f32.mrf.mxu0  ;;  %v8154_v33 = vld [vmem:[#allocation3 + $0x5c0] sm:$0xff]   ;;  %7694 = vmatprep.subr.bf16.mxu0 %v8208_v0  ;;  %v8155_v43 = vld [vmem:[#allocation3 + $0x630] sm:$0xff]  }
 0x8c5   :  { %v7571_v34 = vpop.f32.mrf.mxu1  ;;  %v8157_v48 = vld [vmem:[#allocation3 + $0x620] sm:$0xff]  }
 0x8c6   :  { %v8158_v34 = vld [vmem:[#allocation3 + $0x618] sm:$0xff]  }
 0x8c7   :  { %7695 = vmatpush3.bf16.msra.mxu0 %v8155_v43  ;;  %v8167_v43 = vld [vmem:[#allocation3 + $0x650] sm:$0xff]  }
 0x8c8   :  { %7696 = vmatprep.subr.bf16.mxu0 %v8208_v0 }
 0x8de   :  { %v4797_v51 = vpop.f32.mrf.mxu0 }
 0x8df   :  { %v4907_v59 = vpop.f32.mrf.mxu1  ;;  %v4804_v27 = vadd.f32 %v4797_v51, %v4690_v24  ;;  %v8151_v24 = vld [vmem:[#allocation3 + $0x5d0] sm:$0xff]  }
 0x8e0   :  { %v7590_v62 = vpop.f32.mrf.mxu0  ;;  %v8159_v51 = vld [vmem:[#allocation3 + $0x610] sm:$0xff]  }
 0x8e1   :  { %v7610_v35 = vpop.f32.mrf.mxu1  ;;  %v4914_v13 = vadd.f32 %v4907_v59, %v4804_v27  ;;  %v8160_v59 = vld [vmem:[#allocation3 + $0x608] sm:$0xff]   ;;  %v8161_v62 = vld [vmem:[#allocation3 + $0x600] sm:$0xff]  }
 0x8e2   :  { %v4800_v55 = vpop.f32.mrf.mxu0 }
 0x8e3   :  { %v4910_v38 = vpop.f32.mrf.mxu1  ;;  %v4805_v56 = vadd.f32 %v4800_v55, %v4693_v31  ;;  %v8156_v31 = vld [vmem:[#allocation3 + $0x628] sm:$0xff]  }
 0x8e4   :  { %v7591_v36 = vpop.f32.mrf.mxu0  ;;  %7697 = vmatpush3.bf16.msra.mxu0 %v8156_v31  ;;  %v8168_v31 = vld [vmem:[#allocation3 + $0x648] sm:$0xff]  }
 0x8e5   :  { %v7611_v39 = vpop.f32.mrf.mxu1  ;;  %v4915_v1 = vadd.f32 %v4910_v38, %v4805_v56  ;;  %7698 = vmatprep.subr.bf16.mxu0 %v8208_v0 }
 0x8e8   :  { %7699 = vmatpush3.bf16.msra.mxu0 %v8157_v48  ;;  %v8169_v48 = vld [vmem:[#allocation3 + $0x640] sm:$0xff]  }
 0x8e9   :  { %7700 = vmatprep.subr.bf16.mxu0 %v8208_v0 }
 0x8ec   :  { %7701 = vmatpush3.bf16.msra.mxu0 %v8158_v34  ;;  %v8170_v34 = vld [vmem:[#allocation3 + $0x6b8] sm:$0xff]  }
 0x8ed   :  { %7702 = vmatprep.subr.bf16.mxu0 %v8208_v0 }
 0x8f0   :  { %7703 = vmatpush3.bf16.msra.mxu0 %v8159_v51  ;;  %v8171_v51 = vld [vmem:[#allocation3 + $0x6b0] sm:$0xff]  }
 0x8f1   :  { %7704 = vmatprep.subr.bf16.mxu0 %v8208_v0 }
 0x8f4   :  { %7705 = vmatpush3.bf16.msra.mxu0 %v8160_v59  ;;  %v8172_v59 = vld [vmem:[#allocation3 + $0x6a8] sm:$0xff]  }
 0x8f5   :  { %7706 = vmatprep.subr.bf16.mxu0 %v8208_v0 }
 0x8f8   :  { %7707 = vmatpush3.bf16.msra.mxu0 %v8161_v62  ;;  %v8173_v62 = vld [vmem:[#allocation3 + $0x6a0] sm:$0xff]  }
 0x8f9   :  { %7732 = vmatprep.subr.bf16.mxu0 %v8208_v0 }
 0x8fe   :  { %v5017_v40 = vpop.f32.mrf.mxu0 }
 0x8ff   :  { %v5127_v14 = vpop.f32.mrf.mxu1  ;;  %v5024_v57 = vadd.f32 %v5017_v40, %v4914_v13 }
 0x900   :  { %v7630_v26 = vpop.f32.mrf.mxu0 }
 0x901   :  { %v7650_v42 = vpop.f32.mrf.mxu1  ;;  %v5134_v25 = vadd.f32 %v5127_v14, %v5024_v57 }
 0x902   :  { %v5020_v44 = vpop.f32.mrf.mxu0 }
 0x903   :  { %v5130_v46 = vpop.f32.mrf.mxu1  ;;  %v5025_v28 = vadd.f32 %v5020_v44, %v4915_v1 }
 0x904   :  { %v7631_v49 = vpop.f32.mrf.mxu0 }
 0x905   :  { %v7651_v54 = vpop.f32.mrf.mxu1  ;;  %v5135_v4 = vadd.f32 %v5130_v46, %v5025_v28 }
 0x91e   :  { %v5237_v3 = vpop.f32.mrf.mxu0 }
 0x91f   :  { %v5244_v52 = vadd.f32 %v5237_v3, %v5134_v25 }
 0x920   :  { %v7670_v53 = vpop.f32.mrf.mxu0 }
 0x921   :  { %v5246_v12 = vadd.f32 %v5244_v52, %v8608_v50 }
 0x922   :  { %v5240_v5 = vpop.f32.mrf.mxu0 }
 0x923   :  { %v5248_v30 = vmax.f32 %v5246_v12, 0.0  ;;  %v5245_v37 = vadd.f32 %v5240_v5, %v5135_v4 }
 0x924   :  { %v7671_v6 = vpop.f32.mrf.mxu0 }
 0x925   :  { %v5247_v45 = vadd.f32 %v5245_v37, %v8608_v50  ;;  %v5250_v41 = vmul.f32 %v5248_v30, %v8613_v47  ;;  %v8148_v50 = vld [vmem:[#allocation3 + $0x5e8] sm:$0xff]  }
 0x927   :  { %v5249_v7 = vmax.f32 %v5247_v45, 0.0  ;;  %v5252_v10 = vadd.f32 %v5250_v41, %v8619_v2 }
 0x929   :  { %v5251_v8 = vmul.f32 %v5249_v7, %v8613_v47  ;;  %v8149_v47 = vld [vmem:[#allocation3 + $0x5e0] sm:$0xff]  }
 0x92b   :  { %v5253_v11 = vadd.f32 %v5251_v8, %v8619_v2  ;;  %v8150_v2 = vld [vmem:[#allocation3 + $0x5d8] sm:$0xff]  }
 0x92d   :  { %v5254_v22 = vpack.c.bf16 %v5253_v11, %v5252_v10 }
 0x92f   :  { %7689 = vmatmul.mubr.bf16.vlgmr.msra.gmra.mxu1 %v5254_v22 }
 0x930   :  { %7713 = vmatpush3.bf16.msra.mxu1 %v8146_v17  ;;  %7728 = vmatprep.mubr.msk.bf16.mxu1 %vm8209_vm0, %v8208_v0 }
 0x931   :  { %7714 = vmatprep.subr.bf16.mxu1 %v8208_v0 }
 0x934   :  { %7715 = vmatpush3.bf16.msra.mxu1 %v8147_v23 }
 0x935   :  { %7716 = vmatprep.subr.bf16.mxu1 %v8208_v0 }
 0x938   :  { %7717 = vmatpush3.bf16.msra.mxu1 %v8148_v50 }
 0x939   :  { %7718 = vmatprep.subr.bf16.mxu1 %v8208_v0 }
 0x93c   :  { %7719 = vmatpush3.bf16.msra.mxu1 %v8149_v47 }
 0x93d   :  { %7720 = vmatprep.subr.bf16.mxu1 %v8208_v0 }
 0x940   :  { %7721 = vmatpush3.bf16.msra.mxu1 %v8150_v2  ;;  %v8162_v2 = vld [vmem:[#allocation3 + $0x678] sm:$0xff]  }
 0x941   :  { %7722 = vmatprep.subr.bf16.mxu1 %v8208_v0 }
 0x944   :  { %7723 = vmatpush3.bf16.msra.mxu1 %v8151_v24  ;;  %v8163_v24 = vld [vmem:[#allocation3 + $0x670] sm:$0xff]  }
 0x945   :  { %7724 = vmatprep.subr.bf16.mxu1 %v8208_v0 }
 0x948   :  { %7725 = vmatpush3.bf16.msra.mxu1 %v8152_v29  ;;  %v8164_v29 = vld [vmem:[#allocation3 + $0x668] sm:$0xff]  }
 0x949   :  { %7726 = vmatprep.subr.bf16.mxu1 %v8208_v0 }
 0x94c   :  { %7727 = vmatpush3.bf16.msra.mxu1 %v8154_v33  ;;  %v8166_v33 = vld [vmem:[#allocation3 + $0x658] sm:$0xff]  }
 0x94d   :  { %7752 = vmatprep.subr.bf16.mxu1 %v8208_v0 }
 0x9ef   :  { %v5353_v35 = vpop.f32.mrf.mxu1 }
 0x9f0   :  { %v5354_v38 = vadd.f32 %v5353_v35, %v8679_v16  ;;  %v8174_v35 = vld [vmem:[#allocation3 + $0x698] sm:$0xff]  }
 0x9f1   :  { %v7690_v55 = vpop.f32.mrf.mxu1 }
 0x9f2   :  { %v5368_v42 = vmul.f32 %v5354_v38, %v5354_v38  ;;  %v8175_v55 = vld [vmem:[#allocation3 + $0x690] sm:$0xff]  }
 0x9f3   :  { %v5356_v36 = vpop.f32.mrf.mxu1 }
 0x9f4   :  { %v5357_v39 = vadd.f32 %v5356_v36, %v8679_v16  ;;  %v2739_v16 = vmax.f32 %v2738_v63, 0.0 }
 0x9f5   :  { %v7691_v40 = vpop.f32.mrf.mxu1 }
 0x9f6   :  { %v5360_v14 = vsel %vm2717_vm1, %v5357_v39, 0.0  ;;  %v5369_v26 = vmul.f32 %v5357_v39, %v5357_v39  ;;  %v2740_v4 = vmul.f32 0.09090909, %v2739_v16  ;;  %v8176_v16 = vld [vmem:[#allocation3 + $0x688] sm:$0xff]  }
 0x9f7   :  { %v5361_v44 = vadd.f32 %v5360_v14, %v5354_v38  ;;  %v31_v14 = vld [vmem:[%s8923_s2 + $0x10] sm:$0xf] }
 0x9f8   :  { %v5370_v46 = vsel %vm2717_vm1, %v5369_v26, 0.0  ;;  %8178 = vrsqrt.f32 %v2740_v4  ;;  %vm2743_vm3 = vcmp.eq.f32.partialorder %v2740_v4, inf  ;;  %v2746_v11 = vand.u32 2147483648, %v2740_v4  ;;  %v8182_v26 = vld [vmem:[%s8923_s2 + $0x8] sm:$0xff] }
 0x9f9   :  { %v5362_v49 = vrot.slane %v5361_v44, 4  ;;  %v5371_v54 = vadd.f32 %v5370_v46, %v5368_v42  ;;  %vm2745_vm5 = vcmp.eq.f32.partialorder %v2740_v4, 0.0  ;;  %v5608_v42 = vrot.slane %v8182_v26, %v1798_v15 }
 0x9fa   :  { %v5725_v15 = vrot.slane %v31_v14, %v8333_v20 }
 0x9fb   :  { %v5363_v27 = vadd.f32 %v5362_v49, %v5361_v44  ;;  %v5372_v13 = vrot.slane %v5371_v54, 4  ;;  %v5613_v49 = vrot.slane %v31_v14, %v8330_v19 }
 0x9fd   :  { %v5364_v56 = vrot.slane %v5363_v27, 2  ;;  %v5373_v57 = vadd.f32 %v5372_v13, %v5371_v54 }
 0x9ff   :  { %v5365_v1 = vadd.f32 %v5364_v56, %v5363_v27  ;;  %v5374_v25 = vrot.slane %v5373_v57, 2 }
 0xa01   :  { %v5366_v28 = vrot.slane %v5365_v1, 1  ;;  %v5375_v3 = vadd.f32 %v5374_v25, %v5373_v57 }
 0xa03   :  { %v5367_v52 = vadd.f32 %v5366_v28, %v5365_v1  ;;  %v5376_v53 = vrot.slane %v5375_v3, 1  ;;  %v8177_v28 = vld [vmem:[#allocation3 + $0x680] sm:$0xff]  }
 0xa05   :  { %v5378_v12 = vmul.f32 0.083333336, %v5367_v52  ;;  %v5377_v5 = vadd.f32 %v5376_v53, %v5375_v3  ;;  %v8179_v61 = vpop.eup %8178  ;;  %v5730_v3 = vrot.slane %v31_v14, %v8336_v21 }
 0xa06   :  { %v2742_v63 = vmul.f32 %v8179_v61, %v2740_v4 }
 0xa07   :  { %v5379_v30 = vmul.f32 %v5378_v12, %v5367_v52  ;;  %v5391_v37 = vsel %vm5390_vm2, %v8685_v58, %v5378_v12 }
 0xa08   :  { %v5392_v6 = vpack.c.bf16 %v5391_v37, %v5391_v37  ;;  %v2744_v8 = vsel %vm2743_vm3, %v2740_v4, %v2742_v63  ;;  %v5754_v63 = vrot.slane %v31_v14, %v8409_v9 }
 0xa09   :  { %v5380_v45 = vsub.f32 %v5377_v5, %v5379_v30  ;;  %v2747_v22 = vsel %vm2745_vm5, %v2746_v11, %v2744_v8 }
 0xa0a   :  { %7729 = vmatmul.mubr.bf16.vlgmr.msra.gmra.mxu1 %v5392_v6 }
 0xa0b   :  { %v5381_v41 = vmax.f32 %v5380_v45, 0.0  ;;  %7768 = vmatprep.mubr.msk.bf16.mxu1 %vm8209_vm0, %v8208_v0  ;;  %7753 = vmatpush3.bf16.msra.mxu1 %v8170_v34  ;;  %v8210_v45 = vmov 1966171168  }
 0xa0c   :  { %7754 = vmatprep.subr.bf16.mxu1 %v8208_v0 }
 0xa0d   :  { %v5382_v60 = vmul.f32 0.09090909, %v5381_v41  ;;  %v5845_v41 = vunpack.c.l.s4 %v8210_v45 }
 0xa0f   :  { %8180 = vrsqrt.f32 %v5382_v60  ;;  %vm5385_vm4 = vcmp.eq.f32.partialorder %v5382_v60, inf  ;;  %v5388_v17 = vand.u32 2147483648, %v5382_v60  ;;  %vm5387_vm6 = vcmp.eq.f32.partialorder %v5382_v60, 0.0  ;;  %7755 = vmatpush3.bf16.msra.mxu1 %v8171_v51 }
 0xa10   :  { %7756 = vmatprep.subr.bf16.mxu1 %v8208_v0 }
 0xa13   :  { %7757 = vmatpush3.bf16.msra.mxu1 %v8172_v59 }
 0xa14   :  { %7758 = vmatprep.subr.bf16.mxu1 %v8208_v0 }
 0xa17   :  { %7759 = vmatpush3.bf16.msra.mxu1 %v8173_v62 }
 0xa18   :  { %7760 = vmatprep.subr.bf16.mxu1 %v8208_v0 }
 0xa1b   :  { %7761 = vmatpush3.bf16.msra.mxu1 %v8174_v35 }
 0xa1c   :  { %v8181_v7 = vpop.eup %8180  ;;  %7762 = vmatprep.subr.bf16.mxu1 %v8208_v0 }
 0xa1d   :  { %v5384_v10 = vmul.f32 %v8181_v7, %v5382_v60 }
 0xa1f   :  { %v5386_v58 = vsel %vm5385_vm4, %v5382_v60, %v5384_v10  ;;  %7763 = vmatpush3.bf16.msra.mxu1 %v8175_v55  ;;  %v5846_v60 = vunpack.c.0.s8 %v5845_v41 }
 0xa20   :  { %v5389_v23 = vsel %vm5387_vm6, %v5388_v17, %v5386_v58  ;;  %7764 = vmatprep.subr.bf16.mxu1 %v8208_v0 }
 0xa21   :  { %v5393_v50 = vsel %vm5390_vm2, %v2747_v22, %v5389_v23 }
 0xa22   :  { %v5394_v47 = vpack.c.bf16 %v5393_v50, %v5393_v50 }
 0xa23   :  { %7765 = vmatpush3.bf16.msra.mxu1 %v8176_v16 }
 0xa24   :  { %7709 = vmatmul.mubr.bf16.vlgmr.msra.gmra.mxu0 %v5394_v47  ;;  %7766 = vmatprep.subr.bf16.mxu1 %v8208_v0 }
 0xa25   :  { %7748 = vmatprep.mubr.msk.bf16.mxu0 %vm8209_vm0, %v8208_v0  ;;  %7733 = vmatpush3.bf16.msra.mxu0 %v8162_v2 }
 0xa26   :  { %7734 = vmatprep.subr.bf16.mxu0 %v8208_v0 }
 0xa27   :  { %7767 = vmatpush3.bf16.msra.mxu1 %v8177_v28 }
 0xa29   :  { %7735 = vmatpush3.bf16.msra.mxu0 %v8163_v24 }
 0xa2a   :  { %7736 = vmatprep.subr.bf16.mxu0 %v8208_v0 }
 0xa2d   :  { %7737 = vmatpush3.bf16.msra.mxu0 %v8164_v29 }
 0xa2e   :  { %7738 = vmatprep.subr.bf16.mxu0 %v8208_v0 }
 0xa31   :  { %7739 = vmatpush3.bf16.msra.mxu0 %v8165_v32 }
 0xa32   :  { %7740 = vmatprep.subr.bf16.mxu0 %v8208_v0 }
 0xa35   :  { %7741 = vmatpush3.bf16.msra.mxu0 %v8166_v33 }
 0xa36   :  { %7742 = vmatprep.subr.bf16.mxu0 %v8208_v0 }
 0xa39   :  { %7743 = vmatpush3.bf16.msra.mxu0 %v8167_v43 }
 0xa3a   :  { %7744 = vmatprep.subr.bf16.mxu0 %v8208_v0 }
 0xa3d   :  { %7745 = vmatpush3.bf16.msra.mxu0 %v8168_v31 }
 0xa3e   :  { %7746 = vmatprep.subr.bf16.mxu0 %v8208_v0  ;;  %v5849_v0 = vsub.s32 %v5846_v60, %v8327_v18 }
 0xa41   :  { %7747 = vmatpush3.bf16.msra.mxu0 %v8169_v48 }
 0xaca   :  { %v5599_v38 = vpop.f32.mrf.mxu1 }
 0xacc   :  { %v7730_v36 = vpop.f32.mrf.mxu1 }
 0xace   :  { %v5602_v39 = vpop.f32.mrf.mxu1 }
 0xad0   :  { %v7731_v40 = vpop.f32.mrf.mxu1 }
 0xae4   :  { %v5511_v44 = vpop.f32.mrf.mxu0 }
 0xae5   :  { %v5600_v46 = vadd.f32 %v5599_v38, %v5511_v44 }
 0xae6   :  { %v7710_v54 = vpop.f32.mrf.mxu0 }
 0xae7   :  { %v5609_v27 = vmul.f32 %v5608_v42, %v5600_v46 }
 0xae8   :  { %v5514_v13 = vpop.f32.mrf.mxu0 }
 0xae9   :  { %v5614_v56 = vadd.f32 %v5613_v49, %v5609_v27 }
 0xaea   :  { %v7711_v57 = vpop.f32.mrf.mxu0 }
 0xaeb   :  { %v5615_v1 = vmax.f32 %v5614_v56, 0.0 }
 0xaed   :  { %v5616_v25 = vpack.c.bf16 %v5615_v1, %v5615_v1  ;;  %v5875_v61 = vrot.slane %v5615_v1, %v5849_v0 }
 0xaef   :  { %7749 = vmatmul.mubr.bf16.vlgmr.msra.gmra.mxu0 %v5616_v25  ;;  %v5876_v20 = vcombine.high %v5875_v61, %v5875_v61  ;;  %v5883_v21 = vrot.slane %v5875_v61, %v5849_v0 }
 0xaf1   :  { %v5890_v11 = vrot.slane %v5876_v20, %v5849_v0  ;;  %v5894_v22 = vrot.slane %v5883_v21, %v8330_v19 }
 0xaf3   :  { %v5898_v2 = vrot.slane %v5890_v11, %v8330_v19 }
 0xbaf   :  { %v5716_v52 = vpop.f32.mrf.mxu0 }
 0xbb0   :  { %v5726_v53 = vmul.f32 %v5725_v15, %v5716_v52 }
 0xbb1   :  { %v7750_v4 = vpop.f32.mrf.mxu0 }
 0xbb2   :  { %v5731_v12 = vadd.f32 %v5730_v3, %v5726_v53 }
 0xbb3   :  { %v5719_v5 = vpop.f32.mrf.mxu0 }
 0xbb4   :  { %v5732_v30 = vmax.f32 %v5731_v12, 0.0 }
 0xbb5   :  { %v7751_v37 = vpop.f32.mrf.mxu0 }
 0xbb6   :  { %v5733_v6 = vpack.c.bf16 %v5732_v30, %v5732_v30 }
 0xbb8   :  { %7769 = vmatmul.mubr.bf16.vlgmr.msra.gmra.mxu1 %v5733_v6 }
 0xc78   :  { %v5837_v7 = vpop.f32.mrf.mxu1 }
 0xc79   :  { %v5838_v8 = vadd.f32 %v5837_v7, %v5754_v63 }
 0xc7a   :  { %v7770_v10 = vpop.f32.mrf.mxu1 }
 0xc7b   :  { %v5850_v17 = vrot.slane %v5838_v8, %v5849_v0 }
 0xc7c   :  { %v5840_v58 = vpop.f32.mrf.mxu1 }
 0xc7d   :  { %v5851_v23 = vcombine.high %v5850_v17, %v5850_v17  ;;  %v5858_v50 = vrot.slane %v5850_v17, %v5849_v0 }
 0xc7e   :  { %v7771_v47 = vpop.f32.mrf.mxu1 }
 0xc7f   :  { %v5865_v24 = vrot.slane %v5851_v23, %v5849_v0  ;;  %v5901_v18 = vsel %vm5390_vm2, %v5858_v50, %v5894_v22 }
 0xc80   :  { %5903 = vst [vmem:[%s8924_s3] sm:$0x3] %v5901_v18 }
 0xc81   :  { %v5902_v9 = vsel %vm5390_vm2, %v5865_v24, %v5898_v2 }
 0xc82   :  { %5904 = vst [vmem:[%s8924_s3 + $0x2] sm:$0x3] %v5902_v9 }
 0xc83   :  { %5909 = vsyncpa [#allocation4], 1 }

</bundles_post_ra>
